<compile_context>
chip_gen: v7x
topology: tpu7x:2x2x1
jax: 0.10.0
libtpu: 0.0.40
codegen_flags: <defaults>
</compile_context>

<pallas_src>
import numpy as np
import jax
import jax.numpy as jnp
from jax.experimental import pallas as pl
from jax.experimental.pallas import tpu as pltpu

BN_EPS = 1e-5
VMEM_LIMIT = 48 * 1024 * 1024  # safe on v5e/v6e (128 MiB) and v7x (64 MiB)


# ----------------------------------------------------------------------------
# Precomputed linear operators for adaptive average pool / bilinear upsample.
# ----------------------------------------------------------------------------
def _adaptive_pool_matrix(in_size, out_size):
    """P[i, h] such that pooled[i] = sum_h P[i,h] * x[h]  (AdaptiveAvgPool1d)."""
    m = np.zeros((out_size, in_size), np.float32)
    for i in range(out_size):
        start = (i * in_size) // out_size
        end = -((-(i + 1) * in_size) // out_size)  # ceil((i+1)*in/out)
        m[i, start:end] = 1.0 / float(end - start)
    return m


def _bilinear_upsample_matrix(out_size, in_size):
    """U[o, i] such that up[o] = sum_i U[o,i] * x[i]  (bilinear, align_corners=False)."""
    m = np.zeros((out_size, in_size), np.float32)
    scale = in_size / out_size
    for o in range(out_size):
        src = (o + 0.5) * scale - 0.5
        if src < 0.0:
            src = 0.0
        i0 = int(np.floor(src))
        if i0 > in_size - 1:
            i0 = in_size - 1
        i1 = i0 + 1 if i0 < in_size - 1 else i0
        frac = src - i0
        m[o, i0] += 1.0 - frac
        m[o, i1] += frac
    return m


# ----------------------------------------------------------------------------
# Pallas kernels
# ----------------------------------------------------------------------------
def _pyramid_concat_kernel(x_ref, phw_ref, w1_ref, scale_ref, shift_ref,
                           uhw_ref, o_ref):
    # x_ref:     (1, H, W, C)        bf16
    # phw_ref:   (S, B2, H*W)        bf16   (zero-padded kron(Ph, Pw))
    # w1_ref:    (S, C, Co)          bf16
    # scale/shift: (S, 1, Co)        f32    (folded eval-mode BN)
    # uhw_ref:   (S, H*W, B2)        bf16   (zero-padded kron(Uh, Uw))
    # o_ref:     (1, H, W, C + S*Co) bf16   (concatenated pyramid slab)
    H, W, C = x_ref.shape[1], x_ref.shape[2], x_ref.shape[3]
    S = phw_ref.shape[0]
    Co = w1_ref.shape[2]

    x = x_ref[0]                                   # (H, W, C) bf16
    # identity branch of the pyramid -> channels [0:C]
    o_ref[0, :, :, 0:C] = x

    x_flat = x.reshape(H * W, C)                   # (HW, C), C on lane axis
    for s in range(S):
        # adaptive avg pool as one (B2, HW) @ (HW, C) matmul (f32 accumulate)
        pooled = jnp.dot(phw_ref[s], x_flat,
                         preferred_element_type=jnp.float32)      # (B2, C)
        # 1x1 conv (no bias)
        z = jnp.dot(pooled.astype(jnp.bfloat16), w1_ref[s],
                    preferred_element_type=jnp.float32)           # (B2, Co)
        # eval-mode BN + ReLU (padded kron rows are zeroed by Uhw columns)
        z = jnp.maximum(z * scale_ref[s] + shift_ref[s], 0.0)
        # bilinear upsample (align_corners=False) as one (HW, B2) @ (B2, Co)
        up = jnp.dot(uhw_ref[s], z.astype(jnp.bfloat16),
                     preferred_element_type=jnp.float32)          # (HW, Co)
        o_ref[0, :, :, C + s * Co:C + (s + 1) * Co] = (
            up.reshape(H, W, Co).astype(o_ref.dtype))


def _bottleneck_kernel(x_ref, w_ref, scale_ref, shift_ref, o_ref):
    # x_ref: (1, H, W, Ct) bf16 (UNPADDED; halo handled in VMEM, no HBM pad)
    # w_ref: (3, 3, Ct, Co) bf16     o_ref: (1, H, W, Co) f32
    H, W, Ct = x_ref.shape[1], x_ref.shape[2], x_ref.shape[3]
    Co = o_ref.shape[3]

    x = x_ref[0]                                               # (H, W, Ct)
    zrow = jnp.zeros((1, W + 2, Ct), x.dtype)
    zcol = jnp.zeros((H, 1, Ct), x.dtype)
    xp = jnp.concatenate([zcol, x, zcol], axis=1)              # (H, W+2, Ct)
    xp = jnp.concatenate([zrow, xp, zrow], axis=0)             # (H+2, W+2, Ct)

    acc = jnp.zeros((H, W, Co), jnp.float32)
    for dh in range(3):
        for dw in range(3):
            patch = xp[dh:dh + H, dw:dw + W, :]                # (H, W, Ct)
            acc = acc + jnp.einsum('hwc,co->hwo', patch, w_ref[dh, dw],
                                   preferred_element_type=jnp.float32)
    y = jnp.maximum(acc * scale_ref[...] + shift_ref[...], 0.0)
    o_ref[0] = y.astype(o_ref.dtype)


# ----------------------------------------------------------------------------
# pallas_call wrappers
# ----------------------------------------------------------------------------
def _pyramid_concat_call(x_bf16, phw, w1, scale, shift, uhw):
    N, H, W, C = x_bf16.shape
    S, B2, HW = phw.shape
    Co = w1.shape[2]
    Ct = C + S * Co
    return pl.pallas_call(
        _pyramid_concat_kernel,
        out_shape=jax.ShapeDtypeStruct((N, H, W, Ct), jnp.bfloat16),
        grid=(N,),
        in_specs=[
            pl.BlockSpec((1, H, W, C), lambda n: (n, 0, 0, 0)),
            pl.BlockSpec((S, B2, HW), lambda n: (0, 0, 0)),
            pl.BlockSpec((S, C, Co), lambda n: (0, 0, 0)),
            pl.BlockSpec((S, 1, Co), lambda n: (0, 0, 0)),
            pl.BlockSpec((S, 1, Co), lambda n: (0, 0, 0)),
            pl.BlockSpec((S, HW, B2), lambda n: (0, 0, 0)),
        ],
        out_specs=pl.BlockSpec((1, H, W, Ct), lambda n: (n, 0, 0, 0)),
        compiler_params=pltpu.CompilerParams(
            dimension_semantics=("parallel",),
            vmem_limit_bytes=VMEM_LIMIT),
    )(x_bf16, phw, w1, scale, shift, uhw)


def _bottleneck_call(slab, w, scale, shift):
    N, H, W, Ct = slab.shape
    Co = w.shape[3]
    return pl.pallas_call(
        _bottleneck_kernel,
        out_shape=jax.ShapeDtypeStruct((N, H, W, Co), jnp.float32),
        grid=(N,),
        in_specs=[
            pl.BlockSpec((1, H, W, Ct), lambda n: (n, 0, 0, 0)),
            pl.BlockSpec((3, 3, Ct, Co), lambda n: (0, 0, 0, 0)),
            pl.BlockSpec((1, Co), lambda n: (0, 0)),
            pl.BlockSpec((1, Co), lambda n: (0, 0)),
        ],
        out_specs=pl.BlockSpec((1, H, W, Co), lambda n: (n, 0, 0, 0)),
        compiler_params=pltpu.CompilerParams(
            dimension_semantics=("parallel",),
            vmem_limit_bytes=VMEM_LIMIT),
    )(slab, w, scale, shift)


# ----------------------------------------------------------------------------
# Parameters (deterministic, synthetic) + full forward
# ----------------------------------------------------------------------------
def _bn_fold(gamma, beta, mean, var):
    scale = gamma / jnp.sqrt(var + BN_EPS)
    shift = beta - mean * scale
    return scale.reshape(1, -1), shift.reshape(1, -1)


def init_psp_params(key, in_channels, bin_sizes, H, W):
    out_channels = in_channels // len(bin_sizes)
    c_total = in_channels + out_channels * len(bin_sizes)
    S = len(bin_sizes)
    keys = jax.random.split(key, S + 1)

    # pad kron row/col dim to a sublane-friendly multiple of 8
    b2_max = max(b * b for b in bin_sizes)
    B2 = -(-b2_max // 8) * 8

    stages = []
    phw_np = np.zeros((S, B2, H * W), np.float32)
    uhw_np = np.zeros((S, H * W, B2), np.float32)
    w1_list, scale_list, shift_list = [], [], []
    for s, b in enumerate(bin_sizes):
        k = jax.random.split(keys[s], 5)
        w1 = 0.1 * jax.random.normal(k[0], (in_channels, out_channels), jnp.float32)
        gamma = jax.random.uniform(k[1], (out_channels,), jnp.float32, 0.5, 1.5)
        beta = 0.1 * jax.random.normal(k[2], (out_channels,), jnp.float32)
        mean = 0.1 * jax.random.normal(k[3], (out_channels,), jnp.float32)
        var = jax.random.uniform(k[4], (out_channels,), jnp.float32, 0.5, 1.5)
        scale, shift = _bn_fold(gamma, beta, mean, var)

        ph = _adaptive_pool_matrix(H, b)
        pw = _adaptive_pool_matrix(W, b)
        uh = _bilinear_upsample_matrix(H, b)
        uw = _bilinear_upsample_matrix(W, b)
        phw_np[s, :b * b, :] = np.kron(ph, pw)      # (b*b, H*W)
        uhw_np[s, :, :b * b] = np.kron(uh, uw)      # (H*W, b*b)

        stages.append(dict(ph=jnp.asarray(ph), pw=jnp.asarray(pw),
                           uh=jnp.asarray(uh), uw=jnp.asarray(uw),
                           w1=w1, scale=scale, shift=shift))
        w1_list.append(w1)
        scale_list.append(scale)
        shift_list.append(shift)

    fused = dict(
        phw=jnp.asarray(phw_np, jnp.bfloat16),
        uhw=jnp.asarray(uhw_np, jnp.bfloat16),
        w1=jnp.stack(w1_list).astype(jnp.bfloat16),     # (S, C, Co)
        scale=jnp.stack(scale_list),                    # (S, 1, Co) f32
        shift=jnp.stack(shift_list),                    # (S, 1, Co) f32
    )

    kb = jax.random.split(keys[-1], 5)
    wb = 0.05 * jax.random.normal(kb[0], (3, 3, c_total, out_channels), jnp.float32)
    gamma = jax.random.uniform(kb[1], (out_channels,), jnp.float32, 0.5, 1.5)
    beta = 0.1 * jax.random.normal(kb[2], (out_channels,), jnp.float32)
    mean = 0.1 * jax.random.normal(kb[3], (out_channels,), jnp.float32)
    var = jax.random.uniform(kb[4], (out_channels,), jnp.float32, 0.5, 1.5)
    scale, shift = _bn_fold(gamma, beta, mean, var)
    bottleneck = dict(w=wb, scale=scale, shift=shift)

    return dict(stages=stages, fused=fused, bottleneck=bottleneck)


def psp_forward(x_nchw, params):
    """PSP module forward. Input/output NCHW (PyTorch convention)."""
    N, C, H, W = x_nchw.shape
    x = jnp.transpose(x_nchw, (0, 2, 3, 1)).astype(jnp.bfloat16)   # -> NHWC bf16

    f = params['fused']
    # fused: all pyramid stages + channel concat in one kernel (x read once)
    slab = _pyramid_concat_call(x, f['phw'], f['w1'], f['scale'], f['shift'],
                                f['uhw'])                          # (N,H,W,Ct) bf16

    bp = params['bottleneck']
    out = _bottleneck_call(slab, bp['w'].astype(jnp.bfloat16),
                           bp['scale'], bp['shift'])               # (N,H,W,Co) f32
    return jnp.transpose(out, (0, 3, 1, 2))                        # -> NCHW


# ----------------------------------------------------------------------------
# Plain-JAX f32 reference (separable einsums, no Pallas) for correctness check
# ----------------------------------------------------------------------------
def psp_reference(x_nchw, params):
    x = jnp.transpose(x_nchw, (0, 2, 3, 1)).astype(jnp.float32)
    N, H, W, _ = x.shape
    pyramids = [x]
    for sp in params['stages']:
        a = jnp.einsum('jw,nhwc->njhc', sp['pw'], x)
        p = jnp.einsum('ih,njhc->nijc', sp['ph'], a)
        z = jnp.einsum('nijc,co->nijo', p, sp['w1'])
        z = jnp.maximum(z * sp['scale'] + sp['shift'], 0.0)
        u = jnp.einsum('wj,nijo->nwio', sp['uw'], z)
        y = jnp.einsum('hi,nwio->nhwo', sp['uh'], u)
        pyramids.append(y)
    cat = jnp.concatenate(pyramids, axis=-1)
    cat_p = jnp.pad(cat, ((0, 0), (1, 1), (1, 1), (0, 0)))
    bp = params['bottleneck']
    Co = bp['w'].shape[3]
    acc = jnp.zeros((N, H, W, Co), jnp.float32)
    for dh in range(3):
        for dw in range(3):
            acc = acc + jnp.einsum('nhwc,co->nhwo',
                                   cat_p[:, dh:dh + H, dw:dw + W, :], bp['w'][dh, dw])
    out = jnp.maximum(acc * bp['scale'] + bp['shift'], 0.0)
    return jnp.transpose(out, (0, 3, 1, 2))


# ----------------------------------------------------------------------------
if __name__ == "__main__":
    in_channels = 16
    bin_sizes = (1, 2, 3, 6)
    N, H, W = 2, 16, 16

    root = jax.random.PRNGKey(0)
    k_x, k_p = jax.random.split(root)
    x = jax.random.normal(k_x, (N, in_channels, H, W), jnp.float32)   # NCHW input
    params = init_psp_params(k_p, in_channels, bin_sizes, H, W)

    fwd = jax.jit(psp_forward)
    out = fwd(x, params)
    out = jax.block_until_ready(out)

    ref = jax.block_until_ready(psp_reference(x, params))
    expected_co = in_channels // len(bin_sizes)
    assert out.shape == (N, expected_co, H, W), out.shape
    np.testing.assert_allclose(np.asarray(out, dtype=np.float32), np.asarray(ref),
                               rtol=2e-2, atol=2e-2)

    print("KERNEL_OK")
</pallas_src>

<mosaic_0001>
module attributes {stable_mosaic.version = 11 : i64} {
  func.func @_pyramid_concat_kernel(%arg0: i32, %arg1: memref<1x16x16x16xbf16, #tpu.memory_space<vmem>>, %arg2: memref<4x40x256xbf16, #tpu.memory_space<vmem>>, %arg3: memref<4x16x4xbf16, #tpu.memory_space<vmem>>, %arg4: memref<4x1x4xf32, #tpu.memory_space<vmem>>, %arg5: memref<4x1x4xf32, #tpu.memory_space<vmem>>, %arg6: memref<4x256x40xbf16, #tpu.memory_space<vmem>>, %arg7: memref<1x16x16x32xbf16, #tpu.memory_space<vmem>>) attributes {dimension_semantics = [#tpu.dimension_semantics<parallel>], iteration_bounds = array<i64: 2>, scalar_prefetch = 0 : i64, scratch_operands = 0 : i64, tpu.core_type = #tpu.core_type<tc>, window_params = [{transform_indices = @transform_0, window_bounds = array<i64: 1, 16, 16, 16>}, {pipeline_mode = #tpu.pipeline_mode<synchronous>, transform_indices = @transform_1, window_bounds = array<i64: 4, 40, 256>}, {pipeline_mode = #tpu.pipeline_mode<synchronous>, transform_indices = @transform_2, window_bounds = array<i64: 4, 16, 4>}, {pipeline_mode = #tpu.pipeline_mode<synchronous>, transform_indices = @transform_3, window_bounds = array<i64: 4, 1, 4>}, {pipeline_mode = #tpu.pipeline_mode<synchronous>, transform_indices = @transform_4, window_bounds = array<i64: 4, 1, 4>}, {pipeline_mode = #tpu.pipeline_mode<synchronous>, transform_indices = @transform_5, window_bounds = array<i64: 4, 256, 40>}, {transform_indices = @transform_6, window_bounds = array<i64: 1, 16, 16, 32>}]} {
    %c0 = arith.constant 0 : index
    %c0_0 = arith.constant 0 : index
    %c0_1 = arith.constant 0 : index
    %c0_2 = arith.constant 0 : index
    %0 = vector.load %arg1[%c0, %c0_0, %c0_1, %c0_2] : memref<1x16x16x16xbf16, #tpu.memory_space<vmem>>, vector<1x16x16x16xbf16>
    %1 = vector.shape_cast %0 : vector<1x16x16x16xbf16> to vector<16x16x16xbf16>
    %c0_3 = arith.constant 0 : index
    %c0_4 = arith.constant 0 : index
    %c0_5 = arith.constant 0 : index
    %c0_6 = arith.constant 0 : index
    %2 = vector.load %arg7[%c0_3, %c0_4, %c0_5, %c0_6] : memref<1x16x16x32xbf16, #tpu.memory_space<vmem>>, vector<1x16x16x16xbf16>
    %3 = vector.shape_cast %2 : vector<1x16x16x16xbf16> to vector<16x16x16xbf16>
    %4 = vector.shape_cast %1 : vector<16x16x16xbf16> to vector<1x16x16x16xbf16>
    tpu.vector_store %arg7[%c0_3, %c0_4, %c0_5, %c0_6], %4 {strides = array<i32>} : memref<1x16x16x32xbf16, #tpu.memory_space<vmem>>, vector<1x16x16x16xbf16>,
    %5 = vector.shape_cast %1 : vector<16x16x16xbf16> to vector<256x16xbf16>
    %c0_7 = arith.constant 0 : index
    %c0_8 = arith.constant 0 : index
    %c0_9 = arith.constant 0 : index
    %6 = vector.load %arg2[%c0_7, %c0_8, %c0_9] : memref<4x40x256xbf16, #tpu.memory_space<vmem>>, vector<1x40x256xbf16>
    %7 = vector.shape_cast %6 : vector<1x40x256xbf16> to vector<40x256xbf16>
    %cst = arith.constant dense<0.000000e+00> : vector<40x16xf32>
    %8 = tpu.matmul %7, %5, %cst {dimension_numbers = #tpu.dot_dimension_numbers<[1], [0], [0], [1], [0, 0, 1, 1], [], []>} : vector<40x256xbf16>, vector<256x16xbf16>, vector<40x16xf32> -> vector<40x16xf32>
    %9 = arith.truncf %8 : vector<40x16xf32> to vector<40x16xbf16>
    %c0_10 = arith.constant 0 : index
    %c0_11 = arith.constant 0 : index
    %c0_12 = arith.constant 0 : index
    %10 = vector.load %arg3[%c0_10, %c0_11, %c0_12] : memref<4x16x4xbf16, #tpu.memory_space<vmem>>, vector<1x16x4xbf16>
    %11 = vector.shape_cast %10 : vector<1x16x4xbf16> to vector<16x4xbf16>
    %cst_13 = arith.constant dense<0.000000e+00> : vector<40x4xf32>
    %12 = tpu.matmul %9, %11, %cst_13 {dimension_numbers = #tpu.dot_dimension_numbers<[1], [0], [0], [1], [0, 0, 1, 1], [], []>} : vector<40x16xbf16>, vector<16x4xbf16>, vector<40x4xf32> -> vector<40x4xf32>
    %c0_14 = arith.constant 0 : index
    %c0_15 = arith.constant 0 : index
    %c0_16 = arith.constant 0 : index
    %13 = vector.load %arg4[%c0_14, %c0_15, %c0_16] : memref<4x1x4xf32, #tpu.memory_space<vmem>>, vector<1x1x4xf32>
    %14 = vector.shape_cast %13 : vector<1x1x4xf32> to vector<1x4xf32>
    %15 = vector.broadcast %14 : vector<1x4xf32> to vector<40x4xf32>
    %16 = arith.mulf %12, %15 : vector<40x4xf32>
    %c0_17 = arith.constant 0 : index
    %c0_18 = arith.constant 0 : index
    %c0_19 = arith.constant 0 : index
    %17 = vector.load %arg5[%c0_17, %c0_18, %c0_19] : memref<4x1x4xf32, #tpu.memory_space<vmem>>, vector<1x1x4xf32>
    %18 = vector.shape_cast %17 : vector<1x1x4xf32> to vector<1x4xf32>
    %19 = vector.broadcast %18 : vector<1x4xf32> to vector<40x4xf32>
    %20 = arith.addf %16, %19 : vector<40x4xf32>
    %cst_20 = arith.constant 0.000000e+00 : f32
    %21 = vector.broadcast %cst_20 : f32 to vector<40x4xf32>
    %22 = arith.maximumf %20, %21 : vector<40x4xf32>
    %c0_21 = arith.constant 0 : index
    %c0_22 = arith.constant 0 : index
    %c0_23 = arith.constant 0 : index
    %23 = vector.load %arg6[%c0_21, %c0_22, %c0_23] : memref<4x256x40xbf16, #tpu.memory_space<vmem>>, vector<1x256x40xbf16>
    %24 = vector.shape_cast %23 : vector<1x256x40xbf16> to vector<256x40xbf16>
    %25 = arith.truncf %22 : vector<40x4xf32> to vector<40x4xbf16>
    %cst_24 = arith.constant dense<0.000000e+00> : vector<256x4xf32>
    %26 = tpu.matmul %24, %25, %cst_24 {dimension_numbers = #tpu.dot_dimension_numbers<[1], [0], [0], [1], [0, 0, 1, 1], [], []>} : vector<256x40xbf16>, vector<40x4xbf16>, vector<256x4xf32> -> vector<256x4xf32>
    %27 = vector.shape_cast %26 : vector<256x4xf32> to vector<16x16x4xf32>
    %28 = arith.truncf %27 : vector<16x16x4xf32> to vector<16x16x4xbf16>
    %c0_25 = arith.constant 0 : index
    %c0_26 = arith.constant 0 : index
    %c0_27 = arith.constant 0 : index
    %c16 = arith.constant 16 : index
    %29 = vector.load %arg7[%c0_25, %c0_26, %c0_27, %c16] : memref<1x16x16x32xbf16, #tpu.memory_space<vmem>>, vector<1x16x16x4xbf16>
    %30 = vector.shape_cast %29 : vector<1x16x16x4xbf16> to vector<16x16x4xbf16>
    %31 = vector.shape_cast %28 : vector<16x16x4xbf16> to vector<1x16x16x4xbf16>
    tpu.vector_store %arg7[%c0_25, %c0_26, %c0_27, %c16], %31 {strides = array<i32>} : memref<1x16x16x32xbf16, #tpu.memory_space<vmem>>, vector<1x16x16x4xbf16>,
    %c1 = arith.constant 1 : index
    %c0_28 = arith.constant 0 : index
    %c0_29 = arith.constant 0 : index
    %32 = vector.load %arg2[%c1, %c0_28, %c0_29] : memref<4x40x256xbf16, #tpu.memory_space<vmem>>, vector<1x40x256xbf16>
    %33 = vector.shape_cast %32 : vector<1x40x256xbf16> to vector<40x256xbf16>
    %cst_30 = arith.constant dense<0.000000e+00> : vector<40x16xf32>
    %34 = tpu.matmul %33, %5, %cst_30 {dimension_numbers = #tpu.dot_dimension_numbers<[1], [0], [0], [1], [0, 0, 1, 1], [], []>} : vector<40x256xbf16>, vector<256x16xbf16>, vector<40x16xf32> -> vector<40x16xf32>
    %35 = arith.truncf %34 : vector<40x16xf32> to vector<40x16xbf16>
    %c1_31 = arith.constant 1 : index
    %c0_32 = arith.constant 0 : index
    %c0_33 = arith.constant 0 : index
    %36 = vector.load %arg3[%c1_31, %c0_32, %c0_33] : memref<4x16x4xbf16, #tpu.memory_space<vmem>>, vector<1x16x4xbf16>
    %37 = vector.shape_cast %36 : vector<1x16x4xbf16> to vector<16x4xbf16>
    %cst_34 = arith.constant dense<0.000000e+00> : vector<40x4xf32>
    %38 = tpu.matmul %35, %37, %cst_34 {dimension_numbers = #tpu.dot_dimension_numbers<[1], [0], [0], [1], [0, 0, 1, 1], [], []>} : vector<40x16xbf16>, vector<16x4xbf16>, vector<40x4xf32> -> vector<40x4xf32>
    %c1_35 = arith.constant 1 : index
    %c0_36 = arith.constant 0 : index
    %c0_37 = arith.constant 0 : index
    %39 = vector.load %arg4[%c1_35, %c0_36, %c0_37] : memref<4x1x4xf32, #tpu.memory_space<vmem>>, vector<1x1x4xf32>
    %40 = vector.shape_cast %39 : vector<1x1x4xf32> to vector<1x4xf32>
    %41 = vector.broadcast %40 : vector<1x4xf32> to vector<40x4xf32>
    %42 = arith.mulf %38, %41 : vector<40x4xf32>
    %c1_38 = arith.constant 1 : index
    %c0_39 = arith.constant 0 : index
    %c0_40 = arith.constant 0 : index
    %43 = vector.load %arg5[%c1_38, %c0_39, %c0_40] : memref<4x1x4xf32, #tpu.memory_space<vmem>>, vector<1x1x4xf32>
    %44 = vector.shape_cast %43 : vector<1x1x4xf32> to vector<1x4xf32>
    %45 = vector.broadcast %44 : vector<1x4xf32> to vector<40x4xf32>
    %46 = arith.addf %42, %45 : vector<40x4xf32>
    %cst_41 = arith.constant 0.000000e+00 : f32
    %47 = vector.broadcast %cst_41 : f32 to vector<40x4xf32>
    %48 = arith.maximumf %46, %47 : vector<40x4xf32>
    %c1_42 = arith.constant 1 : index
    %c0_43 = arith.constant 0 : index
    %c0_44 = arith.constant 0 : index
    %49 = vector.load %arg6[%c1_42, %c0_43, %c0_44] : memref<4x256x40xbf16, #tpu.memory_space<vmem>>, vector<1x256x40xbf16>
    %50 = vector.shape_cast %49 : vector<1x256x40xbf16> to vector<256x40xbf16>
    %51 = arith.truncf %48 : vector<40x4xf32> to vector<40x4xbf16>
    %cst_45 = arith.constant dense<0.000000e+00> : vector<256x4xf32>
    %52 = tpu.matmul %50, %51, %cst_45 {dimension_numbers = #tpu.dot_dimension_numbers<[1], [0], [0], [1], [0, 0, 1, 1], [], []>} : vector<256x40xbf16>, vector<40x4xbf16>, vector<256x4xf32> -> vector<256x4xf32>
    %53 = vector.shape_cast %52 : vector<256x4xf32> to vector<16x16x4xf32>
    %54 = arith.truncf %53 : vector<16x16x4xf32> to vector<16x16x4xbf16>
    %c0_46 = arith.constant 0 : index
    %c0_47 = arith.constant 0 : index
    %c0_48 = arith.constant 0 : index
    %c20 = arith.constant 20 : index
    %55 = vector.load %arg7[%c0_46, %c0_47, %c0_48, %c20] : memref<1x16x16x32xbf16, #tpu.memory_space<vmem>>, vector<1x16x16x4xbf16>
    %56 = vector.shape_cast %55 : vector<1x16x16x4xbf16> to vector<16x16x4xbf16>
    %57 = vector.shape_cast %54 : vector<16x16x4xbf16> to vector<1x16x16x4xbf16>
    tpu.vector_store %arg7[%c0_46, %c0_47, %c0_48, %c20], %57 {strides = array<i32>} : memref<1x16x16x32xbf16, #tpu.memory_space<vmem>>, vector<1x16x16x4xbf16>,
    %c2 = arith.constant 2 : index
    %c0_49 = arith.constant 0 : index
    %c0_50 = arith.constant 0 : index
    %58 = vector.load %arg2[%c2, %c0_49, %c0_50] : memref<4x40x256xbf16, #tpu.memory_space<vmem>>, vector<1x40x256xbf16>
    %59 = vector.shape_cast %58 : vector<1x40x256xbf16> to vector<40x256xbf16>
    %cst_51 = arith.constant dense<0.000000e+00> : vector<40x16xf32>
    %60 = tpu.matmul %59, %5, %cst_51 {dimension_numbers = #tpu.dot_dimension_numbers<[1], [0], [0], [1], [0, 0, 1, 1], [], []>} : vector<40x256xbf16>, vector<256x16xbf16>, vector<40x16xf32> -> vector<40x16xf32>
    %61 = arith.truncf %60 : vector<40x16xf32> to vector<40x16xbf16>
    %c2_52 = arith.constant 2 : index
    %c0_53 = arith.constant 0 : index
    %c0_54 = arith.constant 0 : index
    %62 = vector.load %arg3[%c2_52, %c0_53, %c0_54] : memref<4x16x4xbf16, #tpu.memory_space<vmem>>, vector<1x16x4xbf16>
    %63 = vector.shape_cast %62 : vector<1x16x4xbf16> to vector<16x4xbf16>
    %cst_55 = arith.constant dense<0.000000e+00> : vector<40x4xf32>
    %64 = tpu.matmul %61, %63, %cst_55 {dimension_numbers = #tpu.dot_dimension_numbers<[1], [0], [0], [1], [0, 0, 1, 1], [], []>} : vector<40x16xbf16>, vector<16x4xbf16>, vector<40x4xf32> -> vector<40x4xf32>
    %c2_56 = arith.constant 2 : index
    %c0_57 = arith.constant 0 : index
    %c0_58 = arith.constant 0 : index
    %65 = vector.load %arg4[%c2_56, %c0_57, %c0_58] : memref<4x1x4xf32, #tpu.memory_space<vmem>>, vector<1x1x4xf32>
    %66 = vector.shape_cast %65 : vector<1x1x4xf32> to vector<1x4xf32>
    %67 = vector.broadcast %66 : vector<1x4xf32> to vector<40x4xf32>
    %68 = arith.mulf %64, %67 : vector<40x4xf32>
    %c2_59 = arith.constant 2 : index
    %c0_60 = arith.constant 0 : index
    %c0_61 = arith.constant 0 : index
    %69 = vector.load %arg5[%c2_59, %c0_60, %c0_61] : memref<4x1x4xf32, #tpu.memory_space<vmem>>, vector<1x1x4xf32>
    %70 = vector.shape_cast %69 : vector<1x1x4xf32> to vector<1x4xf32>
    %71 = vector.broadcast %70 : vector<1x4xf32> to vector<40x4xf32>
    %72 = arith.addf %68, %71 : vector<40x4xf32>
    %cst_62 = arith.constant 0.000000e+00 : f32
    %73 = vector.broadcast %cst_62 : f32 to vector<40x4xf32>
    %74 = arith.maximumf %72, %73 : vector<40x4xf32>
    %c2_63 = arith.constant 2 : index
    %c0_64 = arith.constant 0 : index
    %c0_65 = arith.constant 0 : index
    %75 = vector.load %arg6[%c2_63, %c0_64, %c0_65] : memref<4x256x40xbf16, #tpu.memory_space<vmem>>, vector<1x256x40xbf16>
    %76 = vector.shape_cast %75 : vector<1x256x40xbf16> to vector<256x40xbf16>
    %77 = arith.truncf %74 : vector<40x4xf32> to vector<40x4xbf16>
    %cst_66 = arith.constant dense<0.000000e+00> : vector<256x4xf32>
    %78 = tpu.matmul %76, %77, %cst_66 {dimension_numbers = #tpu.dot_dimension_numbers<[1], [0], [0], [1], [0, 0, 1, 1], [], []>} : vector<256x40xbf16>, vector<40x4xbf16>, vector<256x4xf32> -> vector<256x4xf32>
    %79 = vector.shape_cast %78 : vector<256x4xf32> to vector<16x16x4xf32>
    %80 = arith.truncf %79 : vector<16x16x4xf32> to vector<16x16x4xbf16>
    %c0_67 = arith.constant 0 : index
    %c0_68 = arith.constant 0 : index
    %c0_69 = arith.constant 0 : index
    %c24 = arith.constant 24 : index
    %81 = vector.load %arg7[%c0_67, %c0_68, %c0_69, %c24] : memref<1x16x16x32xbf16, #tpu.memory_space<vmem>>, vector<1x16x16x4xbf16>
    %82 = vector.shape_cast %81 : vector<1x16x16x4xbf16> to vector<16x16x4xbf16>
    %83 = vector.shape_cast %80 : vector<16x16x4xbf16> to vector<1x16x16x4xbf16>
    tpu.vector_store %arg7[%c0_67, %c0_68, %c0_69, %c24], %83 {strides = array<i32>} : memref<1x16x16x32xbf16, #tpu.memory_space<vmem>>, vector<1x16x16x4xbf16>,
    %c3 = arith.constant 3 : index
    %c0_70 = arith.constant 0 : index
    %c0_71 = arith.constant 0 : index
    %84 = vector.load %arg2[%c3, %c0_70, %c0_71] : memref<4x40x256xbf16, #tpu.memory_space<vmem>>, vector<1x40x256xbf16>
    %85 = vector.shape_cast %84 : vector<1x40x256xbf16> to vector<40x256xbf16>
    %cst_72 = arith.constant dense<0.000000e+00> : vector<40x16xf32>
    %86 = tpu.matmul %85, %5, %cst_72 {dimension_numbers = #tpu.dot_dimension_numbers<[1], [0], [0], [1], [0, 0, 1, 1], [], []>} : vector<40x256xbf16>, vector<256x16xbf16>, vector<40x16xf32> -> vector<40x16xf32>
    %87 = arith.truncf %86 : vector<40x16xf32> to vector<40x16xbf16>
    %c3_73 = arith.constant 3 : index
    %c0_74 = arith.constant 0 : index
    %c0_75 = arith.constant 0 : index
    %88 = vector.load %arg3[%c3_73, %c0_74, %c0_75] : memref<4x16x4xbf16, #tpu.memory_space<vmem>>, vector<1x16x4xbf16>
    %89 = vector.shape_cast %88 : vector<1x16x4xbf16> to vector<16x4xbf16>
    %cst_76 = arith.constant dense<0.000000e+00> : vector<40x4xf32>
    %90 = tpu.matmul %87, %89, %cst_76 {dimension_numbers = #tpu.dot_dimension_numbers<[1], [0], [0], [1], [0, 0, 1, 1], [], []>} : vector<40x16xbf16>, vector<16x4xbf16>, vector<40x4xf32> -> vector<40x4xf32>
    %c3_77 = arith.constant 3 : index
    %c0_78 = arith.constant 0 : index
    %c0_79 = arith.constant 0 : index
    %91 = vector.load %arg4[%c3_77, %c0_78, %c0_79] : memref<4x1x4xf32, #tpu.memory_space<vmem>>, vector<1x1x4xf32>
    %92 = vector.shape_cast %91 : vector<1x1x4xf32> to vector<1x4xf32>
    %93 = vector.broadcast %92 : vector<1x4xf32> to vector<40x4xf32>
    %94 = arith.mulf %90, %93 : vector<40x4xf32>
    %c3_80 = arith.constant 3 : index
    %c0_81 = arith.constant 0 : index
    %c0_82 = arith.constant 0 : index
    %95 = vector.load %arg5[%c3_80, %c0_81, %c0_82] : memref<4x1x4xf32, #tpu.memory_space<vmem>>, vector<1x1x4xf32>
    %96 = vector.shape_cast %95 : vector<1x1x4xf32> to vector<1x4xf32>
    %97 = vector.broadcast %96 : vector<1x4xf32> to vector<40x4xf32>
    %98 = arith.addf %94, %97 : vector<40x4xf32>
    %cst_83 = arith.constant 0.000000e+00 : f32
    %99 = vector.broadcast %cst_83 : f32 to vector<40x4xf32>
    %100 = arith.maximumf %98, %99 : vector<40x4xf32>
    %c3_84 = arith.constant 3 : index
    %c0_85 = arith.constant 0 : index
    %c0_86 = arith.constant 0 : index
    %101 = vector.load %arg6[%c3_84, %c0_85, %c0_86] : memref<4x256x40xbf16, #tpu.memory_space<vmem>>, vector<1x256x40xbf16>
    %102 = vector.shape_cast %101 : vector<1x256x40xbf16> to vector<256x40xbf16>
    %103 = arith.truncf %100 : vector<40x4xf32> to vector<40x4xbf16>
    %cst_87 = arith.constant dense<0.000000e+00> : vector<256x4xf32>
    %104 = tpu.matmul %102, %103, %cst_87 {dimension_numbers = #tpu.dot_dimension_numbers<[1], [0], [0], [1], [0, 0, 1, 1], [], []>} : vector<256x40xbf16>, vector<40x4xbf16>, vector<256x4xf32> -> vector<256x4xf32>
    %105 = vector.shape_cast %104 : vector<256x4xf32> to vector<16x16x4xf32>
    %106 = arith.truncf %105 : vector<16x16x4xf32> to vector<16x16x4xbf16>
    %c0_88 = arith.constant 0 : index
    %c0_89 = arith.constant 0 : index
    %c0_90 = arith.constant 0 : index
    %c28 = arith.constant 28 : index
    %107 = vector.load %arg7[%c0_88, %c0_89, %c0_90, %c28] : memref<1x16x16x32xbf16, #tpu.memory_space<vmem>>, vector<1x16x16x4xbf16>
    %108 = vector.shape_cast %107 : vector<1x16x16x4xbf16> to vector<16x16x4xbf16>
    %109 = vector.shape_cast %106 : vector<16x16x4xbf16> to vector<1x16x16x4xbf16>
    tpu.vector_store %arg7[%c0_88, %c0_89, %c0_90, %c28], %109 {strides = array<i32>} : memref<1x16x16x32xbf16, #tpu.memory_space<vmem>>, vector<1x16x16x4xbf16>,
    return
  }
  func.func @transform_0(%arg0: i32) -> (i32, i32, i32, i32) {
    %c0_i32 = arith.constant 0 : i32
    %c0_i32_0 = arith.constant 0 : i32
    %c0_i32_1 = arith.constant 0 : i32
    %c0_i32_2 = arith.constant 0 : i32
    return %arg0, %c0_i32, %c0_i32_0, %c0_i32_1 : i32, i32, i32, i32
  }
  func.func @transform_1(%arg0: i32) -> (i32, i32, i32) {
    %c0_i32 = arith.constant 0 : i32
    %c0_i32_0 = arith.constant 0 : i32
    %c0_i32_1 = arith.constant 0 : i32
    %c0_i32_2 = arith.constant 0 : i32
    return %c0_i32, %c0_i32_0, %c0_i32_1 : i32, i32, i32
  }
  func.func @transform_2(%arg0: i32) -> (i32, i32, i32) {
    %c0_i32 = arith.constant 0 : i32
    %c0_i32_0 = arith.constant 0 : i32
    %c0_i32_1 = arith.constant 0 : i32
    %c0_i32_2 = arith.constant 0 : i32
    return %c0_i32, %c0_i32_0, %c0_i32_1 : i32, i32, i32
  }
  func.func @transform_3(%arg0: i32) -> (i32, i32, i32) {
    %c0_i32 = arith.constant 0 : i32
    %c0_i32_0 = arith.constant 0 : i32
    %c0_i32_1 = arith.constant 0 : i32
    %c0_i32_2 = arith.constant 0 : i32
    return %c0_i32, %c0_i32_0, %c0_i32_1 : i32, i32, i32
  }
  func.func @transform_4(%arg0: i32) -> (i32, i32, i32) {
    %c0_i32 = arith.constant 0 : i32
    %c0_i32_0 = arith.constant 0 : i32
    %c0_i32_1 = arith.constant 0 : i32
    %c0_i32_2 = arith.constant 0 : i32
    return %c0_i32, %c0_i32_0, %c0_i32_1 : i32, i32, i32
  }
  func.func @transform_5(%arg0: i32) -> (i32, i32, i32) {
    %c0_i32 = arith.constant 0 : i32
    %c0_i32_0 = arith.constant 0 : i32
    %c0_i32_1 = arith.constant 0 : i32
    %c0_i32_2 = arith.constant 0 : i32
    return %c0_i32, %c0_i32_0, %c0_i32_1 : i32, i32, i32
  }
  func.func @transform_6(%arg0: i32) -> (i32, i32, i32, i32) {
    %c0_i32 = arith.constant 0 : i32
    %c0_i32_0 = arith.constant 0 : i32
    %c0_i32_1 = arith.constant 0 : i32
    %c0_i32_2 = arith.constant 0 : i32
    return %arg0, %c0_i32, %c0_i32_0, %c0_i32_1 : i32, i32, i32, i32
  }
}

module attributes {stable_mosaic.version = 11 : i64} {
  func.func @_bottleneck_kernel(%arg0: i32, %arg1: memref<1x16x16x32xbf16, #tpu.memory_space<vmem>>, %arg2: memref<3x3x32x4xbf16, #tpu.memory_space<vmem>>, %arg3: memref<1x4xf32, #tpu.memory_space<vmem>>, %arg4: memref<1x4xf32, #tpu.memory_space<vmem>>, %arg5: memref<1x16x16x4xf32, #tpu.memory_space<vmem>>) attributes {dimension_semantics = [#tpu.dimension_semantics<parallel>], iteration_bounds = array<i64: 2>, scalar_prefetch = 0 : i64, scratch_operands = 0 : i64, tpu.core_type = #tpu.core_type<tc>, window_params = [{transform_indices = @transform_0, window_bounds = array<i64: 1, 16, 16, 32>}, {pipeline_mode = #tpu.pipeline_mode<synchronous>, transform_indices = @transform_1, window_bounds = array<i64: 3, 3, 32, 4>}, {pipeline_mode = #tpu.pipeline_mode<synchronous>, transform_indices = @transform_2, window_bounds = array<i64: 1, 4>}, {pipeline_mode = #tpu.pipeline_mode<synchronous>, transform_indices = @transform_3, window_bounds = array<i64: 1, 4>}, {transform_indices = @transform_4, window_bounds = array<i64: 1, 16, 16, 4>}]} {
    %c0 = arith.constant 0 : index
    %c0_0 = arith.constant 0 : index
    %c0_1 = arith.constant 0 : index
    %c0_2 = arith.constant 0 : index
    %0 = vector.load %arg1[%c0, %c0_0, %c0_1, %c0_2] : memref<1x16x16x32xbf16, #tpu.memory_space<vmem>>, vector<1x16x16x32xbf16>
    %1 = vector.shape_cast %0 : vector<1x16x16x32xbf16> to vector<16x16x32xbf16>
    %cst = arith.constant 0.000000e+00 : bf16
    %2 = vector.broadcast %cst : bf16 to vector<1x18x32xbf16>
    %cst_3 = arith.constant 0.000000e+00 : bf16
    %3 = vector.broadcast %cst_3 : bf16 to vector<16x1x32xbf16>
    %4 = tpu.concatenate %3, %1, %3 in 1 : vector<16x1x32xbf16>, vector<16x16x32xbf16>, vector<16x1x32xbf16> -> vector<16x18x32xbf16>
    %5 = tpu.concatenate %2, %4, %2 in 0 : vector<1x18x32xbf16>, vector<16x18x32xbf16>, vector<1x18x32xbf16> -> vector<18x18x32xbf16>
    %cst_4 = arith.constant 0.000000e+00 : f32
    %6 = vector.broadcast %cst_4 : f32 to vector<16x16x4xf32>
    %7 = vector.extract_strided_slice %5 {offsets = [0, 0, 0], sizes = [16, 16, 32], strides = [1, 1, 1]} : vector<18x18x32xbf16> to vector<16x16x32xbf16>
    %c0_5 = arith.constant 0 : index
    %c0_6 = arith.constant 0 : index
    %c0_7 = arith.constant 0 : index
    %c0_8 = arith.constant 0 : index
    %8 = vector.load %arg2[%c0_5, %c0_6, %c0_7, %c0_8] : memref<3x3x32x4xbf16, #tpu.memory_space<vmem>>, vector<1x1x32x4xbf16>
    %9 = vector.shape_cast %8 : vector<1x1x32x4xbf16> to vector<32x4xbf16>
    "tpu.trace_start"() <{level = 10 : i32, message = "hwc,co->hwo"}> : () -> ()
    %cst_9 = arith.constant dense<0.000000e+00> : vector<16x16x4xf32>
    %10 = tpu.matmul %7, %9, %cst_9 {dimension_numbers = #tpu.dot_dimension_numbers<[2], [0], [0, 1], [1], [0, 0, 0, 1, 1, 1], [], []>} : vector<16x16x32xbf16>, vector<32x4xbf16>, vector<16x16x4xf32> -> vector<16x16x4xf32>
    "tpu.trace_stop"() : () -> ()
    %11 = arith.addf %6, %10 : vector<16x16x4xf32>
    %12 = vector.extract_strided_slice %5 {offsets = [0, 1, 0], sizes = [16, 16, 32], strides = [1, 1, 1]} : vector<18x18x32xbf16> to vector<16x16x32xbf16>
    %c0_10 = arith.constant 0 : index
    %c1 = arith.constant 1 : index
    %c0_11 = arith.constant 0 : index
    %c0_12 = arith.constant 0 : index
    %13 = vector.load %arg2[%c0_10, %c1, %c0_11, %c0_12] : memref<3x3x32x4xbf16, #tpu.memory_space<vmem>>, vector<1x1x32x4xbf16>
    %14 = vector.shape_cast %13 : vector<1x1x32x4xbf16> to vector<32x4xbf16>
    "tpu.trace_start"() <{level = 10 : i32, message = "hwc,co->hwo"}> : () -> ()
    %cst_13 = arith.constant dense<0.000000e+00> : vector<16x16x4xf32>
    %15 = tpu.matmul %12, %14, %cst_13 {dimension_numbers = #tpu.dot_dimension_numbers<[2], [0], [0, 1], [1], [0, 0, 0, 1, 1, 1], [], []>} : vector<16x16x32xbf16>, vector<32x4xbf16>, vector<16x16x4xf32> -> vector<16x16x4xf32>
    "tpu.trace_stop"() : () -> ()
    %16 = arith.addf %11, %15 : vector<16x16x4xf32>
    %17 = vector.extract_strided_slice %5 {offsets = [0, 2, 0], sizes = [16, 16, 32], strides = [1, 1, 1]} : vector<18x18x32xbf16> to vector<16x16x32xbf16>
    %c0_14 = arith.constant 0 : index
    %c2 = arith.constant 2 : index
    %c0_15 = arith.constant 0 : index
    %c0_16 = arith.constant 0 : index
    %18 = vector.load %arg2[%c0_14, %c2, %c0_15, %c0_16] : memref<3x3x32x4xbf16, #tpu.memory_space<vmem>>, vector<1x1x32x4xbf16>
    %19 = vector.shape_cast %18 : vector<1x1x32x4xbf16> to vector<32x4xbf16>
    "tpu.trace_start"() <{level = 10 : i32, message = "hwc,co->hwo"}> : () -> ()
    %cst_17 = arith.constant dense<0.000000e+00> : vector<16x16x4xf32>
    %20 = tpu.matmul %17, %19, %cst_17 {dimension_numbers = #tpu.dot_dimension_numbers<[2], [0], [0, 1], [1], [0, 0, 0, 1, 1, 1], [], []>} : vector<16x16x32xbf16>, vector<32x4xbf16>, vector<16x16x4xf32> -> vector<16x16x4xf32>
    "tpu.trace_stop"() : () -> ()
    %21 = arith.addf %16, %20 : vector<16x16x4xf32>
    %22 = vector.extract_strided_slice %5 {offsets = [1, 0, 0], sizes = [16, 16, 32], strides = [1, 1, 1]} : vector<18x18x32xbf16> to vector<16x16x32xbf16>
    %c1_18 = arith.constant 1 : index
    %c0_19 = arith.constant 0 : index
    %c0_20 = arith.constant 0 : index
    %c0_21 = arith.constant 0 : index
    %23 = vector.load %arg2[%c1_18, %c0_19, %c0_20, %c0_21] : memref<3x3x32x4xbf16, #tpu.memory_space<vmem>>, vector<1x1x32x4xbf16>
    %24 = vector.shape_cast %23 : vector<1x1x32x4xbf16> to vector<32x4xbf16>
    "tpu.trace_start"() <{level = 10 : i32, message = "hwc,co->hwo"}> : () -> ()
    %cst_22 = arith.constant dense<0.000000e+00> : vector<16x16x4xf32>
    %25 = tpu.matmul %22, %24, %cst_22 {dimension_numbers = #tpu.dot_dimension_numbers<[2], [0], [0, 1], [1], [0, 0, 0, 1, 1, 1], [], []>} : vector<16x16x32xbf16>, vector<32x4xbf16>, vector<16x16x4xf32> -> vector<16x16x4xf32>
    "tpu.trace_stop"() : () -> ()
    %26 = arith.addf %21, %25 : vector<16x16x4xf32>
    %27 = vector.extract_strided_slice %5 {offsets = [1, 1, 0], sizes = [16, 16, 32], strides = [1, 1, 1]} : vector<18x18x32xbf16> to vector<16x16x32xbf16>
    %c1_23 = arith.constant 1 : index
    %c1_24 = arith.constant 1 : index
    %c0_25 = arith.constant 0 : index
    %c0_26 = arith.constant 0 : index
    %28 = vector.load %arg2[%c1_23, %c1_24, %c0_25, %c0_26] : memref<3x3x32x4xbf16, #tpu.memory_space<vmem>>, vector<1x1x32x4xbf16>
    %29 = vector.shape_cast %28 : vector<1x1x32x4xbf16> to vector<32x4xbf16>
    "tpu.trace_start"() <{level = 10 : i32, message = "hwc,co->hwo"}> : () -> ()
    %cst_27 = arith.constant dense<0.000000e+00> : vector<16x16x4xf32>
    %30 = tpu.matmul %27, %29, %cst_27 {dimension_numbers = #tpu.dot_dimension_numbers<[2], [0], [0, 1], [1], [0, 0, 0, 1, 1, 1], [], []>} : vector<16x16x32xbf16>, vector<32x4xbf16>, vector<16x16x4xf32> -> vector<16x16x4xf32>
    "tpu.trace_stop"() : () -> ()
    %31 = arith.addf %26, %30 : vector<16x16x4xf32>
    %32 = vector.extract_strided_slice %5 {offsets = [1, 2, 0], sizes = [16, 16, 32], strides = [1, 1, 1]} : vector<18x18x32xbf16> to vector<16x16x32xbf16>
    %c1_28 = arith.constant 1 : index
    %c2_29 = arith.constant 2 : index
    %c0_30 = arith.constant 0 : index
    %c0_31 = arith.constant 0 : index
    %33 = vector.load %arg2[%c1_28, %c2_29, %c0_30, %c0_31] : memref<3x3x32x4xbf16, #tpu.memory_space<vmem>>, vector<1x1x32x4xbf16>
    %34 = vector.shape_cast %33 : vector<1x1x32x4xbf16> to vector<32x4xbf16>
    "tpu.trace_start"() <{level = 10 : i32, message = "hwc,co->hwo"}> : () -> ()
    %cst_32 = arith.constant dense<0.000000e+00> : vector<16x16x4xf32>
    %35 = tpu.matmul %32, %34, %cst_32 {dimension_numbers = #tpu.dot_dimension_numbers<[2], [0], [0, 1], [1], [0, 0, 0, 1, 1, 1], [], []>} : vector<16x16x32xbf16>, vector<32x4xbf16>, vector<16x16x4xf32> -> vector<16x16x4xf32>
    "tpu.trace_stop"() : () -> ()
    %36 = arith.addf %31, %35 : vector<16x16x4xf32>
    %37 = vector.extract_strided_slice %5 {offsets = [2, 0, 0], sizes = [16, 16, 32], strides = [1, 1, 1]} : vector<18x18x32xbf16> to vector<16x16x32xbf16>
    %c2_33 = arith.constant 2 : index
    %c0_34 = arith.constant 0 : index
    %c0_35 = arith.constant 0 : index
    %c0_36 = arith.constant 0 : index
    %38 = vector.load %arg2[%c2_33, %c0_34, %c0_35, %c0_36] : memref<3x3x32x4xbf16, #tpu.memory_space<vmem>>, vector<1x1x32x4xbf16>
    %39 = vector.shape_cast %38 : vector<1x1x32x4xbf16> to vector<32x4xbf16>
    "tpu.trace_start"() <{level = 10 : i32, message = "hwc,co->hwo"}> : () -> ()
    %cst_37 = arith.constant dense<0.000000e+00> : vector<16x16x4xf32>
    %40 = tpu.matmul %37, %39, %cst_37 {dimension_numbers = #tpu.dot_dimension_numbers<[2], [0], [0, 1], [1], [0, 0, 0, 1, 1, 1], [], []>} : vector<16x16x32xbf16>, vector<32x4xbf16>, vector<16x16x4xf32> -> vector<16x16x4xf32>
    "tpu.trace_stop"() : () -> ()
    %41 = arith.addf %36, %40 : vector<16x16x4xf32>
    %42 = vector.extract_strided_slice %5 {offsets = [2, 1, 0], sizes = [16, 16, 32], strides = [1, 1, 1]} : vector<18x18x32xbf16> to vector<16x16x32xbf16>
    %c2_38 = arith.constant 2 : index
    %c1_39 = arith.constant 1 : index
    %c0_40 = arith.constant 0 : index
    %c0_41 = arith.constant 0 : index
    %43 = vector.load %arg2[%c2_38, %c1_39, %c0_40, %c0_41] : memref<3x3x32x4xbf16, #tpu.memory_space<vmem>>, vector<1x1x32x4xbf16>
    %44 = vector.shape_cast %43 : vector<1x1x32x4xbf16> to vector<32x4xbf16>
    "tpu.trace_start"() <{level = 10 : i32, message = "hwc,co->hwo"}> : () -> ()
    %cst_42 = arith.constant dense<0.000000e+00> : vector<16x16x4xf32>
    %45 = tpu.matmul %42, %44, %cst_42 {dimension_numbers = #tpu.dot_dimension_numbers<[2], [0], [0, 1], [1], [0, 0, 0, 1, 1, 1], [], []>} : vector<16x16x32xbf16>, vector<32x4xbf16>, vector<16x16x4xf32> -> vector<16x16x4xf32>
    "tpu.trace_stop"() : () -> ()
    %46 = arith.addf %41, %45 : vector<16x16x4xf32>
    %47 = vector.extract_strided_slice %5 {offsets = [2, 2, 0], sizes = [16, 16, 32], strides = [1, 1, 1]} : vector<18x18x32xbf16> to vector<16x16x32xbf16>
    %c2_43 = arith.constant 2 : index
    %c2_44 = arith.constant 2 : index
    %c0_45 = arith.constant 0 : index
    %c0_46 = arith.constant 0 : index
    %48 = vector.load %arg2[%c2_43, %c2_44, %c0_45, %c0_46] : memref<3x3x32x4xbf16, #tpu.memory_space<vmem>>, vector<1x1x32x4xbf16>
    %49 = vector.shape_cast %48 : vector<1x1x32x4xbf16> to vector<32x4xbf16>
    "tpu.trace_start"() <{level = 10 : i32, message = "hwc,co->hwo"}> : () -> ()
    %cst_47 = arith.constant dense<0.000000e+00> : vector<16x16x4xf32>
    %50 = tpu.matmul %47, %49, %cst_47 {dimension_numbers = #tpu.dot_dimension_numbers<[2], [0], [0, 1], [1], [0, 0, 0, 1, 1, 1], [], []>} : vector<16x16x32xbf16>, vector<32x4xbf16>, vector<16x16x4xf32> -> vector<16x16x4xf32>
    "tpu.trace_stop"() : () -> ()
    %51 = arith.addf %46, %50 : vector<16x16x4xf32>
    %c0_48 = arith.constant 0 : index
    %c0_49 = arith.constant 0 : index
    %52 = vector.load %arg3[%c0_48, %c0_49] : memref<1x4xf32, #tpu.memory_space<vmem>>, vector<1x4xf32>
    %53 = vector.shape_cast %52 : vector<1x4xf32> to vector<1x1x4xf32>
    %54 = vector.broadcast %53 : vector<1x1x4xf32> to vector<16x16x4xf32>
    %55 = arith.mulf %51, %54 : vector<16x16x4xf32>
    %c0_50 = arith.constant 0 : index
    %c0_51 = arith.constant 0 : index
    %56 = vector.load %arg4[%c0_50, %c0_51] : memref<1x4xf32, #tpu.memory_space<vmem>>, vector<1x4xf32>
    %57 = vector.shape_cast %56 : vector<1x4xf32> to vector<1x1x4xf32>
    %58 = vector.broadcast %57 : vector<1x1x4xf32> to vector<16x16x4xf32>
    %59 = arith.addf %55, %58 : vector<16x16x4xf32>
    %cst_52 = arith.constant 0.000000e+00 : f32
    %60 = vector.broadcast %cst_52 : f32 to vector<16x16x4xf32>
    %61 = arith.maximumf %59, %60 : vector<16x16x4xf32>
    %c0_53 = arith.constant 0 : index
    %c0_54 = arith.constant 0 : index
    %c0_55 = arith.constant 0 : index
    %c0_56 = arith.constant 0 : index
    %62 = vector.load %arg5[%c0_53, %c0_54, %c0_55, %c0_56] : memref<1x16x16x4xf32, #tpu.memory_space<vmem>>, vector<1x16x16x4xf32>
    %63 = vector.shape_cast %62 : vector<1x16x16x4xf32> to vector<16x16x4xf32>
    %64 = vector.shape_cast %61 : vector<16x16x4xf32> to vector<1x16x16x4xf32>
    tpu.vector_store %arg5[%c0_53, %c0_54, %c0_55, %c0_56], %64 {strides = array<i32>} : memref<1x16x16x4xf32, #tpu.memory_space<vmem>>, vector<1x16x16x4xf32>,
    return
  }
  func.func @transform_0(%arg0: i32) -> (i32, i32, i32, i32) {
    %c0_i32 = arith.constant 0 : i32
    %c0_i32_0 = arith.constant 0 : i32
    %c0_i32_1 = arith.constant 0 : i32
    %c0_i32_2 = arith.constant 0 : i32
    return %arg0, %c0_i32, %c0_i32_0, %c0_i32_1 : i32, i32, i32, i32
  }
  func.func @transform_1(%arg0: i32) -> (i32, i32, i32, i32) {
    %c0_i32 = arith.constant 0 : i32
    %c0_i32_0 = arith.constant 0 : i32
    %c0_i32_1 = arith.constant 0 : i32
    %c0_i32_2 = arith.constant 0 : i32
    %c0_i32_3 = arith.constant 0 : i32
    return %c0_i32, %c0_i32_0, %c0_i32_1, %c0_i32_2 : i32, i32, i32, i32
  }
  func.func @transform_2(%arg0: i32) -> (i32, i32) {
    %c0_i32 = arith.constant 0 : i32
    %c0_i32_0 = arith.constant 0 : i32
    %c0_i32_1 = arith.constant 0 : i32
    return %c0_i32, %c0_i32_0 : i32, i32
  }
  func.func @transform_3(%arg0: i32) -> (i32, i32) {
    %c0_i32 = arith.constant 0 : i32
    %c0_i32_0 = arith.constant 0 : i32
    %c0_i32_1 = arith.constant 0 : i32
    return %c0_i32, %c0_i32_0 : i32, i32
  }
  func.func @transform_4(%arg0: i32) -> (i32, i32, i32, i32) {
    %c0_i32 = arith.constant 0 : i32
    %c0_i32_0 = arith.constant 0 : i32
    %c0_i32_1 = arith.constant 0 : i32
    %c0_i32_2 = arith.constant 0 : i32
    return %arg0, %c0_i32, %c0_i32_0, %c0_i32_1 : i32, i32, i32, i32
  }
}

</mosaic_0001>

<bundles_post_ra>
// kernel: psp_forward.3
= control target key start
LH: loop header
LB: loop body
LE: loop exit
PB: predicated region body
PF: predicated region fallthrough
CT: control target
= control target key end

     0   :  { %s3981_s15 = smov 0   ;;  %s4862_s0 = inlined_call_operand.vmem [shape: bf16[2,16,16,32], index: 0, kind: input, shape index: {}]   ;;  %s4863_s1 = inlined_call_operand.vmem [shape: bf16[3,3,32,4], index: 1, kind: input, shape index: {}]   ;;  %s4864_s2 = inlined_call_operand.vmem [shape: f32[1,4], index: 2, kind: input, shape index: {}]   ;;  %s4865_s3 = inlined_call_operand.vmem [shape: f32[1,4], index: 3, kind: input, shape index: {}]   ;;  %s4866_s4 = inlined_call_operand.vmem [shape: f32[2,16,16,4], index: 4, kind: output, shape index: {}]  }
   0x1 LB: > { %s2935_s16 = sadd.s32 4294967295, %s3953_s15   ;;  %p2939_p0 = scmp.ge.s32.totalorder %s3953_s15, 1  ;;  %s3953_s15 = sphi %s3981_s15, %s14_s15  }
   0x2   : > { %p162_p1 = scmp.lt.s32.totalorder %s3953_s15, 3 }
   0x4   : > { %p163_p2 = pnand %p2939_p0, %p162_p1 }
   0x6   : > { %166 = sbr.rel (%p163_p2) target bundleno = 538 (0x21a), region = 36 }
   0xd   : > { %v3913_v0 = vld [vmem:[%s4863_s1 + $0x10] sm:$0xff]   ;;  %v3995_v1 = vld [vmem:[%s4863_s1 + $0x40] sm:$0xff]   ;;  %v4867_v2 = vmov 0   ;;  %v3915_v4 = vld [vmem:[%s4863_s1 + $0x18] sm:$0xff]   ;;  %vm700_vm0 = vcmask 261120   ;;  %p188_p3 = scmp.lt.s32.totalorder %s2935_s16, 1 }
   0xe   : > { %v3998_v3 = vrot.slane %v4867_v2, 1  ;;  %3320 = vmatprep.subr.bf16.mxu1 %v3913_v0  ;;  %3464 = vmatprep.subr.bf16.mxu0 %v3995_v1  ;;  %v4007_v5 = vld [vmem:[%s4863_s1 + $0x48] sm:$0xff]   ;;  %v4013_v6 = vld [vmem:[%s4863_s1] sm:$0xff]   ;;  %v4023_v7 = vld [vmem:[%s4863_s1 + $0x50] sm:$0xff]   ;;  %vm456_vm1 = vsmask.f32 256 }
   0xf   : > { %3321 = vmatpush3.bf16.msra.mxu1 %v3913_v0  ;;  %4871 = vst [vmem:[#allocation2_spill] sm:$0xff] %v4007_v5  ;;  %3465 = vmatpush3.bf16.msra.mxu0 %v3995_v1  ;;  %s4877_s16 = smov (!%p188_p3, %s2935_s16), 1  ;;  %vm455_vm2 = vcmask 1040384   ;;  %vm499_vm3 = vsmask.f32 7424  ;;  %v3924_v55 = vld [vmem:[%s4863_s1 + $0x58] sm:$0xff]  }
  0x10   : > { %3322 = vmatprep.subr.bf16.mxu1 %v3915_v4  ;;  %3466 = vmatprep.subr.bf16.mxu0 %v4007_v5  ;;  %s3156_s29 = sshll.u32 %s4877_s16, 7  ;;  %vm4042_vm4 = vmand %vm455_vm2, %vm456_vm1  ;;  %v3929_v61 = vld [vmem:[%s4863_s1 + $0x8] sm:$0xff]   ;;  %vm1151_vm5 = vcmask 1046528   ;;  %s3157_s11 = sshll.u32 %s4877_s16, 8  ;;  %vm2847_vm6 = vcmask 31744  }
  0x11   : > { %3324 = vmatprep.mubr.msk.bf16.mxu1 %vm700_vm0, %v3998_v3  ;;  %s4030_s6 = scalar_lea.vmem %s4862_s0, %s3156_s29  ;;  %s4727_s14 = scalar_lea.vmem %s4866_s4, %s3157_s11 }
  0x12   : > { %v3917_v8 = vld [vmem:[%s4030_s6] sm:$0xff]   ;;  %v3920_v9 = vld [vmem:[%s4030_s6 + $0x8] sm:$0xff]   ;;  %v3921_v14 = vld [vmem:[%s4030_s6 + $0x10] sm:$0xff]  }
  0x13   : > { %3323 = vmatpush3.bf16.msra.mxu1 %v3915_v4  ;;  %3467 = vmatpush3.bf16.msra.mxu0 %v4007_v5  ;;  %v312_v10 = vshrl.u32 %v3917_v8, 16  ;;  %v315_v11 = vshll.u32 %v3917_v8, 16  ;;  %v319_v12 = vshrl.u32 %v3920_v9, 16  ;;  %v322_v13 = vshll.u32 %v3920_v9, 16  ;;  %v3922_v15 = vld [vmem:[%s4030_s6 + $0x18] sm:$0xff]   ;;  %v4039_v17 = vld [vmem:[%s4030_s6 + $0x20] sm:$0xff]  }
  0x14   : > { %3356 = vmatprep.subr.bf16.mxu1 %v4013_v6  ;;  %3500 = vmatprep.subr.bf16.mxu0 %v4023_v7  ;;  %v326_v20 = vshrl.u32 %v3921_v14, 16  ;;  %v333_v21 = vshrl.u32 %v3922_v15, 16  ;;  %v329_v24 = vshll.u32 %v3921_v14, 16  ;;  %v336_v25 = vshll.u32 %v3922_v15, 16  ;;  %v3925_v46 = vld [vmem:[%s4030_s6 + $0x28] sm:$0xff]   ;;  %v3926_v56 = vld [vmem:[%s4030_s6 + $0x30] sm:$0xff]  }
  0x15   : > { %v314_v16 = vrot.slane %v312_v10, 7  ;;  %v321_v19 = vrot.slane %v319_v12, 7  ;;  %v340_v33 = vshrl.u32 %v4039_v17, 16  ;;  %v4101_v8 = vld [vmem:[%s4030_s6 + $0x38] sm:$0xff]   ;;  %v347_v12 = vshrl.u32 %v3925_v46, 16 }
  0x16   : > { %v328_v29 = vrot.slane %v326_v20, 7  ;;  %v335_v32 = vrot.slane %v333_v21, 7  ;;  %v350_v15 = vshll.u32 %v3925_v46, 16 }
  0x17   : > { %v317_v22 = vor.u32 %v315_v11, %v314_v16  ;;  %v4048_v23 = vsel %vm4042_vm4, %v314_v16, 0  ;;  %v324_v27 = vor.u32 %v322_v13, %v321_v19  ;;  %v4053_v28 = vsel %vm4042_vm4, %v321_v19, 0 }
  0x18   : > { %v516_v26 = vshll.u32 %v4048_v23, 16  ;;  %v528_v31 = vshll.u32 %v4053_v28, 16  ;;  %v331_v41 = vor.u32 %v329_v24, %v328_v29  ;;  %v4071_v43 = vsel %vm4042_vm4, %v328_v29, 0 }
  0x19   : > { %v4057_v30 = vsel %vm4042_vm4, 0, %v317_v22  ;;  %v4065_v37 = vsel %vm4042_vm4, 0, %v324_v27  ;;  %v338_v44 = vor.u32 %v336_v25, %v335_v32  ;;  %v4075_v45 = vsel %vm4042_vm4, %v335_v32, 0 }
  0x1a   : > { %v509_v34 = vshrl.u32 %v4057_v30, 16  ;;  %v511_v35 = vshll.u32 %v4057_v30, 16  ;;  %v518_v36 = vrot.slane %v516_v26, 1  ;;  %v521_v38 = vshrl.u32 %v4065_v37, 16 }
  0x1b   : > { %v523_v39 = vshll.u32 %v4065_v37, 16  ;;  %v530_v40 = vrot.slane %v528_v31, 1  ;;  %v4080_v48 = vsel %vm4042_vm4, 0, %v331_v41  ;;  %v540_v49 = vshll.u32 %v4071_v43, 16 }
  0x1c   : > { %v513_v42 = vrot.slane %v511_v35, 1  ;;  %v552_v50 = vshll.u32 %v4075_v45, 16  ;;  %v533_v52 = vshrl.u32 %v4080_v48, 16  ;;  %v535_v53 = vshll.u32 %v4080_v48, 16 }
  0x1d   : > { %v525_v47 = vrot.slane %v523_v39, 1  ;;  %v4088_v54 = vsel %vm4042_vm4, 0, %v338_v44  ;;  %v542_v58 = vrot.slane %v540_v49, 1  ;;  %v342_v4 = vrot.slane %v340_v33, 7 }
  0x1e   : > { %v514_v51 = vor.u32 %v513_v42, %v509_v34  ;;  %v545_v59 = vshrl.u32 %v4088_v54, 16  ;;  %v547_v60 = vshll.u32 %v4088_v54, 16  ;;  %v537_v63 = vrot.slane %v535_v53, 1 }
  0x1f   : > { %v526_v57 = vor.u32 %v525_v47, %v521_v38  ;;  %v554_v0 = vrot.slane %v552_v50, 1  ;;  %v343_v11 = vshll.u32 %v4039_v17, 16  ;;  %v4114_v14 = vsel %vm4042_vm4, %v342_v4, 0 }
  0x20   : > { %v519_v62 = vsel %vm499_vm3, %v514_v51, %v518_v36  ;;  %v549_v10 = vrot.slane %v547_v60, 1  ;;  %v538_v13 = vor.u32 %v537_v63, %v533_v52  ;;  %v354_v16 = vshrl.u32 %v3926_v56, 16  ;;  %v3928_v36 = vld [vmem:[%s4030_s6 + $0x40] sm:$0xff]  }
  0x21   : > { %3325 = vmatmul.mubr.msk.bf16.vlgmr.msra.gmra.mrb[0].mxu1 %vm700_vm0, %v519_v62  ;;  %3468 = vmatprep.mubr.msk.bf16.mxu0 %vm700_vm0, %v519_v62  ;;  %v4106_v9 = vsel %vm499_vm3, %v526_v57, %v530_v40  ;;  %v345_v17 = vor.u32 %v343_v11, %v342_v4  ;;  %v564_v20 = vshll.u32 %v4114_v14, 16  ;;  %v357_v24 = vshll.u32 %v3926_v56, 16  ;;  %v4174_v57 = vld [vmem:[%s4863_s1 + $0x20] sm:$0xff]  }
  0x22   : > { %3357 = vmatpush3.bf16.msra.mxu1 %v4013_v6  ;;  %3469 = vmatmul.mubr.msk.bf16.vlgmr.msra.gmra.mrb[0].mxu0 %vm700_vm0, %v4106_v9  ;;  %v550_v19 = vor.u32 %v549_v10, %v545_v59  ;;  %v349_v6 = vrot.slane %v347_v12, 7  ;;  %v4121_v21 = vsel %vm499_vm3, %v538_v13, %v542_v58  ;;  %v356_v22 = vrot.slane %v354_v16, 7 }
  0x23   : > { %3501 = vmatpush3.bf16.msra.mxu0 %v4023_v7  ;;  %3328 = vmatprep.mubr.msk.bf16.mxu1 %vm700_vm0, %v4106_v9  ;;  %v361_v25 = vshrl.u32 %v4101_v8, 16  ;;  %v4127_v7 = vld [vmem:[%s4863_s1 + $0x60] sm:$0xff]   ;;  %v4136_v27 = vsel %vm4042_vm4, 0, %v345_v17  ;;  %v566_v29 = vrot.slane %v564_v20, 1  ;;  %v364_v56 = vshll.u32 %v4101_v8, 16  ;;  %v3931_v8 = vld [vmem:[%s4030_s6 + $0x48] sm:$0xff]  }
  0x24   : > { %3502 = vmatprep.subr.bf16.mxu0 %v3924_v55  ;;  %3358 = vmatprep.subr.bf16.mxu1 %v3929_v61  ;;  %v4132_v26 = vsel %vm499_vm3, %v550_v19, %v554_v0  ;;  %v352_v31 = vor.u32 %v350_v15, %v349_v6  ;;  %v557_v32 = vshrl.u32 %v4136_v27, 16  ;;  %v559_v33 = vshll.u32 %v4136_v27, 16  ;;  %v3932_v15 = vld [vmem:[%s4030_s6 + $0x50] sm:$0xff]  }
  0x25   : > { %3472 = vmatprep.mubr.msk.bf16.mxu0 %vm700_vm0, %v4121_v21  ;;  %v4142_v34 = vsel %vm4042_vm4, %v349_v6, 0  ;;  %v359_v35 = vor.u32 %v357_v24, %v356_v22  ;;  %v4152_v40 = vsel %vm4042_vm4, %v356_v22, 0  ;;  %v363_v41 = vrot.slane %v361_v25, 7 }
  0x26   : > { %3359 = vmatpush3.bf16.msra.mxu1 %v3929_v61  ;;  %v4147_v38 = vsel %vm4042_vm4, 0, %v352_v31  ;;  %v576_v39 = vshll.u32 %v4142_v34, 16  ;;  %v561_v42 = vrot.slane %v559_v33, 1  ;;  %v588_v51 = vshll.u32 %v4152_v40, 16 }
  0x27   : > { %3503 = vmatpush3.bf16.msra.mxu0 %v3924_v55  ;;  %v569_v44 = vshrl.u32 %v4147_v38, 16  ;;  %v571_v46 = vshll.u32 %v4147_v38, 16  ;;  %v4158_v47 = vsel %vm4042_vm4, 0, %v359_v35  ;;  %v4178_v60 = vsel %vm4042_vm4, %v363_v41, 0  ;;  %3392 = vmatprep.subr.bf16.mxu1 %v4174_v57 }
  0x28   : > { %3536 = vmatprep.subr.bf16.mxu0 %v4127_v7  ;;  %v581_v49 = vshrl.u32 %v4158_v47, 16  ;;  %v583_v50 = vshll.u32 %v4158_v47, 16  ;;  %v562_v52 = vor.u32 %v561_v42, %v557_v32  ;;  %v578_v55 = vrot.slane %v576_v39, 1 }
  0x29   : > { %3329 = vmatmul.mubr.msk.bf16.gmra.mrb[4].mxu1 %vm700_vm0, %v4121_v21  ;;  %v573_v53 = vrot.slane %v571_v46, 1  ;;  %v590_v59 = vrot.slane %v588_v51, 1  ;;  %v368_v61 = vshrl.u32 %v3928_v36, 16  ;;  %v366_v0 = vor.u32 %v364_v56, %v363_v41  ;;  %v3934_v56 = vld [vmem:[%s4030_s6 + $0x60] sm:$0xff]  }
  0x2a   : > { %3473 = vmatmul.mubr.msk.bf16.gmra.mrb[4].mxu0 %vm700_vm0, %v4132_v26  ;;  %3332 = vmatprep.mubr.msk.bf16.mxu1 %vm700_vm0, %v4132_v26  ;;  %v585_v58 = vrot.slane %v583_v50, 1  ;;  %v4181_v62 = vsel %vm499_vm3, %v562_v52, %v566_v29  ;;  %v371_v4 = vshll.u32 %v3928_v36, 16  ;;  %v600_v13 = vshll.u32 %v4178_v60, 16 }
  0x2b   : > { %v574_v63 = vor.u32 %v573_v53, %v569_v44  ;;  %3476 = vmatprep.mubr.msk.bf16.mxu0 %vm700_vm0, %v4181_v62  ;;  %v370_v11 = vrot.slane %v368_v61, 7  ;;  %v4189_v12 = vsel %vm4042_vm4, 0, %v366_v0  ;;  %v1158_v6 = vrot.slane %v4053_v28, 1 }
  0x2c   : > { %v586_v10 = vor.u32 %v585_v58, %v581_v49  ;;  %v593_v19 = vshrl.u32 %v4189_v12, 16  ;;  %v595_v17 = vshll.u32 %v4189_v12, 16  ;;  %v375_v24 = vshrl.u32 %v3931_v8, 16 }
  0x2d   : > { %v4194_v16 = vsel %vm499_vm3, %v574_v63, %v578_v55  ;;  %v373_v20 = vor.u32 %v371_v4, %v370_v11  ;;  %v4210_v31 = vsel %vm4042_vm4, %v370_v11, 0  ;;  %v378_v32 = vshll.u32 %v3931_v8, 16  ;;  %v3933_v55 = vld [vmem:[%s4030_s6 + $0x58] sm:$0xff]  }
  0x2e   : > { %v4200_v22 = vsel %vm499_vm3, %v586_v10, %v590_v59  ;;  %v597_v25 = vrot.slane %v595_v17, 1  ;;  %v602_v28 = vrot.slane %v600_v13, 1  ;;  %v377_v35 = vrot.slane %v375_v24, 7 }
  0x2f   : > { %v4206_v29 = vsel %vm4042_vm4, 0, %v373_v20  ;;  %v382_v36 = vshrl.u32 %v3932_v15, 16  ;;  %v1154_v41 = vrot.slane %v4057_v30, 1  ;;  %v1155_v42 = vrot.slane %v4048_v23, 1  ;;  %v3935_v20 = vld [vmem:[%s4030_s6 + $0x68] sm:$0xff]  }
  0x30   : > { %v607_v33 = vshll.u32 %v4206_v29, 16  ;;  %v598_v39 = vor.u32 %v597_v25, %v593_v19  ;;  %v385_v44 = vshll.u32 %v3932_v15, 16  ;;  %v612_v46 = vshll.u32 %v4210_v31, 16 }
  0x31   : > { %3333 = vmatmul.mubr.msk.bf16.gmra.mrb[8].mxu1 %vm700_vm0, %v4181_v62  ;;  %v380_v49 = vor.u32 %v378_v32, %v377_v35  ;;  %v4224_v50 = vsel %vm4042_vm4, %v377_v35, 0  ;;  %v384_v51 = vrot.slane %v382_v36, 7  ;;  %v605_v52 = vshrl.u32 %v4206_v29, 16 }
  0x32   : > { %3477 = vmatmul.mubr.msk.bf16.gmra.mrb[8].mxu0 %vm700_vm0, %v4194_v16  ;;  %3336 = vmatprep.mubr.msk.bf16.mxu1 %vm700_vm0, %v4194_v16  ;;  %v609_v53 = vrot.slane %v607_v33, 1  ;;  %v1157_v58 = vrot.slane %v4065_v37, 1  ;;  %v4235_v61 = vsel %vm499_vm3, %v598_v39, %v602_v28  ;;  %v624_v4 = vshll.u32 %v4224_v50, 16 }
  0x33   : > { %3480 = vmatprep.mubr.msk.bf16.mxu0 %vm700_vm0, %v4200_v22  ;;  %v4232_v23 = vsel %vm4042_vm4, 0, %v380_v49  ;;  %v387_v59 = vor.u32 %v385_v44, %v384_v51  ;;  %v614_v8 = vrot.slane %v612_v46, 1  ;;  %v4241_v10 = vsel %vm1151_vm5, %v1154_v41, %v1155_v42 }
  0x34   : > { %v617_v63 = vshrl.u32 %v4232_v23, 16  ;;  %v619_v0 = vshll.u32 %v4232_v23, 16  ;;  %v610_v13 = vor.u32 %v609_v53, %v605_v52  ;;  %v1160_v17 = vrot.slane %v4080_v48, 1 }
  0x35   : > { %v4245_v11 = vsel %vm4042_vm4, 0, %v387_v59  ;;  %v4258_v24 = vsel %vm4042_vm4, %v384_v51, 0  ;;  %v389_v25 = vshrl.u32 %v3933_v55, 16  ;;  %v392_v32 = vshll.u32 %v3933_v55, 16 }
  0x36   : > { %v621_v15 = vrot.slane %v619_v0, 1  ;;  %v631_v19 = vshll.u32 %v4245_v11, 16  ;;  %v396_v28 = vshrl.u32 %v3934_v56, 16  ;;  %v626_v35 = vrot.slane %v624_v4, 1  ;;  %v3936_v0 = vld [vmem:[%s4030_s6 + $0x70] sm:$0xff]  }
  0x37   : > { %v1161_v36 = vrot.slane %v4071_v43, 1  ;;  %v399_v39 = vshll.u32 %v3934_v56, 16  ;;  %v4264_v41 = vsel %vm1151_vm5, %v1157_v58, %v1158_v6  ;;  %v391_v42 = vrot.slane %v389_v25, 7 }
  0x38   : > { %v622_v33 = vor.u32 %v621_v15, %v617_v63  ;;  %v398_v44 = vrot.slane %v396_v28, 7  ;;  %v629_v46 = vshrl.u32 %v4245_v11, 16  ;;  %v633_v49 = vrot.slane %v631_v19, 1  ;;  %v3938_v19 = vld [vmem:[%s4863_s1 + $0x68] sm:$0xff]  }
  0x39   : > { %3337 = vmatmul.mubr.msk.bf16.gmra.mrb[12].mxu1 %vm700_vm0, %v4200_v22  ;;  %v636_v51 = vshll.u32 %v4258_v24, 16  ;;  %v403_v52 = vshrl.u32 %v3935_v20, 16  ;;  %v4269_v53 = vsel %vm499_vm3, %v610_v13, %v614_v8  ;;  %v394_v55 = vor.u32 %v392_v32, %v391_v42 }
  0x3a   : > { %3481 = vmatmul.mubr.msk.bf16.gmra.mrb[12].mxu0 %vm700_vm0, %v4235_v61  ;;  %3340 = vmatprep.mubr.msk.bf16.mxu1 %vm700_vm0, %v4235_v61  ;;  %v4273_v43 = vsel %vm4042_vm4, %v391_v42, 0  ;;  %v401_v56 = vor.u32 %v399_v39, %v398_v44  ;;  %v4276_v6 = vsel %vm499_vm3, %v622_v33, %v626_v35  ;;  %v4279_v58 = vsel %vm1151_vm5, %v1160_v17, %v1161_v36 }
  0x3b   : > { %3504 = vmatprep.mubr.msk.bf16.mxu0 %vm700_vm0, %v4241_v10  ;;  %v1163_v59 = vrot.slane %v4088_v54, 1  ;;  %v648_v63 = vshll.u32 %v4273_v43, 16  ;;  %v1164_v4 = vrot.slane %v4075_v45, 1  ;;  %v4287_v8 = vsel %vm4042_vm4, 0, %v394_v55 }
  0x3c   : > { %v4291_v13 = vsel %vm4042_vm4, 0, %v401_v56  ;;  %v405_v15 = vrot.slane %v403_v52, 7  ;;  %v634_v17 = vor.u32 %v633_v49, %v629_v46  ;;  %v638_v25 = vrot.slane %v636_v51, 1 }
  0x3d   : > { %v641_v45 = vshrl.u32 %v4287_v8, 16  ;;  %v643_v32 = vshll.u32 %v4287_v8, 16  ;;  %v650_v28 = vrot.slane %v648_v63, 1  ;;  %v4306_v33 = vsel %vm4042_vm4, %v398_v44, 0 }
  0x3e   : > { %v655_v35 = vshll.u32 %v4291_v13, 16  ;;  %v406_v36 = vshll.u32 %v3935_v20, 16  ;;  %v4314_v42 = vsel %vm4042_vm4, %v405_v15, 0  ;;  %v410_v46 = vshrl.u32 %v3936_v0, 16 }
  0x3f   : > { %v645_v39 = vrot.slane %v643_v32, 1  ;;  %v413_v49 = vshll.u32 %v3936_v0, 16  ;;  %v4317_v51 = vsel %vm1151_vm5, %v1163_v59, %v1164_v4  ;;  %v1166_v44 = vrot.slane %v4136_v27, 1 }
  0x40   : > { %v1167_v52 = vrot.slane %v4114_v14, 1  ;;  %v408_v20 = vor.u32 %v406_v36, %v405_v15  ;;  %v4327_v55 = vsel %vm499_vm3, %v634_v17, %v638_v25  ;;  %v660_v63 = vshll.u32 %v4306_v33, 16 }
  0x41   : > { %3341 = vmatmul.mubr.msk.bf16.gmra.mrb[16].mxu1 %vm700_vm0, %v4269_v53  ;;  %v646_v56 = vor.u32 %v645_v39, %v641_v45  ;;  %v412_v0 = vrot.slane %v410_v46, 7  ;;  %v653_v59 = vshrl.u32 %v4291_v13, 16  ;;  %v657_v4 = vrot.slane %v655_v35, 1 }
  0x42   : > { %3505 = vmatmul.mubr.msk.bf16.vlgmr.msra.gmra.mrb[0].mxu0 %vm700_vm0, %v4264_v41  ;;  %3344 = vmatprep.mubr.msk.bf16.mxu1 %vm700_vm0, %v4276_v6  ;;  %v4333_v14 = vsel %vm4042_vm4, 0, %v408_v20  ;;  %v672_v15 = vshll.u32 %v4314_v42, 16  ;;  %v4342_v45 = vsel %vm1151_vm5, %v1166_v44, %v1167_v52  ;;  %v662_v39 = vrot.slane %v660_v63, 1  ;;  %v3939_v63 = vld [vmem:[%s4030_s6 + $0x78] sm:$0xff]  }
  0x43   : > { %3537 = vmatpush3.bf16.msra.mxu0 %v4127_v7  ;;  %3508 = vmatprep.mubr.msk.bf16.mxu0 %vm700_vm0, %v4279_v58  ;;  %v4324_v7 = vld [vmem:[%s4863_s1 + $0x70] sm:$0xff]   ;;  %v4337_v32 = vsel %vm499_vm3, %v646_v56, %v650_v28  ;;  %v665_v36 = vshrl.u32 %v4333_v14, 16  ;;  %v667_v17 = vshll.u32 %v4333_v14, 16  ;;  %v415_v25 = vor.u32 %v413_v49, %v412_v0 }
  0x44   : > { %3538 = vmatprep.subr.bf16.mxu0 %v3938_v19  ;;  %v1169_v46 = vrot.slane %v4147_v38, 1  ;;  %v1170_v44 = vrot.slane %v4142_v34, 1  ;;  %v674_v20 = vrot.slane %v672_v15, 1  ;;  %v4362_v56 = vsel %vm4042_vm4, %v412_v0, 0 }
  0x45   : > { %v669_v35 = vrot.slane %v667_v17, 1  ;;  %v4349_v28 = vsel %vm4042_vm4, 0, %v415_v25  ;;  %v1172_v17 = vrot.slane %v4158_v47, 1  ;;  %v684_v5 = vshll.u32 %v4362_v56, 16 }
  0x46   : > { %v679_v49 = vshll.u32 %v4349_v28, 16  ;;  %v677_v25 = vshrl.u32 %v4349_v28, 16  ;;  %v4373_v34 = vsel %vm1151_vm5, %v1169_v46, %v1170_v44  ;;  %v1175_v46 = vrot.slane %v4189_v12, 1 }
  0x47   : > { %3539 = vmatpush3.bf16.msra.mxu0 %v3938_v19  ;;  %v658_v19 = vor.u32 %v657_v4, %v653_v59  ;;  %v670_v52 = vor.u32 %v669_v35, %v665_v36  ;;  %v1173_v59 = vrot.slane %v4152_v40, 1  ;;  %v417_v36 = vshrl.u32 %v3939_v63, 16 }
  0x48   : > { %3572 = vmatprep.subr.bf16.mxu0 %v4324_v7  ;;  %v681_v2 = vrot.slane %v679_v49, 1  ;;  %v420_v40 = vshll.u32 %v3939_v63, 16  ;;  %v1176_v49 = vrot.slane %v4178_v60, 1  ;;  %v1178_v44 = vrot.slane %v4206_v29, 1 }
  0x49   : > { %3345 = vmatmul.mubr.msk.bf16.gmra.mrb[20].mxu1 %vm700_vm0, %v4327_v55  ;;  %v4368_v4 = vsel %vm499_vm3, %v658_v19, %v662_v39  ;;  %v4376_v15 = vsel %vm499_vm3, %v670_v52, %v674_v20  ;;  %v4379_v0 = vsel %vm1151_vm5, %v1172_v17, %v1173_v59  ;;  %v686_v19 = vrot.slane %v684_v5, 1 }
  0x4a   : > { %3509 = vmatmul.mubr.msk.bf16.gmra.mrb[4].mxu0 %vm700_vm0, %v4317_v51  ;;  %3348 = vmatprep.mubr.msk.bf16.mxu1 %vm700_vm0, %v4337_v32  ;;  %v682_v35 = vor.u32 %v681_v2, %v677_v25  ;;  %v419_v39 = vrot.slane %v417_v36, 7  ;;  %v1179_v52 = vrot.slane %v4210_v31, 1  ;;  %v4405_v59 = vsel %vm1151_vm5, %v1175_v46, %v1176_v49 }
  0x4b   : > { %3512 = vmatprep.mubr.msk.bf16.mxu0 %vm700_vm0, %v4342_v45  ;;  %v4874_v31 = vmov 0   ;;  %v1181_v18 = vrot.slane %v4232_v23, 1  ;;  %v1182_v63 = vrot.slane %v4224_v50, 1  ;;  %v1184_v25 = vrot.slane %v4245_v11, 1 }
  0x4c   : > { %v422_v20 = vor.u32 %v420_v40, %v419_v39  ;;  %v4395_v17 = vsel %vm4042_vm4, %v419_v39, 0  ;;  %v4398_v2 = vsel %vm499_vm3, %v682_v35, %v686_v19  ;;  %v4408_v60 = vsel %vm1151_vm5, %v1178_v44, %v1179_v52  ;;  %v3940_v19 = vld [vmem:[%s4863_s1 + $0x28] sm:$0xff]   ;;  %v3942_v39 = vld [vmem:[%s4863_s1 + $0x30] sm:$0xff]  }
  0x4d   : > { %v1185_v36 = vrot.slane %v4258_v24, 1  ;;  %v4422_v40 = vsel %vm1151_vm5, %v1181_v18, %v1182_v63  ;;  %v1187_v50 = vrot.slane %v4287_v8, 1  ;;  %v1188_v24 = vrot.slane %v4273_v43, 1 }
  0x4e   : > { %v4402_v5 = vsel %vm4042_vm4, 0, %v422_v20  ;;  %v1190_v46 = vrot.slane %v4291_v13, 1  ;;  %v1193_v43 = vrot.slane %v4333_v14, 1  ;;  %v1196_v52 = vrot.slane %v4349_v28, 1 }
  0x4f   : > { %v4425_v35 = vsel %vm1151_vm5, %v1184_v25, %v1185_v36  ;;  %v4447_v49 = vsel %vm1151_vm5, %v1187_v50, %v1188_v24  ;;  %v1197_v20 = vrot.slane %v4362_v56, 1  ;;  %v1897_v56 = vrot.slane %v4395_v17, 1  ;;  %v3943_v36 = vld [vmem:[%s4863_s1 + $0x78] sm:$0xff]  }
  0x51   : > { %3349 = vmatmul.mubr.msk.bf16.gmra.mrb[24].mxu1 %vm700_vm0, %v4368_v4  ;;  %v4468_v63 = vsel %vm1151_vm5, %v1196_v52, %v1197_v20 }
  0x52   : > { %3513 = vmatmul.mubr.msk.bf16.gmra.mrb[8].mxu0 %vm700_vm0, %v4373_v34  ;;  %3352 = vmatprep.mubr.msk.bf16.mxu1 %vm700_vm0, %v4376_v15 }
  0x53   : > { %3516 = vmatprep.mubr.msk.bf16.mxu0 %vm700_vm0, %v4379_v0 }
  0x59   : > { %3353 = vmatmul.mubr.msk.bf16.gmra.mrb[28].mxu1 %vm700_vm0, %v4398_v2 }
  0x5a   : > { %3517 = vmatmul.mubr.msk.bf16.gmra.mrb[12].mxu0 %vm700_vm0, %v4405_v59  ;;  %3360 = vmatprep.mubr.bf16.mxu1 %v4874_v31 }
  0x5b   : > { %3520 = vmatprep.mubr.msk.bf16.mxu0 %vm700_vm0, %v4408_v60 }
  0x61   : > { %3361 = vmatmul.mubr.msk.bf16.vlgmr.msra.gmra.mrb[0].mxu1 %vm700_vm0, %v4057_v30 }
  0x62   : > { %3393 = vmatpush3.bf16.msra.mxu1 %v4174_v57  ;;  %3521 = vmatmul.mubr.msk.bf16.gmra.mrb[16].mxu0 %vm700_vm0, %v4422_v40  ;;  %v1191_v57 = vrot.slane %v4306_v33, 1  ;;  %v1194_v33 = vrot.slane %v4314_v42, 1  ;;  %v1896_v42 = vrot.slane %v4402_v5, 1 }
  0x63   : > { %3364 = vmatprep.mubr.msk.bf16.mxu1 %vm700_vm0, %v4065_v37  ;;  %3524 = vmatprep.mubr.msk.bf16.mxu0 %vm700_vm0, %v4425_v35 }
  0x64   : > { %3394 = vmatprep.subr.bf16.mxu1 %v3940_v19  ;;  %v4450_v44 = vsel %vm1151_vm5, %v1190_v46, %v1191_v57  ;;  %v4465_v18 = vsel %vm1151_vm5, %v1193_v43, %v1194_v33  ;;  %v4481_v25 = vsel %vm1151_vm5, %v1896_v42, %v1897_v56 }
  0x66   : > { %3395 = vmatpush3.bf16.msra.mxu1 %v3940_v19  ;;  %v3945_v19 = vld [vmem:[%s4863_s1 + $0x80] sm:$0xff]  }
  0x67   : > { %3428 = vmatprep.subr.bf16.mxu1 %v3942_v39 }
  0x69   : > { %3365 = vmatmul.mubr.msk.bf16.gmra.mrb[4].mxu1 %vm700_vm0, %v4080_v48 }
  0x6a   : > { %3525 = vmatmul.mubr.msk.bf16.gmra.mrb[20].mxu0 %vm700_vm0, %v4447_v49  ;;  %3368 = vmatprep.mubr.msk.bf16.mxu1 %vm700_vm0, %v4088_v54 }
  0x6b   : > { %3528 = vmatprep.mubr.msk.bf16.mxu0 %vm700_vm0, %v4450_v44 }
  0x71   : > { %3369 = vmatmul.mubr.msk.bf16.gmra.mrb[8].mxu1 %vm700_vm0, %v4136_v27 }
  0x72   : > { %3529 = vmatmul.mubr.msk.bf16.gmra.mrb[24].mxu0 %vm700_vm0, %v4465_v18  ;;  %3372 = vmatprep.mubr.msk.bf16.mxu1 %vm700_vm0, %v4147_v38 }
  0x73   : > { %3532 = vmatprep.mubr.msk.bf16.mxu0 %vm700_vm0, %v4468_v63 }
  0x79   : > { %3373 = vmatmul.mubr.msk.bf16.gmra.mrb[12].mxu1 %vm700_vm0, %v4158_v47 }
  0x7a   : > { %3533 = vmatmul.mubr.msk.bf16.gmra.mrb[28].mxu0 %vm700_vm0, %v4481_v25  ;;  %3376 = vmatprep.mubr.msk.bf16.mxu1 %vm700_vm0, %v4189_v12 }
  0x7b   : > { %3540 = vmatprep.mubr.msk.bf16.mxu0 %vm700_vm0, %v4065_v37 }
  0x81   : > { %3377 = vmatmul.mubr.msk.bf16.gmra.mrb[16].mxu1 %vm700_vm0, %v4206_v29 }
  0x82   : > { %3541 = vmatmul.mubr.msk.bf16.vlgmr.msra.gmra.mrb[0].mxu0 %vm700_vm0, %v4080_v48  ;;  %3380 = vmatprep.mubr.msk.bf16.mxu1 %vm700_vm0, %v4232_v23 }
  0x83   : > { %3573 = vmatpush3.bf16.msra.mxu0 %v4324_v7  ;;  %3544 = vmatprep.mubr.msk.bf16.mxu0 %vm700_vm0, %v4088_v54  ;;  %v3944_v7 = vld [vmem:[%s4863_s1 + $0x38] sm:$0xff]  }
  0x84   : > { %3574 = vmatprep.subr.bf16.mxu0 %v3943_v36 }
  0x87   : > { %3575 = vmatpush3.bf16.msra.mxu0 %v3943_v36 }
  0x88   : > { %3608 = vmatprep.subr.bf16.mxu0 %v3945_v19 }
  0x89   : > { %3381 = vmatmul.mubr.msk.bf16.gmra.mrb[20].mxu1 %vm700_vm0, %v4245_v11 }
  0x8a   : > { %3545 = vmatmul.mubr.msk.bf16.gmra.mrb[4].mxu0 %vm700_vm0, %v4136_v27  ;;  %3384 = vmatprep.mubr.msk.bf16.mxu1 %vm700_vm0, %v4287_v8 }
  0x8b   : > { %3548 = vmatprep.mubr.msk.bf16.mxu0 %vm700_vm0, %v4147_v38 }
  0x91   : > { %3385 = vmatmul.mubr.msk.bf16.gmra.mrb[24].mxu1 %vm700_vm0, %v4291_v13 }
  0x92   : > { %3549 = vmatmul.mubr.msk.bf16.gmra.mrb[8].mxu0 %vm700_vm0, %v4158_v47  ;;  %3388 = vmatprep.mubr.msk.bf16.mxu1 %vm700_vm0, %v4333_v14 }
  0x93   : > { %3552 = vmatprep.mubr.msk.bf16.mxu0 %vm700_vm0, %v4189_v12 }
  0x99   : > { %3389 = vmatmul.mubr.msk.bf16.gmra.mrb[28].mxu1 %vm700_vm0, %v4349_v28 }
  0x9a   : > { %3553 = vmatmul.mubr.msk.bf16.gmra.mrb[12].mxu0 %vm700_vm0, %v4206_v29  ;;  %3396 = vmatprep.mubr.msk.bf16.mxu1 %vm700_vm0, %v3998_v3 }
  0x9b   : > { %3556 = vmatprep.mubr.msk.bf16.mxu0 %vm700_vm0, %v4232_v23 }
  0xa1   : > { %3397 = vmatmul.mubr.msk.bf16.vlgmr.msra.gmra.mrb[0].mxu1 %vm700_vm0, %v4241_v10  ;;  %v3946_v10 = vld [vmem:[%s4863_s1 + $0x88] sm:$0xff]  }
  0xa2   : > { %3429 = vmatpush3.bf16.msra.mxu1 %v3942_v39  ;;  %3557 = vmatmul.mubr.msk.bf16.gmra.mrb[16].mxu0 %vm700_vm0, %v4245_v11 }
  0xa3   : > { %3400 = vmatprep.mubr.msk.bf16.mxu1 %vm700_vm0, %v4264_v41  ;;  %3560 = vmatprep.mubr.msk.bf16.mxu0 %vm700_vm0, %v4287_v8 }
  0xa4   : > { %3430 = vmatprep.subr.bf16.mxu1 %v3944_v7 }
  0xa6   : > { %3431 = vmatpush3.bf16.msra.mxu1 %v3944_v7 }
  0xa7   : > { %3644 = vmatprep.subr.bf16.mxu1 %v3995_v1 }
  0xa9   : > { %3401 = vmatmul.mubr.msk.bf16.gmra.mrb[4].mxu1 %vm700_vm0, %v4279_v58 }
  0xaa   : > { %3561 = vmatmul.mubr.msk.bf16.gmra.mrb[20].mxu0 %vm700_vm0, %v4291_v13  ;;  %3404 = vmatprep.mubr.msk.bf16.mxu1 %vm700_vm0, %v4317_v51 }
  0xab   : > { %3564 = vmatprep.mubr.msk.bf16.mxu0 %vm700_vm0, %v4333_v14 }
  0xb1   : > { %3405 = vmatmul.mubr.msk.bf16.gmra.mrb[8].mxu1 %vm700_vm0, %v4342_v45 }
  0xb2   : > { %3565 = vmatmul.mubr.msk.bf16.gmra.mrb[24].mxu0 %vm700_vm0, %v4349_v28  ;;  %3408 = vmatprep.mubr.msk.bf16.mxu1 %vm700_vm0, %v4373_v34 }
  0xb3   : > { %3568 = vmatprep.mubr.msk.bf16.mxu0 %vm700_vm0, %v4402_v5 }
  0xb9   : > { %3409 = vmatmul.mubr.msk.bf16.gmra.mrb[12].mxu1 %vm700_vm0, %v4379_v0 }
  0xba   : > { %3569 = vmatmul.mubr.bf16.gmra.mrb[28].mxu0 %v4874_v31  ;;  %3412 = vmatprep.mubr.msk.bf16.mxu1 %vm700_vm0, %v4405_v59 }
  0xbb   : > { %3576 = vmatprep.mubr.msk.bf16.mxu0 %vm700_vm0, %v4106_v9  ;;  %v1672_v9 = vshll.u32 %v4402_v5, 16 }
  0xc1   : > { %3413 = vmatmul.mubr.msk.bf16.gmra.mrb[16].mxu1 %vm700_vm0, %v4408_v60 }
  0xc2   : > { %3577 = vmatmul.mubr.msk.bf16.vlgmr.msra.gmra.mrb[0].mxu0 %vm700_vm0, %v4121_v21  ;;  %3416 = vmatprep.mubr.msk.bf16.mxu1 %vm700_vm0, %v4422_v40  ;;  %v1670_v21 = vshrl.u32 %v4402_v5, 16 }
  0xc3   : > { %3609 = vmatpush3.bf16.msra.mxu0 %v3945_v19  ;;  %3580 = vmatprep.mubr.msk.bf16.mxu0 %vm700_vm0, %v4132_v26 }
  0xc4   : > { %3610 = vmatprep.subr.bf16.mxu0 %v3946_v10 }
  0xc7   : > { %3611 = vmatpush3.bf16.msra.mxu0 %v3946_v10 }
  0xc9   : > { %3417 = vmatmul.mubr.msk.bf16.gmra.mrb[20].mxu1 %vm700_vm0, %v4425_v35 }
  0xca   : > { %3581 = vmatmul.mubr.msk.bf16.gmra.mrb[4].mxu0 %vm700_vm0, %v4181_v62  ;;  %3420 = vmatprep.mubr.msk.bf16.mxu1 %vm700_vm0, %v4447_v49 }
  0xcb   : > { %3584 = vmatprep.mubr.msk.bf16.mxu0 %vm700_vm0, %v4194_v16 }
  0xd1   : > { %3421 = vmatmul.mubr.msk.bf16.gmra.mrb[24].mxu1 %vm700_vm0, %v4450_v44 }
  0xd2   : > { %3585 = vmatmul.mubr.msk.bf16.gmra.mrb[8].mxu0 %vm700_vm0, %v4200_v22  ;;  %3424 = vmatprep.mubr.msk.bf16.mxu1 %vm700_vm0, %v4465_v18 }
  0xd3   : > { %3588 = vmatprep.mubr.msk.bf16.mxu0 %vm700_vm0, %v4235_v61 }
  0xd9   : > { %3425 = vmatmul.mubr.msk.bf16.gmra.mrb[28].mxu1 %vm700_vm0, %v4468_v63 }
  0xda   : > { %3589 = vmatmul.mubr.msk.bf16.gmra.mrb[12].mxu0 %vm700_vm0, %v4269_v53  ;;  %3432 = vmatprep.mubr.msk.bf16.mxu1 %vm700_vm0, %v4057_v30  ;;  %v4875_v30 = vld [vmem:[#allocation2_spill] sm:$0xff] }
  0xdb   : > { %3592 = vmatprep.mubr.msk.bf16.mxu0 %vm700_vm0, %v4276_v6 }
  0xe1   : > { %3433 = vmatmul.mubr.msk.bf16.vlgmr.msra.gmra.mrb[0].mxu1 %vm700_vm0, %v4065_v37  ;;  %v1674_v37 = vrot.slane %v1672_v9, 1 }
  0xe2   : > { %3646 = vmatpush3.bf16.msra.mxu1 %v3995_v1  ;;  %3593 = vmatmul.mubr.msk.bf16.gmra.mrb[16].mxu0 %vm700_vm0, %v4327_v55  ;;  %v1677_v1 = vshll.u32 %v4395_v17, 16 }
  0xe3   : > { %3436 = vmatprep.mubr.msk.bf16.mxu1 %vm700_vm0, %v4080_v48  ;;  %3596 = vmatprep.mubr.msk.bf16.mxu0 %vm700_vm0, %v4337_v32  ;;  %v1675_v48 = vor.u32 %v1674_v37, %v1670_v21 }
  0xe4   : > { %3645 = vmatprep.subr.bf16.mxu1 %v4875_v30  ;;  %v1679_v26 = vrot.slane %v1677_v1, 1 }
  0xe6   : > { %3647 = vmatpush3.bf16.msra.mxu1 %v4875_v30  ;;  %v1680_v62 = vsel %vm499_vm3, %v1675_v48, %v1679_v26 }
  0xe9   : > { %3437 = vmatmul.mubr.msk.bf16.gmra.mrb[4].mxu1 %vm700_vm0, %v4088_v54 }
  0xea   : > { %3597 = vmatmul.mubr.msk.bf16.gmra.mrb[20].mxu0 %vm700_vm0, %v4368_v4  ;;  %3440 = vmatprep.mubr.msk.bf16.mxu1 %vm700_vm0, %v4136_v27 }
  0xeb   : > { %3600 = vmatprep.mubr.msk.bf16.mxu0 %vm700_vm0, %v4376_v15 }
  0xf1   : > { %3441 = vmatmul.mubr.msk.bf16.gmra.mrb[8].mxu1 %vm700_vm0, %v4147_v38 }
  0xf2   : > { %3601 = vmatmul.mubr.msk.bf16.gmra.mrb[24].mxu0 %vm700_vm0, %v4398_v2  ;;  %3444 = vmatprep.mubr.msk.bf16.mxu1 %vm700_vm0, %v4158_v47 }
  0xf3   : > { %3604 = vmatprep.mubr.msk.bf16.mxu0 %vm700_vm0, %v1680_v62 }
  0xf9   : > { %3445 = vmatmul.mubr.msk.bf16.gmra.mrb[12].mxu1 %vm700_vm0, %v4189_v12 }
  0xfa   : > { %3605 = vmatmul.mubr.msk.bf16.gmra.mrb[28].mxu0 %vm700_vm0, %v3998_v3  ;;  %3448 = vmatprep.mubr.msk.bf16.mxu1 %vm700_vm0, %v4206_v29 }
  0xfb   : > { %3612 = vmatprep.mubr.msk.bf16.mxu0 %vm700_vm0, %v4264_v41 }
 0x101   : > { %3449 = vmatmul.mubr.msk.bf16.gmra.mrb[16].mxu1 %vm700_vm0, %v4232_v23 }
 0x102   : > { %3613 = vmatmul.mubr.msk.bf16.vlgmr.msra.gmra.mrb[0].mxu0 %vm700_vm0, %v4279_v58  ;;  %3452 = vmatprep.mubr.msk.bf16.mxu1 %vm700_vm0, %v4245_v11 }
 0x103   : > { %3616 = vmatprep.mubr.msk.bf16.mxu0 %vm700_vm0, %v4317_v51 }
 0x109   : > { %3453 = vmatmul.mubr.msk.bf16.gmra.mrb[20].mxu1 %vm700_vm0, %v4287_v8 }
 0x10a   : > { %3617 = vmatmul.mubr.msk.bf16.gmra.mrb[4].mxu0 %vm700_vm0, %v4342_v45  ;;  %3456 = vmatprep.mubr.msk.bf16.mxu1 %vm700_vm0, %v4291_v13  ;;  %v4712_v13 = vld [vmem:[%s4864_s2] ss:$0 sm:$0xff] }
 0x10b   : > { %3620 = vmatprep.mubr.msk.bf16.mxu0 %vm700_vm0, %v4373_v34 }
 0x111   : > { %3457 = vmatmul.mubr.msk.bf16.gmra.mrb[24].mxu1 %vm700_vm0, %v4333_v14  ;;  %v4717_v14 = vld [vmem:[%s4865_s3] ss:$0 sm:$0xff] }
 0x112   : > { %3621 = vmatmul.mubr.msk.bf16.gmra.mrb[8].mxu0 %vm700_vm0, %v4379_v0  ;;  %3460 = vmatprep.mubr.msk.bf16.mxu1 %vm700_vm0, %v4349_v28 }
 0x113   : > { %3624 = vmatprep.mubr.msk.bf16.mxu0 %vm700_vm0, %v4405_v59 }
 0x119   : > { %3461 = vmatmul.mubr.msk.bf16.gmra.mrb[28].mxu1 %vm700_vm0, %v4402_v5 }
 0x11a   : > { %3625 = vmatmul.mubr.msk.bf16.gmra.mrb[12].mxu0 %vm700_vm0, %v4408_v60  ;;  %3484 = vmatprep.mubr.msk.bf16.mxu1 %vm700_vm0, %v4269_v53 }
 0x11b   : > { %3628 = vmatprep.mubr.msk.bf16.mxu0 %vm700_vm0, %v4422_v40 }
 0x121   : > { %3485 = vmatmul.mubr.msk.bf16.vlgmr.msra.gmra.mrb[16].mxu1 %vm700_vm0, %v4276_v6 }
 0x122   : > { %3629 = vmatmul.mubr.msk.bf16.gmra.mrb[16].mxu0 %vm700_vm0, %v4425_v35  ;;  %3488 = vmatprep.mubr.msk.bf16.mxu1 %vm700_vm0, %v4327_v55 }
 0x123   : > { %3632 = vmatprep.mubr.msk.bf16.mxu0 %vm700_vm0, %v4447_v49 }
 0x129   : > { %3489 = vmatmul.mubr.msk.bf16.gmra.mrb[20].mxu1 %vm700_vm0, %v4337_v32 }
 0x12a   : > { %3633 = vmatmul.mubr.msk.bf16.gmra.mrb[20].mxu0 %vm700_vm0, %v4450_v44  ;;  %3492 = vmatprep.mubr.msk.bf16.mxu1 %vm700_vm0, %v4368_v4 }
 0x12b   : > { %3636 = vmatprep.mubr.msk.bf16.mxu0 %vm700_vm0, %v4465_v18 }
 0x131   : > { %3493 = vmatmul.mubr.msk.bf16.gmra.mrb[24].mxu1 %vm700_vm0, %v4376_v15 }
 0x132   : > { %3637 = vmatmul.mubr.msk.bf16.gmra.mrb[24].mxu0 %vm700_vm0, %v4468_v63  ;;  %3496 = vmatprep.mubr.msk.bf16.mxu1 %vm700_vm0, %v4398_v2 }
 0x133   : > { %3640 = vmatprep.mubr.msk.bf16.mxu0 %vm700_vm0, %v4481_v25 }
 0x139   : > { %3497 = vmatmul.mubr.msk.bf16.gmra.mrb[28].mxu1 %vm700_vm0, %v1680_v62 }
 0x13a   : > { %3641 = vmatmul.mubr.msk.bf16.gmra.mrb[28].mxu0 %vm700_vm0, %v3998_v3 }
 0x1b4   : > { %v3434_v54 = vpop.f32.mrb[0].mxu1 }
 0x1b5   : > { %v1506_v27 = vpop.f32.mrb[1].mxu1 }
 0x1b6   : > { %v3435_v38 = vpop.f32.mrb[2].mxu1 }
 0x1b7   : > { %v1509_v47 = vpop.f32.mrb[3].mxu1 }
 0x1bc   : > { %v3438_v12 = vpop.f32.mrb[4].mxu1 }
 0x1bd   : > { %v1522_v16 = vpop.f32.mrb[5].mxu1 }
 0x1be   : > { %v3439_v22 = vpop.f32.mrb[6].mxu1 }
 0x1bf   : > { %v1525_v29 = vpop.f32.mrb[7].mxu1 }
 0x1c4   : > { %v3442_v23 = vpop.f32.mrb[8].mxu1 }
 0x1c5   : > { %v1538_v61 = vpop.f32.mrb[9].mxu1 }
 0x1c6   : > { %v4697_v11 = vpop.f32.mrb[10].mxu1 }
 0x1c7   : > { %v4699_v41 = vpop.f32.mrb[11].mxu1 }
 0x1cc   : > { %v4701_v53 = vpop.f32.mrb[12].mxu1 }
 0x1cd   : > { %v4703_v6 = vpop.f32.mrb[13].mxu1 }
 0x1ce   : > { %v4705_v3 = vpop.f32.mrb[14].mxu1 }
 0x1cf   : > { %v4707_v58 = vpop.f32.mrb[15].mxu1 }
 0x1d5   : > { %v3614_v8 = vpop.f32.mrb[0].mxu0 }
 0x1d6   : > { %v3648_v51 = vadd.f32 %v3614_v8, %v3434_v54  ;;  %v2578_v55 = vpop.f32.mrb[1].mxu0 }
 0x1d7   : > { %v3649_v32 = vadd.f32 %v2578_v55, %v1506_v27  ;;  %v3615_v45 = vpop.f32.mrb[2].mxu0 }
 0x1d8   : > { %v2746_v28 = vmul.f32 %v3648_v51, %v4712_v13  ;;  %v3650_v4 = vadd.f32 %v3615_v45, %v3435_v38  ;;  %v2581_v34 = vpop.f32.mrb[3].mxu0 }
 0x1d9   : > { %v2744_v15 = vmul.f32 %v3649_v32, %v4712_v13  ;;  %v3651_v0 = vadd.f32 %v2581_v34, %v1509_v47 }
 0x1da   : > { %v2785_v17 = vadd.f32 %v4717_v14, %v2746_v28  ;;  %v2747_v2 = vmul.f32 %v3650_v4, %v4712_v13 }
 0x1db   : > { %v2783_v5 = vadd.f32 %v4717_v14, %v2744_v15  ;;  %v2745_v59 = vmul.f32 %v3651_v0, %v4712_v13 }
 0x1dc   : > { %v2817_v60 = vmax.f32 %v2785_v17, 0.0  ;;  %v2786_v31 = vadd.f32 %v4717_v14, %v2747_v2 }
 0x1dd   : > { %v2815_v40 = vmax.f32 %v2783_v5, 0.0  ;;  %v2784_v35 = vadd.f32 %v4717_v14, %v2745_v59  ;;  %v3618_v50 = vpop.f32.mrb[4].mxu0 }
 0x1de   : > { %2850 = vst.msk [vmem:[%s4727_s14 + $0x10] sm:$0xff] %vm2847_vm6, %v2817_v60  ;;  %v2818_v24 = vmax.f32 %v2786_v31, 0.0  ;;  %v3652_v39 = vadd.f32 %v3618_v50, %v3438_v12  ;;  %v2594_v46 = vpop.f32.mrb[5].mxu0 }
 0x1df   : > { %2848 = vst.msk [vmem:[%s4727_s14] sm:$0xff] %vm2847_vm6, %v2815_v40  ;;  %v2816_v57 = vmax.f32 %v2784_v35, 0.0  ;;  %v3653_v49 = vadd.f32 %v2594_v46, %v1522_v16  ;;  %v3619_v44 = vpop.f32.mrb[6].mxu0 }
 0x1e0   : > { %2851 = vst.msk [vmem:[%s4727_s14 + $0x18] sm:$0xff] %vm2847_vm6, %v2818_v24  ;;  %v2750_v43 = vmul.f32 %v3652_v39, %v4712_v13  ;;  %v3654_v33 = vadd.f32 %v3619_v44, %v3439_v22  ;;  %v2597_v52 = vpop.f32.mrb[7].mxu0 }
 0x1e1   : > { %2849 = vst.msk [vmem:[%s4727_s14 + $0x8] sm:$0xff] %vm2847_vm6, %v2816_v57  ;;  %v2748_v20 = vmul.f32 %v3653_v49, %v4712_v13  ;;  %v3655_v18 = vadd.f32 %v2597_v52, %v1525_v29 }
 0x1e2   : > { %v2789_v63 = vadd.f32 %v4717_v14, %v2750_v43  ;;  %v2751_v42 = vmul.f32 %v3654_v33, %v4712_v13 }
 0x1e3   : > { %v2787_v56 = vadd.f32 %v4717_v14, %v2748_v20  ;;  %v2749_v25 = vmul.f32 %v3655_v18, %v4712_v13 }
 0x1e4   : > { %v2821_v36 = vmax.f32 %v2789_v63, 0.0  ;;  %v2790_v19 = vadd.f32 %v4717_v14, %v2751_v42 }
 0x1e5   : > { %v2819_v7 = vmax.f32 %v2787_v56, 0.0  ;;  %v2788_v10 = vadd.f32 %v4717_v14, %v2749_v25  ;;  %v3622_v9 = vpop.f32.mrb[8].mxu0 }
 0x1e6   : > { %2854 = vst.msk [vmem:[%s4727_s14 + $0x30] sm:$0xff] %vm2847_vm6, %v2821_v36  ;;  %v2822_v30 = vmax.f32 %v2790_v19, 0.0  ;;  %v3656_v21 = vadd.f32 %v3622_v9, %v3442_v23  ;;  %v2610_v37 = vpop.f32.mrb[9].mxu0 }
 0x1e7   : > { %2852 = vst.msk [vmem:[%s4727_s14 + $0x20] sm:$0xff] %vm2847_vm6, %v2819_v7  ;;  %v2820_v1 = vmax.f32 %v2788_v10, 0.0  ;;  %v3657_v48 = vadd.f32 %v2610_v37, %v1538_v61  ;;  %v3623_v26 = vpop.f32.mrb[10].mxu0 }
 0x1e8   : > { %2855 = vst.msk [vmem:[%s4727_s14 + $0x38] sm:$0xff] %vm2847_vm6, %v2822_v30  ;;  %v2754_v62 = vmul.f32 %v3656_v21, %v4712_v13  ;;  %v3658_v54 = vadd.f32 %v3623_v26, %v4697_v11  ;;  %v2613_v27 = vpop.f32.mrb[11].mxu0 }
 0x1e9   : > { %2853 = vst.msk [vmem:[%s4727_s14 + $0x28] sm:$0xff] %vm2847_vm6, %v2820_v1  ;;  %v2752_v38 = vmul.f32 %v3657_v48, %v4712_v13  ;;  %v3659_v47 = vadd.f32 %v2613_v27, %v4699_v41 }
 0x1ea   : > { %v2793_v12 = vadd.f32 %v4717_v14, %v2754_v62  ;;  %v2755_v16 = vmul.f32 %v3658_v54, %v4712_v13 }
 0x1eb   : > { %v2791_v22 = vadd.f32 %v4717_v14, %v2752_v38  ;;  %v2753_v29 = vmul.f32 %v3659_v47, %v4712_v13 }
 0x1ec   : > { %v2825_v23 = vmax.f32 %v2793_v12, 0.0  ;;  %v2794_v61 = vadd.f32 %v4717_v14, %v2755_v16 }
 0x1ed   : > { %v2823_v11 = vmax.f32 %v2791_v22, 0.0  ;;  %v2792_v8 = vadd.f32 %v4717_v14, %v2753_v29  ;;  %v3626_v51 = vpop.f32.mrb[12].mxu0 }
 0x1ee   : > { %2858 = vst.msk [vmem:[%s4727_s14 + $0x50] sm:$0xff] %vm2847_vm6, %v2825_v23  ;;  %v2826_v41 = vmax.f32 %v2794_v61, 0.0  ;;  %v3660_v55 = vadd.f32 %v3626_v51, %v4701_v53  ;;  %v2626_v32 = vpop.f32.mrb[13].mxu0 }
 0x1ef   : > { %2856 = vst.msk [vmem:[%s4727_s14 + $0x40] sm:$0xff] %vm2847_vm6, %v2823_v11  ;;  %v2824_v45 = vmax.f32 %v2792_v8, 0.0  ;;  %v3661_v28 = vadd.f32 %v2626_v32, %v4703_v6  ;;  %v3627_v4 = vpop.f32.mrb[14].mxu0 }
 0x1f0   : > { %2859 = vst.msk [vmem:[%s4727_s14 + $0x58] sm:$0xff] %vm2847_vm6, %v2826_v41  ;;  %v2758_v34 = vmul.f32 %v3660_v55, %v4712_v13  ;;  %v3662_v15 = vadd.f32 %v3627_v4, %v4705_v3  ;;  %v2629_v0 = vpop.f32.mrb[15].mxu0 }
 0x1f1   : > { %2857 = vst.msk [vmem:[%s4727_s14 + $0x48] sm:$0xff] %vm2847_vm6, %v2824_v45  ;;  %v2756_v17 = vmul.f32 %v3661_v28, %v4712_v13  ;;  %v3663_v53 = vadd.f32 %v2629_v0, %v4707_v58 }
 0x1f2   : > { %v2797_v2 = vadd.f32 %v4717_v14, %v2758_v34  ;;  %v2759_v6 = vmul.f32 %v3662_v15, %v4712_v13 }
 0x1f3   : > { %v2795_v5 = vadd.f32 %v4717_v14, %v2756_v17  ;;  %v2757_v59 = vmul.f32 %v3663_v53, %v4712_v13 }
 0x1f4   : > { %v2829_v60 = vmax.f32 %v2797_v2, 0.0  ;;  %v2798_v3 = vadd.f32 %v4717_v14, %v2759_v6  ;;  %v3486_v31 = vpop.f32.mrb[16].mxu1 }
 0x1f5   : > { %v2827_v40 = vmax.f32 %v2795_v5, 0.0  ;;  %v2796_v35 = vadd.f32 %v4717_v14, %v2757_v59  ;;  %v1794_v50 = vpop.f32.mrb[17].mxu1  ;;  %v3630_v58 = vpop.f32.mrb[16].mxu0 }
 0x1f6   : > { %2862 = vst.msk [vmem:[%s4727_s14 + $0x70] sm:$0xff] %vm2847_vm6, %v2829_v60  ;;  %v2830_v24 = vmax.f32 %v2798_v3, 0.0  ;;  %v3664_v39 = vadd.f32 %v3630_v58, %v3486_v31  ;;  %v3487_v46 = vpop.f32.mrb[18].mxu1  ;;  %v2642_v57 = vpop.f32.mrb[17].mxu0 }
 0x1f7   : > { %2860 = vst.msk [vmem:[%s4727_s14 + $0x60] sm:$0xff] %vm2847_vm6, %v2827_v40  ;;  %v2828_v49 = vmax.f32 %v2796_v35, 0.0  ;;  %v3665_v44 = vadd.f32 %v2642_v57, %v1794_v50  ;;  %v1797_v43 = vpop.f32.mrb[19].mxu1  ;;  %v3631_v33 = vpop.f32.mrb[18].mxu0 }
 0x1f8   : > { %2863 = vst.msk [vmem:[%s4727_s14 + $0x78] sm:$0xff] %vm2847_vm6, %v2830_v24  ;;  %v2762_v52 = vmul.f32 %v3664_v39, %v4712_v13  ;;  %v3666_v20 = vadd.f32 %v3631_v33, %v3487_v46  ;;  %v2645_v18 = vpop.f32.mrb[19].mxu0 }
 0x1f9   : > { %2861 = vst.msk [vmem:[%s4727_s14 + $0x68] sm:$0xff] %vm2847_vm6, %v2828_v49  ;;  %v2760_v63 = vmul.f32 %v3665_v44, %v4712_v13  ;;  %v3667_v42 = vadd.f32 %v2645_v18, %v1797_v43 }
 0x1fa   : > { %v2801_v56 = vadd.f32 %v4717_v14, %v2762_v52  ;;  %v2763_v25 = vmul.f32 %v3666_v20, %v4712_v13 }
 0x1fb   : > { %v2799_v36 = vadd.f32 %v4717_v14, %v2760_v63  ;;  %v2761_v19 = vmul.f32 %v3667_v42, %v4712_v13 }
 0x1fc   : > { %v2833_v7 = vmax.f32 %v2801_v56, 0.0  ;;  %v2802_v10 = vadd.f32 %v4717_v14, %v2763_v25  ;;  %v3490_v9 = vpop.f32.mrb[20].mxu1 }
 0x1fd   : > { %v2831_v30 = vmax.f32 %v2799_v36, 0.0  ;;  %v2800_v21 = vadd.f32 %v4717_v14, %v2761_v19  ;;  %v1810_v37 = vpop.f32.mrb[21].mxu1  ;;  %v3634_v1 = vpop.f32.mrb[20].mxu0 }
 0x1fe   : > { %2866 = vst.msk [vmem:[%s4727_s14 + $0x90] sm:$0xff] %vm2847_vm6, %v2833_v7  ;;  %v2834_v48 = vmax.f32 %v2802_v10, 0.0  ;;  %v3668_v26 = vadd.f32 %v3634_v1, %v3490_v9  ;;  %v3491_v62 = vpop.f32.mrb[22].mxu1  ;;  %v2658_v54 = vpop.f32.mrb[21].mxu0 }
 0x1ff   : > { %2864 = vst.msk [vmem:[%s4727_s14 + $0x80] sm:$0xff] %vm2847_vm6, %v2831_v30  ;;  %v2832_v27 = vmax.f32 %v2800_v21, 0.0  ;;  %v3669_v38 = vadd.f32 %v2658_v54, %v1810_v37  ;;  %v1813_v47 = vpop.f32.mrb[23].mxu1  ;;  %v3635_v12 = vpop.f32.mrb[22].mxu0 }
 0x200   : > { %2867 = vst.msk [vmem:[%s4727_s14 + $0x98] sm:$0xff] %vm2847_vm6, %v2834_v48  ;;  %v2766_v16 = vmul.f32 %v3668_v26, %v4712_v13  ;;  %v3670_v22 = vadd.f32 %v3635_v12, %v3491_v62  ;;  %v2661_v29 = vpop.f32.mrb[23].mxu0 }
 0x201   : > { %2865 = vst.msk [vmem:[%s4727_s14 + $0x88] sm:$0xff] %vm2847_vm6, %v2832_v27  ;;  %v2764_v23 = vmul.f32 %v3669_v38, %v4712_v13  ;;  %v3671_v61 = vadd.f32 %v2661_v29, %v1813_v47 }
 0x202   : > { %v2805_v11 = vadd.f32 %v4717_v14, %v2766_v16  ;;  %v2767_v8 = vmul.f32 %v3670_v22, %v4712_v13 }
 0x203   : > { %v2803_v51 = vadd.f32 %v4717_v14, %v2764_v23  ;;  %v2765_v41 = vmul.f32 %v3671_v61, %v4712_v13 }
 0x204   : > { %v2837_v55 = vmax.f32 %v2805_v11, 0.0  ;;  %v2806_v32 = vadd.f32 %v4717_v14, %v2767_v8  ;;  %v3494_v45 = vpop.f32.mrb[24].mxu1 }
 0x205   : > { %v2835_v28 = vmax.f32 %v2803_v51, 0.0  ;;  %v2804_v4 = vadd.f32 %v4717_v14, %v2765_v41  ;;  %v1826_v34 = vpop.f32.mrb[25].mxu1  ;;  %v3638_v15 = vpop.f32.mrb[24].mxu0 }
 0x206   : > { %2870 = vst.msk [vmem:[%s4727_s14 + $0xb0] sm:$0xff] %vm2847_vm6, %v2837_v55  ;;  %v2838_v0 = vmax.f32 %v2806_v32, 0.0  ;;  %v3672_v17 = vadd.f32 %v3638_v15, %v3494_v45  ;;  %v3495_v53 = vpop.f32.mrb[26].mxu1  ;;  %v2674_v2 = vpop.f32.mrb[25].mxu0 }
 0x207   : > { %2868 = vst.msk [vmem:[%s4727_s14 + $0xa0] sm:$0xff] %vm2847_vm6, %v2835_v28  ;;  %v2836_v6 = vmax.f32 %v2804_v4, 0.0  ;;  %v3673_v5 = vadd.f32 %v2674_v2, %v1826_v34  ;;  %v1829_v59 = vpop.f32.mrb[27].mxu1  ;;  %v3639_v60 = vpop.f32.mrb[26].mxu0 }
 0x208   : > { %2871 = vst.msk [vmem:[%s4727_s14 + $0xb8] sm:$0xff] %vm2847_vm6, %v2838_v0  ;;  %v2770_v3 = vmul.f32 %v3672_v17, %v4712_v13  ;;  %v3674_v31 = vadd.f32 %v3639_v60, %v3495_v53  ;;  %v2677_v40 = vpop.f32.mrb[27].mxu0 }
 0x209   : > { %2869 = vst.msk [vmem:[%s4727_s14 + $0xa8] sm:$0xff] %vm2847_vm6, %v2836_v6  ;;  %v2768_v35 = vmul.f32 %v3673_v5, %v4712_v13  ;;  %v3675_v50 = vadd.f32 %v2677_v40, %v1829_v59 }
 0x20a   : > { %v2809_v58 = vadd.f32 %v4717_v14, %v2770_v3  ;;  %v2771_v24 = vmul.f32 %v3674_v31, %v4712_v13 }
 0x20b   : > { %v2807_v39 = vadd.f32 %v4717_v14, %v2768_v35  ;;  %v2769_v46 = vmul.f32 %v3675_v50, %v4712_v13 }
 0x20c   : > { %v2841_v57 = vmax.f32 %v2809_v58, 0.0  ;;  %v2810_v49 = vadd.f32 %v4717_v14, %v2771_v24  ;;  %v3498_v44 = vpop.f32.mrb[28].mxu1 }
 0x20d   : > { %v2839_v43 = vmax.f32 %v2807_v39, 0.0  ;;  %v2808_v33 = vadd.f32 %v4717_v14, %v2769_v46  ;;  %v1842_v52 = vpop.f32.mrb[29].mxu1  ;;  %v3642_v20 = vpop.f32.mrb[28].mxu0 }
 0x20e   : > { %2874 = vst.msk [vmem:[%s4727_s14 + $0xd0] sm:$0xff] %vm2847_vm6, %v2841_v57  ;;  %v2842_v18 = vmax.f32 %v2810_v49, 0.0  ;;  %v3676_v63 = vadd.f32 %v3642_v20, %v3498_v44  ;;  %v3499_v42 = vpop.f32.mrb[30].mxu1  ;;  %v2690_v56 = vpop.f32.mrb[29].mxu0 }
 0x20f   : > { %2872 = vst.msk [vmem:[%s4727_s14 + $0xc0] sm:$0xff] %vm2847_vm6, %v2839_v43  ;;  %v2840_v25 = vmax.f32 %v2808_v33, 0.0  ;;  %v3677_v36 = vadd.f32 %v2690_v56, %v1842_v52  ;;  %v1845_v19 = vpop.f32.mrb[31].mxu1  ;;  %v3643_v7 = vpop.f32.mrb[30].mxu0 }
 0x210   : > { %2875 = vst.msk [vmem:[%s4727_s14 + $0xd8] sm:$0xff] %vm2847_vm6, %v2842_v18  ;;  %v2774_v10 = vmul.f32 %v3676_v63, %v4712_v13  ;;  %v3678_v9 = vadd.f32 %v3643_v7, %v3499_v42  ;;  %v2693_v30 = vpop.f32.mrb[31].mxu0 }
 0x211   : > { %2873 = vst.msk [vmem:[%s4727_s14 + $0xc8] sm:$0xff] %vm2847_vm6, %v2840_v25  ;;  %v2772_v21 = vmul.f32 %v3677_v36, %v4712_v13  ;;  %v3679_v37 = vadd.f32 %v2693_v30, %v1845_v19 }
 0x212   : > { %v2813_v1 = vadd.f32 %v4717_v14, %v2774_v10  ;;  %v2775_v48 = vmul.f32 %v3678_v9, %v4712_v13 }
 0x213   : > { %v2811_v26 = vadd.f32 %v4717_v14, %v2772_v21  ;;  %v2773_v62 = vmul.f32 %v3679_v37, %v4712_v13 }
 0x214   : > { %v2845_v54 = vmax.f32 %v2813_v1, 0.0  ;;  %v2814_v27 = vadd.f32 %v4717_v14, %v2775_v48 }
 0x215   : > { %v2843_v38 = vmax.f32 %v2811_v26, 0.0  ;;  %v2812_v47 = vadd.f32 %v4717_v14, %v2773_v62 }
 0x216   : > { %2878 = vst.msk [vmem:[%s4727_s14 + $0xf0] sm:$0xff] %vm2847_vm6, %v2845_v54  ;;  %v2846_v12 = vmax.f32 %v2814_v27, 0.0 }
 0x217   : > { %2876 = vst.msk [vmem:[%s4727_s14 + $0xe0] sm:$0xff] %vm2847_vm6, %v2843_v38  ;;  %v2844_v16 = vmax.f32 %v2812_v47, 0.0 }
 0x218   : > { %2879 = vst.msk [vmem:[%s4727_s14 + $0xf8] sm:$0xff] %vm2847_vm6, %v2846_v12 }
 0x219   : > { %2877 = vst.msk [vmem:[%s4727_s14 + $0xe8] sm:$0xff] %vm2847_vm6, %v2844_v16 }
 0x21a PF: > { %s14_s15 = sadd.s32 1, %s3953_s15  }
 0x21b   : > { %p11_p4 = scmp.ge.s32.totalorder %s14_s15, 4  }
 0x21d   :  { %13 = sbr.rel (!%p11_p4) target bundleno = 1 (0x1), region = 74 }

// kernel: psp_forward.2
= control target key start
LH: loop header
LB: loop body
LE: loop exit
PB: predicated region body
PF: predicated region fallthrough
CT: control target
= control target key end

     0   :  { %s4677_s21 = smov 0   ;;  %s5846_s0 = inlined_call_operand.vmem [shape: bf16[2,16,16,16], index: 0, kind: input, shape index: {}]   ;;  %s5847_s1 = inlined_call_operand.vmem [shape: bf16[4,40,256], index: 1, kind: input, shape index: {}]   ;;  %s5848_s2 = inlined_call_operand.vmem [shape: bf16[4,16,4], index: 2, kind: input, shape index: {}]   ;;  %s5849_s3 = inlined_call_operand.vmem [shape: f32[4,1,4], index: 3, kind: input, shape index: {}]   ;;  %s5850_s4 = inlined_call_operand.vmem [shape: f32[4,1,4], index: 4, kind: input, shape index: {}]   ;;  %s5851_s5 = inlined_call_operand.vmem [shape: bf16[4,256,40], index: 5, kind: input, shape index: {}]   ;;  %s5852_s6 = inlined_call_operand.vmem [shape: bf16[2,16,16,32], index: 6, kind: output, shape index: {}]  }
   0x1 LB: > { %s3467_s22 = sadd.s32 4294967295, %s4634_s21   ;;  %p3471_p0 = scmp.ge.s32.totalorder %s4634_s21, 1  ;;  %s4634_s21 = sphi %s4677_s21, %s16_s21  }
   0x2   : > { %p212_p1 = scmp.lt.s32.totalorder %s4634_s21, 3 }
   0x4   : > { %p213_p2 = pnand %p3471_p0, %p212_p1 }
   0x6   : > { %216 = sbr.rel (%p213_p2) target bundleno = 1898 (0x76a), region = 44 }
   0xd   : > { %p242_p3 = scmp.lt.s32.totalorder %s3467_s22, 1  ;;  %v4530_v0 = vld [vmem:[%s5847_s1 + $0x4] ss:$8 sps:$4 sm:$0xff]   ;;  %v4528_v49 = vld [vmem:[%s5847_s1] ss:$8 sps:$4 sm:$0xff]   ;;  %v5853_v56 = vmov 0.0  }
   0xe   : > { %478 = vmatprep.mubr.bf16.mxu0 %v4530_v0  ;;  %v4531_v50 = vld [vmem:[%s5847_s1 + $0x14] ss:$8 sps:$4 sm:$0xff]   ;;  %v322_v51 = vld [vmem:[%s5847_s1 + $0x20] sm:$0xff]  ;;  %v4533_v52 = vld [vmem:[%s5847_s1 + $0x10] ss:$8 sps:$4 sm:$0xff]   ;;  %4279 = vmatprep.subr.bf16.mxu1 %v5853_v56  ;;  %vm4637_vm0 = vmmov 0  }
   0xf   : > { %s5872_s22 = smov (!%p242_p3, %s3467_s22), 1  ;;  %v3481_v53 = vcombine.high %v322_v51, %v322_v51  ;;  %v3480_v54 = vcombine.low %v322_v51, %v322_v51  ;;  %v4536_v55 = vld [vmem:[%s5848_s2] sm:$0xff]   ;;  %4281 = vmatprep.mubr.msk.bf16.mxu1 %vm4637_vm0, %v5853_v56  ;;  %vm513_vm1 = vcmask 130048   ;;  %vm723_vm2 = vcmask 326656   ;;  %s4639_s16 = smov 20  }
  0x10   : > { %s3921_s25 = sshll.u32 %s5872_s22, 7  ;;  %4280 = vmatpush3.bf16.msra.mxu1 %v4536_v55  ;;  %vm772_vm3 = vcmask 1043456   ;;  %vm285_vm4 = vcmask 125952   ;;  %s4638_s22 = smov 16   ;;  %vm1129_vm5 = vcmask 158848   ;;  %vm1879_vm6 = vcmask 191648  }
  0x11   : > { %s4696_s28 = scalar_lea.vmem %s5846_s0, %s3921_s25  ;;  %s5015_s26 = scalar_lea.vmem %s5852_s6, %s3921_s25  ;;  %vm2629_vm7 = vcmask 224448   ;;  %vm3379_vm8 = vcmask 257248  }
  0x12   : > { %v4699_v1 = vld [vmem:[%s4696_s28 + $0x40] sm:$0xf]  ;;  %v4702_v2 = vld [vmem:[%s4696_s28 + $0x44] sm:$0xf]  ;;  %v4715_v6 = vld [vmem:[%s4696_s28 + $0x48] sm:$0xf] }
  0x13   : > { %v4705_v3 = vld [vmem:[%s4696_s28] sm:$0xf]  ;;  %v4709_v4 = vcombine.low %v4699_v1, %v4702_v2  ;;  %v4712_v5 = vld [vmem:[%s4696_s28 + $0x4] sm:$0xf]  ;;  %v4718_v7 = vld [vmem:[%s4696_s28 + $0x4c] sm:$0xf] }
  0x14   : > { %v4722_v8 = vcombine.low %v4705_v3, %v4712_v5  ;;  %v4726_v9 = vcombine.low %v4715_v6, %v4718_v7  ;;  %v4729_v10 = vld [vmem:[%s4696_s28 + $0x8] sm:$0xf]  ;;  %v4732_v11 = vld [vmem:[%s4696_s28 + $0xc] sm:$0xf]  ;;  %v4735_v12 = vld [vmem:[%s4696_s28 + $0x50] sm:$0xf] }
  0x15   : > { %4051 = vmatprep.subr.bf16.mxu0 %v4709_v4  ;;  %v4739_v13 = vld [vmem:[%s4696_s28 + $0x54] sm:$0xf]  ;;  %v4744_v14 = vcombine.low %v4729_v10, %v4732_v11  ;;  %v4752_v16 = vld [vmem:[%s4696_s28 + $0x10] sm:$0xf]  ;;  %v4758_v18 = vld [vmem:[%s4696_s28 + $0x58] sm:$0xf] }
  0x16   : > { %4052 = vmatpush3.bf16.msra.mxu0 %v4722_v8  ;;  %v4749_v15 = vcombine.low %v4735_v12, %v4739_v13  ;;  %v4755_v17 = vld [vmem:[%s4696_s28 + $0x14] sm:$0xf]  ;;  %v4761_v19 = vld [vmem:[%s4696_s28 + $0x5c] sm:$0xf]  ;;  %v4774_v22 = vld [vmem:[%s4696_s28 + $0x18] sm:$0xf] }
  0x17   : > { %4053 = vmatprep.subr.bf16.mxu0 %v4726_v9  ;;  %v4766_v20 = vcombine.low %v4752_v16, %v4755_v17  ;;  %v4771_v21 = vcombine.low %v4758_v18, %v4761_v19  ;;  %v4777_v23 = vld [vmem:[%s4696_s28 + $0x1c] sm:$0xf]  ;;  %v4780_v24 = vld [vmem:[%s4696_s28 + $0x60] sm:$0xf]  ;;  %v4783_v25 = vld [vmem:[%s4696_s28 + $0x64] sm:$0xf] }
  0x18   : > { %v4786_v26 = vld [vmem:[%s4696_s28 + $0x20] sm:$0xf]  ;;  %v4789_v27 = vld [vmem:[%s4696_s28 + $0x24] sm:$0xf]  ;;  %v4794_v28 = vcombine.low %v4774_v22, %v4777_v23  ;;  %v4797_v29 = vld [vmem:[%s4696_s28 + $0x68] sm:$0xf]  ;;  %v4805_v31 = vcombine.low %v4780_v24, %v4783_v25 }
  0x19   : > { %v4800_v30 = vld [vmem:[%s4696_s28 + $0x6c] sm:$0xf]  ;;  %v4808_v32 = vld [vmem:[%s4696_s28 + $0x28] sm:$0xf]  ;;  %v4816_v34 = vcombine.low %v4786_v26, %v4789_v27  ;;  %v4819_v35 = vld [vmem:[%s4696_s28 + $0x70] sm:$0xf] }
  0x1a   : > { %4054 = vmatpush3.bf16.msra.mxu0 %v4744_v14  ;;  %5860 = vst [vmem:[#allocation2_spill] sm:$0xff] %v4800_v30  ;;  %v4811_v33 = vld [vmem:[%s4696_s28 + $0x2c] sm:$0xf]  ;;  %5861 = vst [vmem:[#allocation3_spill] sm:$0xff] %v4819_v35  ;;  %v4822_v36 = vld [vmem:[%s4696_s28 + $0x74] sm:$0xf]  ;;  %v4827_v37 = vcombine.low %v4797_v29, %v4800_v30 }
  0x1b   : > { %4055 = vmatprep.subr.bf16.mxu0 %v4749_v15  ;;  %5862 = vst [vmem:[#allocation4_spill] sm:$0xff] %v4822_v36  ;;  %v4830_v38 = vld [vmem:[%s4696_s28 + $0x30] sm:$0xf]  ;;  %v4833_v39 = vld [vmem:[%s4696_s28 + $0x34] sm:$0xf]  ;;  %v4838_v40 = vcombine.low %v4808_v32, %v4811_v33  ;;  %v4849_v43 = vcombine.low %v4819_v35, %v4822_v36  ;;  %s4640_s11 = smov 24  }
  0x1c   : > { %v4841_v41 = vld [vmem:[%s4696_s28 + $0x78] sm:$0xf]  ;;  %v4844_v42 = vld [vmem:[%s4696_s28 + $0x7c] sm:$0xf]  ;;  %v4860_v46 = vcombine.low %v4830_v38, %v4833_v39  ;;  %288 = vst.msk [vmem:[%s5015_s26 + $0x8] sm:$0xf] %vm285_vm4, %v4729_v10 }
  0x1d   : > { %5863 = vst [vmem:[#allocation5_spill] sm:$0xff] %v4841_v41  ;;  %5864 = vst [vmem:[#allocation6_spill] sm:$0xff] %v4844_v42  ;;  %v4852_v44 = vld [vmem:[%s4696_s28 + $0x38] sm:$0xf]  ;;  %v4855_v45 = vld [vmem:[%s4696_s28 + $0x3c] sm:$0xf]  ;;  %v4865_v47 = vcombine.low %v4841_v41, %v4844_v42 }
  0x1e   : > { %4056 = vmatpush3.bf16.msra.mxu0 %v4766_v20  ;;  %v4870_v48 = vcombine.low %v4852_v44, %v4855_v45  ;;  %286 = vst.msk [vmem:[%s5015_s26] sm:$0xf] %vm285_vm4, %v4705_v3  ;;  %287 = vst.msk [vmem:[%s5015_s26 + $0x4] sm:$0xf] %vm285_vm4, %v4712_v5  ;;  %s4641_s8 = smov 28  }
  0x1f   : > { %4057 = vmatprep.subr.bf16.mxu0 %v4771_v21  ;;  %289 = vst.msk [vmem:[%s5015_s26 + $0xc] sm:$0xf] %vm285_vm4, %v4732_v11  ;;  %290 = vst.msk [vmem:[%s5015_s26 + $0x10] sm:$0xf] %vm285_vm4, %v4752_v16 }
  0x20   : > { %291 = vst.msk [vmem:[%s5015_s26 + $0x14] sm:$0xf] %vm285_vm4, %v4755_v17  ;;  %292 = vst.msk [vmem:[%s5015_s26 + $0x18] sm:$0xf] %vm285_vm4, %v4774_v22 }
  0x21   : > { %293 = vst.msk [vmem:[%s5015_s26 + $0x1c] sm:$0xf] %vm285_vm4, %v4777_v23  ;;  %294 = vst.msk [vmem:[%s5015_s26 + $0x20] sm:$0xf] %vm285_vm4, %v4786_v26 }
  0x22   : > { %4058 = vmatpush3.bf16.msra.mxu0 %v4794_v28  ;;  %295 = vst.msk [vmem:[%s5015_s26 + $0x24] sm:$0xf] %vm285_vm4, %v4789_v27  ;;  %296 = vst.msk [vmem:[%s5015_s26 + $0x28] sm:$0xf] %vm285_vm4, %v4808_v32  ;;  %v5868_v3 = vld [vmem:[#allocation4_spill] sm:$0xff] }
  0x23   : > { %4059 = vmatprep.subr.bf16.mxu0 %v4805_v31  ;;  %297 = vst.msk [vmem:[%s5015_s26 + $0x2c] sm:$0xf] %vm285_vm4, %v4811_v33  ;;  %298 = vst.msk [vmem:[%s5015_s26 + $0x30] sm:$0xf] %vm285_vm4, %v4830_v38 }
  0x24   : > { %299 = vst.msk [vmem:[%s5015_s26 + $0x34] sm:$0xf] %vm285_vm4, %v4833_v39  ;;  %300 = vst.msk [vmem:[%s5015_s26 + $0x38] sm:$0xf] %vm285_vm4, %v4852_v44  ;;  %v5869_v5 = vld [vmem:[#allocation5_spill] sm:$0xff] }
  0x25   : > { %301 = vst.msk [vmem:[%s5015_s26 + $0x3c] sm:$0xf] %vm285_vm4, %v4855_v45  ;;  %302 = vst.msk [vmem:[%s5015_s26 + $0x40] sm:$0xf] %vm285_vm4, %v4699_v1  ;;  %v5866_v1 = vld [vmem:[#allocation2_spill] sm:$0xff] }
  0x26   : > { %4060 = vmatpush3.bf16.msra.mxu0 %v4816_v34  ;;  %303 = vst.msk [vmem:[%s5015_s26 + $0x44] sm:$0xf] %vm285_vm4, %v4702_v2  ;;  %304 = vst.msk [vmem:[%s5015_s26 + $0x48] sm:$0xf] %vm285_vm4, %v4715_v6  ;;  %v5867_v2 = vld [vmem:[#allocation3_spill] sm:$0xff]  ;;  %v5870_v6 = vld [vmem:[#allocation6_spill] sm:$0xff] }
  0x27   : > { %4061 = vmatprep.subr.bf16.mxu0 %v4827_v37  ;;  %305 = vst.msk [vmem:[%s5015_s26 + $0x4c] sm:$0xf] %vm285_vm4, %v4718_v7  ;;  %306 = vst.msk [vmem:[%s5015_s26 + $0x50] sm:$0xf] %vm285_vm4, %v4735_v12 }
  0x28   : > { %307 = vst.msk [vmem:[%s5015_s26 + $0x54] sm:$0xf] %vm285_vm4, %v4739_v13  ;;  %308 = vst.msk [vmem:[%s5015_s26 + $0x58] sm:$0xf] %vm285_vm4, %v4758_v18 }
  0x29   : > { %309 = vst.msk [vmem:[%s5015_s26 + $0x5c] sm:$0xf] %vm285_vm4, %v4761_v19  ;;  %310 = vst.msk [vmem:[%s5015_s26 + $0x60] sm:$0xf] %vm285_vm4, %v4780_v24 }
  0x2a   : > { %4062 = vmatpush3.bf16.msra.mxu0 %v4838_v40  ;;  %311 = vst.msk [vmem:[%s5015_s26 + $0x64] sm:$0xf] %vm285_vm4, %v4783_v25  ;;  %312 = vst.msk [vmem:[%s5015_s26 + $0x68] sm:$0xf] %vm285_vm4, %v4797_v29 }
  0x2b   : > { %4063 = vmatprep.subr.bf16.mxu0 %v4849_v43  ;;  %313 = vst.msk [vmem:[%s5015_s26 + $0x6c] sm:$0xf] %vm285_vm4, %v5866_v1  ;;  %314 = vst.msk [vmem:[%s5015_s26 + $0x70] sm:$0xf] %vm285_vm4, %v5867_v2 }
  0x2c   : > { %315 = vst.msk [vmem:[%s5015_s26 + $0x74] sm:$0xf] %vm285_vm4, %v5868_v3  ;;  %316 = vst.msk [vmem:[%s5015_s26 + $0x78] sm:$0xf] %vm285_vm4, %v5869_v5 }
  0x2d   : > { %317 = vst.msk [vmem:[%s5015_s26 + $0x7c] sm:$0xf] %vm285_vm4, %v5870_v6 }
  0x2e   : > { %4064 = vmatpush3.bf16.msra.mxu0 %v4860_v46 }
  0x2f   : > { %4065 = vmatprep.subr.bf16.mxu0 %v4865_v47 }
  0x32   : > { %4066 = vmatpush3.bf16.msra.mxu0 %v4870_v48 }
  0x35   : > { %479 = vmatmul.mubr.bf16.vlgmr.msra.gmra.mrb[0].mxu0 %v4528_v49 }
  0x36   : > { %486 = vmatprep.mubr.bf16.mxu0 %v4531_v50 }
  0x3d   : > { %487 = vmatmul.mubr.bf16.gmra.mrb[4].mxu0 %v4533_v52 }
  0x3e   : > { %494 = vmatprep.mubr.bf16.mxu0 %v3481_v53 }
  0x45   : > { %495 = vmatmul.mubr.bf16.gmra.mrb[8].mxu0 %v3480_v54 }
 0x108   : > { %v4067_v57 = vpop.f32.mrb[0].mxu0 }
 0x109   : > { %v4068_v58 = vpop.f32.mrb[1].mxu0 }
 0x10a   : > { %v4069_v59 = vadd.f32 %v4068_v58, %v4067_v57  ;;  %v4070_v60 = vpop.f32.mrb[2].mxu0 }
 0x10b   : > { %v4071_v61 = vpop.f32.mrb[3].mxu0 }
 0x10c   : > { %v4072_v62 = vadd.f32 %v4071_v61, %v4070_v60 }
 0x10e   : > { %v502_v63 = vpack.c.bf16 %v4072_v62, %v4069_v59  ;;  %v4537_v62 = vld [vmem:[%s5851_s5] sm:$0xff]  }
 0x10f   : > { %4299 = vmatprep.mubr.msk.bf16.mxu0 %vm723_vm2, %v4537_v62 }
 0x110   : > { %v4073_v0 = vpop.f32.mrb[4].mxu0  ;;  %4282 = vmatmul.mubr.msk.bf16.vlgmr.msra.gmra.mrb[0].mxu1 %vm513_vm1, %v502_v63  ;;  %v4538_v63 = vld [vmem:[%s5851_s5 + $0x40] sm:$0xff]  }
 0x111   : > { %v4074_v49 = vpop.f32.mrb[5].mxu0  ;;  %4285 = vmatprep.mubr.msk.bf16.mxu1 %vm4637_vm0, %v5853_v56 }
 0x112   : > { %v4075_v50 = vadd.f32 %v4074_v49, %v4073_v0  ;;  %v4076_v51 = vpop.f32.mrb[6].mxu0  ;;  %v3502_v0 = vld [vmem:[%s5849_s3] ss:$0 sm:$0xff] }
 0x113   : > { %v4077_v52 = vpop.f32.mrb[7].mxu0 }
 0x114   : > { %v4078_v53 = vadd.f32 %v4077_v52, %v4076_v51 }
 0x116   : > { %v503_v54 = vpack.c.bf16 %v4078_v53, %v4075_v50  ;;  %v3503_v50 = vld [vmem:[%s5850_s4] ss:$0 sm:$0xff] }
 0x118   : > { %v4079_v55 = vpop.f32.mrb[8].mxu0  ;;  %4286 = vmatmul.mubr.msk.bf16.gmra.mrb[4].mxu1 %vm513_vm1, %v503_v54 }
 0x119   : > { %v4080_v57 = vpop.f32.mrb[9].mxu0  ;;  %4289 = vmatprep.mubr.msk.bf16.mxu1 %vm4637_vm0, %v5853_v56 }
 0x11a   : > { %v4081_v58 = vadd.f32 %v4080_v57, %v4079_v55  ;;  %v4082_v59 = vpop.f32.mrb[10].mxu0 }
 0x11b   : > { %v4083_v60 = vpop.f32.mrb[11].mxu0 }
 0x11c   : > { %v504_v61 = vpack.c.bf16 %v4081_v58, %v4081_v58 }
 0x120   : > { %4290 = vmatmul.mubr.msk.bf16.gmra.mrb[8].mxu1 %vm513_vm1, %v504_v61 }
 0x121   : > { %4315 = vmatprep.mubr.msk.bf16.mxu1 %vm723_vm2, %v4538_v63 }
 0x1e3   : > { %v557_v49 = vpop.f32.mrb[0].mxu1 }
 0x1e4   : > { %v586_v51 = vmul.f32 %v3502_v0, %v557_v49  ;;  %v4283_v52 = vpop.f32.mrb[1].mxu1 }
 0x1e5   : > { %v560_v53 = vpop.f32.mrb[2].mxu1 }
 0x1e6   : > { %v598_v54 = vadd.f32 %v3503_v50, %v586_v51  ;;  %v587_v55 = vmul.f32 %v3502_v0, %v560_v53  ;;  %v4284_v57 = vpop.f32.mrb[3].mxu1 }
 0x1e8   : > { %v599_v58 = vadd.f32 %v3503_v50, %v587_v55  ;;  %v603_v59 = vmax.f32 %v598_v54, 0.0 }
 0x1ea   : > { %v604_v60 = vmax.f32 %v599_v58, 0.0 }
 0x1eb   : > { %v565_v61 = vpop.f32.mrb[4].mxu1 }
 0x1ec   : > { %v640_v62 = vpack.c.bf16 %v604_v60, %v603_v59  ;;  %v588_v63 = vmul.f32 %v3502_v0, %v565_v61  ;;  %v4287_v56 = vpop.f32.mrb[5].mxu1  ;;  %v4546_v60 = vld [vmem:[%s5851_s5 + $0x58] sm:$0xff]   ;;  %v4543_v61 = vld [vmem:[%s5851_s5 + $0x20] sm:$0xff]  }
 0x1ed   : > { %v568_v42 = vpop.f32.mrb[6].mxu1  ;;  %v4540_v56 = vld [vmem:[%s5851_s5 + $0x48] sm:$0xff]  }
 0x1ee   : > { %v600_v41 = vadd.f32 %v3503_v50, %v588_v63  ;;  %v589_v36 = vmul.f32 %v3502_v0, %v568_v42  ;;  %v4288_v35 = vpop.f32.mrb[7].mxu1  ;;  %4293 = vmatprep.subr.bf16.mxu0 %v640_v62  ;;  %4487 = vmatprep.subr.bf16.mxu1 %v640_v62  ;;  %v4544_v63 = vld [vmem:[%s5851_s5 + $0x28] sm:$0xff]  }
 0x1ef   : > { %4294 = vmatpush3.bf16.msra.mxu0 %v640_v62  ;;  %4490 = vmatpush3.bf16.msra.mxu1 %v640_v62  ;;  %v4552_v62 = vld [vmem:[%s5851_s5 + $0x60] sm:$0xff]  }
 0x1f0   : > { %v601_v49 = vadd.f32 %v3503_v50, %v589_v36  ;;  %v605_v52 = vmax.f32 %v600_v41, 0.0  ;;  %v4539_v41 = vld [vmem:[%s5851_s5 + $0x8] sm:$0xff]  }
 0x1f2   : > { %v606_v51 = vmax.f32 %v601_v49, 0.0  ;;  %v4553_v49 = vld [vmem:[%s5851_s5 + $0x68] sm:$0xff]  }
 0x1f3   : > { %v573_v53 = vpop.f32.mrb[8].mxu1 }
 0x1f4   : > { %v641_v57 = vpack.c.bf16 %v606_v51, %v605_v52  ;;  %v590_v55 = vmul.f32 %v3502_v0, %v573_v53  ;;  %v4291_v54 = vpop.f32.mrb[9].mxu1  ;;  %v4545_v0 = vld [vmem:[%s5851_s5 + $0x50] sm:$0xff]   ;;  %v4548_v53 = vld [vmem:[%s5851_s5 + $0x38] sm:$0xff]  }
 0x1f5   : > { %v576_v58 = vpop.f32.mrb[10].mxu1  ;;  %v4547_v52 = vld [vmem:[%s5851_s5 + $0x30] sm:$0xff]  }
 0x1f6   : > { %v602_v30 = vadd.f32 %v3503_v50, %v590_v55  ;;  %v4292_v59 = vpop.f32.mrb[11].mxu1  ;;  %4295 = vmatprep.subr.bf16.mxu0 %v641_v57  ;;  %4488 = vmatprep.subr.bf16.mxu1 %v641_v57  ;;  %v4542_v50 = vld [vmem:[%s5851_s5 + $0x18] sm:$0xff]   ;;  %v4557_v51 = vld [vmem:[%s5851_s5 + $0x70] sm:$0xff]  }
 0x1f7   : > { %4296 = vmatpush3.bf16.msra.mxu0 %v641_v57  ;;  %4491 = vmatpush3.bf16.msra.mxu1 %v641_v57  ;;  %v4558_v57 = vld [vmem:[%s5851_s5 + $0x78] sm:$0xff]   ;;  %v4551_v55 = vld [vmem:[%s5847_s1 + $0x2c] ss:$8 sps:$4 sm:$0xff]   ;;  %v4549_v54 = vld [vmem:[%s5847_s1 + $0x28] ss:$8 sps:$4 sm:$0xff]   ;;  %v5865_v59 = vmov 0.0  }
 0x1f8   : > { %v607_v42 = vmax.f32 %v602_v30, 0.0  ;;  %v4541_v30 = vld [vmem:[%s5851_s5 + $0x10] sm:$0xff]   ;;  %v4554_v58 = vld [vmem:[%s5847_s1 + $0x3c] ss:$8 sps:$4 sm:$0xff]  }
 0x1fa   : > { %v642_v35 = vpack.c.bf16 %v607_v42, %v607_v42  ;;  %v3572_v42 = vld [vmem:[%s5847_s1 + $0x48] sm:$0xff] }
 0x1fc   : > { %4493 = vmatprep.subr.msk.bf16.mxu0 %vm772_vm3, %v642_v35  ;;  %4494 = vmatprep.subr.msk.bf16.mxu1 %vm772_vm3, %v642_v35  ;;  %v774_v36 = vsel %vm772_vm3, %v642_v35, 0  ;;  %v4556_v35 = vld [vmem:[%s5847_s1 + $0x38] ss:$8 sps:$4 sm:$0xff]  }
 0x1fd   : > { %4298 = vmatpush3.bf16.msra.mxu0 %v774_v36  ;;  %4492 = vmatpush3.bf16.msra.mxu1 %v774_v36  ;;  %v3578_v36 = vcombine.high %v3572_v42, %v3572_v42 }
 0x1fe   : > { %4108 = vmatprep.subr.bf16.mxu0 %v4709_v4 }
 0x200   : > { %4300 = vmatmul.mubr.msk.bf16.vlgmr.msra.gmra.mrb[12].mxu0 %vm723_vm2, %v4539_v41  ;;  %4316 = vmatmul.mubr.msk.bf16.vlgmr.msra.gmra.mrb[12].mxu1 %vm723_vm2, %v4540_v56  ;;  %v3577_v41 = vcombine.low %v3572_v42, %v3572_v42  ;;  %v4561_v56 = vld [vmem:[%s5848_s2 + $0x8] sm:$0xff]  }
 0x201   : > { %4109 = vmatpush3.bf16.msra.mxu0 %v4722_v8  ;;  %4303 = vmatprep.mubr.msk.bf16.mxu0 %vm723_vm2, %v4541_v30 }
 0x202   : > { %4110 = vmatprep.subr.bf16.mxu0 %v4726_v9  ;;  %4319 = vmatprep.mubr.msk.bf16.mxu1 %vm723_vm2, %v4545_v0 }
 0x205   : > { %4111 = vmatpush3.bf16.msra.mxu0 %v4744_v14 }
 0x206   : > { %4112 = vmatprep.subr.bf16.mxu0 %v4749_v15 }
 0x208   : > { %4304 = vmatmul.mubr.msk.bf16.gmra.mrb[16].mxu0 %vm723_vm2, %v4542_v50  ;;  %4320 = vmatmul.mubr.msk.bf16.gmra.mrb[16].mxu1 %vm723_vm2, %v4546_v60 }
 0x209   : > { %4113 = vmatpush3.bf16.msra.mxu0 %v4766_v20  ;;  %4307 = vmatprep.mubr.msk.bf16.mxu0 %vm723_vm2, %v4543_v61 }
 0x20a   : > { %4114 = vmatprep.subr.bf16.mxu0 %v4771_v21  ;;  %4323 = vmatprep.mubr.msk.bf16.mxu1 %vm723_vm2, %v4552_v62 }
 0x20d   : > { %4115 = vmatpush3.bf16.msra.mxu0 %v4794_v28 }
 0x20e   : > { %4116 = vmatprep.subr.bf16.mxu0 %v4805_v31 }
 0x210   : > { %4308 = vmatmul.mubr.msk.bf16.gmra.mrb[20].mxu0 %vm723_vm2, %v4544_v63  ;;  %4324 = vmatmul.mubr.msk.bf16.gmra.mrb[20].mxu1 %vm723_vm2, %v4553_v49 }
 0x211   : > { %4117 = vmatpush3.bf16.msra.mxu0 %v4816_v34  ;;  %4311 = vmatprep.mubr.msk.bf16.mxu0 %vm723_vm2, %v4547_v52 }
 0x212   : > { %4118 = vmatprep.subr.bf16.mxu0 %v4827_v37  ;;  %4327 = vmatprep.mubr.msk.bf16.mxu1 %vm723_vm2, %v4557_v51 }
 0x215   : > { %4119 = vmatpush3.bf16.msra.mxu0 %v4838_v40 }
 0x216   : > { %4120 = vmatprep.subr.bf16.mxu0 %v4849_v43 }
 0x218   : > { %4312 = vmatmul.mubr.msk.bf16.gmra.mrb[24].mxu0 %vm723_vm2, %v4548_v53  ;;  %4328 = vmatmul.mubr.msk.bf16.gmra.mrb[24].mxu1 %vm723_vm2, %v4558_v57 }
 0x219   : > { %4121 = vmatpush3.bf16.msra.mxu0 %v4860_v46  ;;  %1227 = vmatprep.mubr.bf16.mxu0 %v4551_v55 }
 0x21a   : > { %4122 = vmatprep.subr.bf16.mxu0 %v4865_v47 }
 0x21d   : > { %4123 = vmatpush3.bf16.msra.mxu0 %v4870_v48 }
 0x21e   : > { %4331 = vmatprep.subr.bf16.mxu0 %v5865_v59 }
 0x220   : > { %1228 = vmatmul.mubr.bf16.vlgmr.msra.gmra.mrb[28].mxu0 %v4549_v54 }
 0x221   : > { %1235 = vmatprep.mubr.bf16.mxu0 %v4554_v58  ;;  %4332 = vmatpush3.bf16.msra.mxu0 %v4561_v56 }
 0x222   : > { %4165 = vmatprep.subr.bf16.mxu0 %v4709_v4 }
 0x228   : > { %1236 = vmatmul.mubr.bf16.gmra.mrb[32].mxu0 %v4556_v35 }
 0x229   : > { %1243 = vmatprep.mubr.bf16.mxu0 %v3578_v36 }
 0x230   : > { %1244 = vmatmul.mubr.bf16.gmra.mrb[36].mxu0 %v3577_v41 }
 0x231   : > { %4333 = vmatprep.mubr.msk.bf16.mxu0 %vm4637_vm0, %v5865_v59 }
 0x2d3   : > { %v4301_v7 = vpop.f32.mrb[12].mxu0  ;;  %v4317_v10 = vpop.f32.mrb[12].mxu1 }
 0x2d4   : > { %v3925_v11 = vpack.c.bf16 %v4301_v7, %v4301_v7  ;;  %v3941_v12 = vpack.c.bf16 %v4317_v10, %v4317_v10  ;;  %v810_v13 = vpop.f32.mrb[13].mxu0  ;;  %v874_v16 = vpop.f32.mrb[13].mxu1 }
 0x2d5   : > { %v4302_v17 = vpop.f32.mrb[14].mxu0  ;;  %v4318_v18 = vpop.f32.mrb[14].mxu1  ;;  %v3923_v23 = vpack.c.bf16 %v810_v13, %v810_v13  ;;  %v3939_v25 = vpack.c.bf16 %v874_v16, %v874_v16 }
 0x2d6   : > { %1037 = vrot.lane.b32.xlu1 %v3925_v11, %s4638_s22  ;;  %v813_v19 = vpop.f32.mrb[15].mxu0  ;;  %1069 = vrot.lane.b32.xlu0 %v3941_v12, %s4638_s22  ;;  %v877_v22 = vpop.f32.mrb[15].mxu1  ;;  %v3926_v24 = vpack.c.bf16 %v4302_v17, %v4302_v17  ;;  %v3942_v26 = vpack.c.bf16 %v4318_v18, %v4318_v18 }
 0x2d7   : > { %v3940_v45 = vpack.c.bf16 %v877_v22, %v877_v22  ;;  %v3924_v0 = vpack.c.bf16 %v813_v19, %v813_v19 }
 0x2da   : > { %1039 = vrot.lane.b32.xlu1 %v3926_v24, %s4638_s22  ;;  %1033 = vrot.lane.b32.xlu0 %v3923_v23, %s4638_s22 }
 0x2db   : > { %v4305_v27 = vpop.f32.mrb[16].mxu0  ;;  %v4321_v29 = vpop.f32.mrb[16].mxu1 }
 0x2dc   : > { %v826_v32 = vpop.f32.mrb[17].mxu0  ;;  %v890_v33 = vpop.f32.mrb[17].mxu1  ;;  %v3929_v61 = vpack.c.bf16 %v4305_v27, %v4305_v27  ;;  %v3945_v53 = vpack.c.bf16 %v4321_v29, %v4321_v29 }
 0x2dd   : > { %v4306_v38 = vpop.f32.mrb[18].mxu0  ;;  %v4322_v39 = vpop.f32.mrb[18].mxu1  ;;  %v3927_v35 = vpack.c.bf16 %v826_v32, %v826_v32  ;;  %v3943_v3 = vpack.c.bf16 %v890_v33, %v890_v33 }
 0x2de   : > { %v829_v44 = vpop.f32.mrb[19].mxu0  ;;  %1065 = vrot.lane.b32.xlu0 %v3939_v25, %s4638_s22  ;;  %1071 = vrot.lane.b32.xlu1 %v3942_v26, %s4638_s22  ;;  %v893_v30 = vpop.f32.mrb[19].mxu1  ;;  %v3930_v62 = vpack.c.bf16 %v4306_v38, %v4306_v38  ;;  %v3946_v55 = vpack.c.bf16 %v4322_v39, %v4322_v39 }
 0x2df   : > { %v3928_v36 = vpack.c.bf16 %v829_v44, %v829_v44  ;;  %v3944_v6 = vpack.c.bf16 %v893_v30, %v893_v30 }
 0x2e2   : > { %1035 = vrot.lane.b32.xlu0 %v3924_v0, %s4638_s22  ;;  %1067 = vrot.lane.b32.xlu1 %v3940_v45, %s4638_s22 }
 0x2e3   : > { %v4309_v50 = vpop.f32.mrb[20].mxu0  ;;  %v4325_v60 = vpop.f32.mrb[20].mxu1 }
 0x2e4   : > { %v842_v63 = vpop.f32.mrb[21].mxu0  ;;  %v906_v49 = vpop.f32.mrb[21].mxu1  ;;  %v3933_v10 = vpack.c.bf16 %v4309_v50, %v4309_v50  ;;  %v3949_v17 = vpack.c.bf16 %v4325_v60, %v4325_v60 }
 0x2e5   : > { %v4310_v52 = vpop.f32.mrb[22].mxu0  ;;  %v4326_v51 = vpop.f32.mrb[22].mxu1  ;;  %v3931_v25 = vpack.c.bf16 %v842_v63, %v842_v63  ;;  %v3947_v33 = vpack.c.bf16 %v906_v49, %v906_v49 }
 0x2e6   : > { %v845_v57 = vpop.f32.mrb[23].mxu0  ;;  %1045 = vrot.lane.b32.xlu0 %v3929_v61, %s4638_s22  ;;  %1047 = vrot.lane.b32.xlu1 %v3930_v62, %s4638_s22  ;;  %v909_v54 = vpop.f32.mrb[23].mxu1  ;;  %v3934_v11 = vpack.c.bf16 %v4310_v52, %v4310_v52  ;;  %v3950_v19 = vpack.c.bf16 %v4326_v51, %v4326_v51 }
 0x2e7   : > { %v3932_v26 = vpack.c.bf16 %v845_v57, %v845_v57  ;;  %v3948_v38 = vpack.c.bf16 %v909_v54, %v909_v54 }
 0x2ea   : > { %1077 = vrot.lane.b32.xlu0 %v3945_v53, %s4638_s22  ;;  %1079 = vrot.lane.b32.xlu1 %v3946_v55, %s4638_s22  ;;  %v4564_v53 = vld [vmem:[%s5847_s1 + $0x54] ss:$8 sps:$4 sm:$0xff]  }
 0x2eb   : > { %v4313_v58 = vpop.f32.mrb[24].mxu0  ;;  %v5125_v42 = vpop.f32.mrb[24].mxu1 }
 0x2ec   : > { %v5127_v41 = vpop.f32.mrb[25].mxu0  ;;  %v5129_v56 = vpop.f32.mrb[25].mxu1  ;;  %v3937_v0 = vpack.c.bf16 %v4313_v58, %v4313_v58  ;;  %v3953_v63 = vpack.c.bf16 %v5125_v42, %v5125_v42  ;;  %v4562_v58 = vld [vmem:[%s5847_s1 + $0x50] ss:$8 sps:$4 sm:$0xff]   ;;  %v4565_v42 = vld [vmem:[%s5847_s1 + $0x64] ss:$8 sps:$4 sm:$0xff]  }
 0x2ed   : > { %v4314_v1 = vpop.f32.mrb[26].mxu0  ;;  %v5131_v2 = vpop.f32.mrb[26].mxu1  ;;  %v3935_v57 = vpack.c.bf16 %v5127_v41, %v5127_v41  ;;  %v3951_v54 = vpack.c.bf16 %v5129_v56, %v5129_v56 }
 0x2ee   : > { %v5133_v5 = vpop.f32.mrb[27].mxu0  ;;  %1041 = vrot.lane.b32.xlu0 %v3927_v35, %s4638_s22  ;;  %1043 = vrot.lane.b32.xlu1 %v3928_v36, %s4638_s22  ;;  %v3938_v50 = vpack.c.bf16 %v4314_v1, %v4314_v1  ;;  %v3954_v49 = vpack.c.bf16 %v5131_v2, %v5131_v2  ;;  %v3689_v35 = vld [vmem:[%s5847_s1 + $0x70] sm:$0xff]  ;;  %v4567_v36 = vld [vmem:[%s5847_s1 + $0x60] ss:$8 sps:$4 sm:$0xff]  }
 0x2ef   : > { %v3936_v55 = vpack.c.bf16 %v5133_v5, %v5133_v5  ;;  %v3695_v41 = vcombine.high %v3689_v35, %v3689_v35  ;;  %v3694_v56 = vcombine.low %v3689_v35, %v3689_v35 }
 0x2f2   : > { %1073 = vrot.lane.b32.xlu0 %v3943_v3, %s4638_s22  ;;  %1075 = vrot.lane.b32.xlu1 %v3944_v6, %s4638_s22 }
 0x2f3   : > { %v4124_v7 = vpop.f32.mrb[28].mxu0 }
 0x2f4   : > { %v4125_v12 = vpop.f32.mrb[29].mxu0 }
 0x2f5   : > { %v4126_v13 = vadd.f32 %v4125_v12, %v4124_v7  ;;  %v4127_v16 = vpop.f32.mrb[30].mxu0 }
 0x2f6   : > { %v4128_v18 = vpop.f32.mrb[31].mxu0  ;;  %1053 = vrot.lane.b32.xlu0 %v3933_v10, %s4638_s22  ;;  %1055 = vrot.lane.b32.xlu1 %v3934_v11, %s4638_s22 }
 0x2f7   : > { %v4129_v22 = vadd.f32 %v4128_v18, %v4127_v16 }
 0x2f9   : > { %v1251_v23 = vpack.c.bf16 %v4129_v22, %v4126_v13 }
 0x2fa   : > { %1085 = vrot.lane.b32.xlu0 %v3949_v17, %s4638_s22  ;;  %1087 = vrot.lane.b32.xlu1 %v3950_v19, %s4638_s22 }
 0x2fb   : > { %4334 = vmatmul.mubr.msk.bf16.vlgmr.msra.gmra.mrb[40].mxu0 %vm513_vm1, %v1251_v23  ;;  %v4130_v24 = vpop.f32.mrb[32].mxu0 }
 0x2fc   : > { %4166 = vmatpush3.bf16.msra.mxu0 %v4722_v8  ;;  %v4131_v27 = vpop.f32.mrb[33].mxu0  ;;  %4337 = vmatprep.mubr.msk.bf16.mxu0 %vm4637_vm0, %v5865_v59 }
 0x2fd   : > { %v4132_v29 = vadd.f32 %v4131_v27, %v4130_v24  ;;  %v4133_v32 = vpop.f32.mrb[34].mxu0  ;;  %4167 = vmatprep.subr.bf16.mxu0 %v4726_v9 }
 0x2fe   : > { %1049 = vrot.lane.b32.xlu0 %v3931_v25, %s4638_s22  ;;  %1051 = vrot.lane.b32.xlu1 %v3932_v26, %s4638_s22  ;;  %v4134_v39 = vpop.f32.mrb[35].mxu0 }
 0x2ff   : > { %v4135_v44 = vadd.f32 %v4134_v39, %v4133_v32 }
 0x300   : > { %4168 = vmatpush3.bf16.msra.mxu0 %v4744_v14 }
 0x301   : > { %v1252_v45 = vpack.c.bf16 %v4135_v44, %v4132_v29  ;;  %4169 = vmatprep.subr.bf16.mxu0 %v4749_v15 }
 0x302   : > { %1081 = vrot.lane.b32.xlu0 %v3947_v33, %s4638_s22  ;;  %1083 = vrot.lane.b32.xlu1 %v3948_v38, %s4638_s22  ;;  %v4570_v33 = vld [vmem:[%s5848_s2 + $0x10] sm:$0xff]  }
 0x303   : > { %4338 = vmatmul.mubr.msk.bf16.gmra.mrb[44].mxu0 %vm513_vm1, %v1252_v45  ;;  %v4136_v30 = vpop.f32.mrb[36].mxu0 }
 0x304   : > { %4170 = vmatpush3.bf16.msra.mxu0 %v4766_v20  ;;  %v4137_v60 = vpop.f32.mrb[37].mxu0  ;;  %4341 = vmatprep.mubr.msk.bf16.mxu0 %vm4637_vm0, %v5865_v59 }
 0x305   : > { %4171 = vmatprep.subr.bf16.mxu0 %v4771_v21  ;;  %v4138_v61 = vadd.f32 %v4137_v60, %v4136_v30  ;;  %v4139_v62 = vpop.f32.mrb[38].mxu0  ;;  %v3586_v60 = vld [vmem:[%s5849_s3 + $0x1] ss:$0 sm:$0xff] }
 0x306   : > { %1061 = vrot.lane.b32.xlu0 %v3937_v0, %s4638_s22  ;;  %1063 = vrot.lane.b32.xlu1 %v3938_v50, %s4638_s22  ;;  %v4140_v52 = vpop.f32.mrb[39].mxu0  ;;  %v3588_v62 = vld [vmem:[%s5850_s4 + $0x1] ss:$0 sm:$0xff] }
 0x307   : > { %v1253_v51 = vpack.c.bf16 %v4138_v61, %v4138_v61 }
 0x308   : > { %4172 = vmatpush3.bf16.msra.mxu0 %v4794_v28 }
 0x309   : > { %4173 = vmatprep.subr.bf16.mxu0 %v4805_v31 }
 0x30a   : > { %1093 = vrot.lane.b32.xlu0 %v3953_v63, %s4638_s22  ;;  %1095 = vrot.lane.b32.xlu1 %v3954_v49, %s4638_s22 }
 0x30b   : > { %4342 = vmatmul.mubr.msk.bf16.gmra.mrb[48].mxu0 %vm513_vm1, %v1253_v51 }
 0x30c   : > { %4174 = vmatpush3.bf16.msra.mxu0 %v4816_v34  ;;  %1977 = vmatprep.mubr.bf16.mxu0 %v4564_v53 }
 0x30d   : > { %4175 = vmatprep.subr.bf16.mxu0 %v4827_v37 }
 0x30e   : > { %1057 = vrot.lane.b32.xlu0 %v3935_v57, %s4638_s22  ;;  %1059 = vrot.lane.b32.xlu1 %v3936_v55, %s4638_s22 }
 0x310   : > { %4176 = vmatpush3.bf16.msra.mxu0 %v4838_v40 }
 0x311   : > { %4177 = vmatprep.subr.bf16.mxu0 %v4849_v43 }
 0x312   : > { %1089 = vrot.lane.b32.xlu0 %v3951_v54, %s4638_s22 }
 0x314   : > { %4178 = vmatpush3.bf16.msra.mxu0 %v4860_v46 }
 0x315   : > { %4179 = vmatprep.subr.bf16.mxu0 %v4865_v47 }
 0x318   : > { %4180 = vmatpush3.bf16.msra.mxu0 %v4870_v48 }
 0x319   : > { %4383 = vmatprep.subr.bf16.mxu0 %v5865_v59 }
 0x31b   : > { %1978 = vmatmul.mubr.bf16.vlgmr.msra.gmra.mrb[52].mxu0 %v4562_v58 }
 0x31c   : > { %1985 = vmatprep.mubr.bf16.mxu0 %v4565_v42  ;;  %4384 = vmatpush3.bf16.msra.mxu0 %v4570_v33 }
 0x31d   : > { %4222 = vmatprep.subr.bf16.mxu0 %v4709_v4 }
 0x323   : > { %1986 = vmatmul.mubr.bf16.gmra.mrb[56].mxu0 %v4567_v36 }
 0x324   : > { %1993 = vmatprep.mubr.bf16.mxu0 %v3695_v41 }
 0x32b   : > { %1994 = vmatmul.mubr.bf16.gmra.mrb[60].mxu0 %v3694_v56 }
 0x32c   : > { %4385 = vmatprep.mubr.msk.bf16.mxu0 %vm4637_vm0, %v5865_v59 }
 0x348   : > { %v1038_v1 = vpop.permute.xlu1 %1037  ;;  %v1070_v2 = vpop.permute.xlu0 %1069 }
 0x349   : > { %1132 = vst.msk [vmem:[%s5015_s26 + $0x8] sm:$0xf] %vm1129_vm5, %v1038_v1  ;;  %1148 = vst.msk [vmem:[%s5015_s26 + $0x48] sm:$0xf] %vm1129_vm5, %v1070_v2 }
 0x34c   : > { %v1040_v3 = vpop.permute.xlu1 %1039  ;;  %v1034_v5 = vpop.permute.xlu0 %1033 }
 0x34d   : > { %1133 = vst.msk [vmem:[%s5015_s26 + $0xc] sm:$0xf] %vm1129_vm5, %v1040_v3  ;;  %1130 = vst.msk [vmem:[%s5015_s26] sm:$0xf] %vm1129_vm5, %v1034_v5 }
 0x350   : > { %v1066_v6 = vpop.permute.xlu0 %1065  ;;  %v1072_v7 = vpop.permute.xlu1 %1071 }
 0x351   : > { %1146 = vst.msk [vmem:[%s5015_s26 + $0x40] sm:$0xf] %vm1129_vm5, %v1066_v6  ;;  %1149 = vst.msk [vmem:[%s5015_s26 + $0x4c] sm:$0xf] %vm1129_vm5, %v1072_v7 }
 0x354   : > { %v1036_v10 = vpop.permute.xlu0 %1035  ;;  %v1068_v11 = vpop.permute.xlu1 %1067 }
 0x355   : > { %1131 = vst.msk [vmem:[%s5015_s26 + $0x4] sm:$0xf] %vm1129_vm5, %v1036_v10  ;;  %1147 = vst.msk [vmem:[%s5015_s26 + $0x44] sm:$0xf] %vm1129_vm5, %v1068_v11 }
 0x358   : > { %v1046_v12 = vpop.permute.xlu0 %1045  ;;  %v1048_v13 = vpop.permute.xlu1 %1047 }
 0x359   : > { %1136 = vst.msk [vmem:[%s5015_s26 + $0x18] sm:$0xf] %vm1129_vm5, %v1046_v12  ;;  %1137 = vst.msk [vmem:[%s5015_s26 + $0x1c] sm:$0xf] %vm1129_vm5, %v1048_v13 }
 0x35c   : > { %v1078_v16 = vpop.permute.xlu0 %1077  ;;  %v1080_v17 = vpop.permute.xlu1 %1079 }
 0x35d   : > { %1152 = vst.msk [vmem:[%s5015_s26 + $0x58] sm:$0xf] %vm1129_vm5, %v1078_v16  ;;  %1153 = vst.msk [vmem:[%s5015_s26 + $0x5c] sm:$0xf] %vm1129_vm5, %v1080_v17 }
 0x360   : > { %v1042_v18 = vpop.permute.xlu0 %1041  ;;  %v1044_v19 = vpop.permute.xlu1 %1043 }
 0x361   : > { %1134 = vst.msk [vmem:[%s5015_s26 + $0x10] sm:$0xf] %vm1129_vm5, %v1042_v18  ;;  %1135 = vst.msk [vmem:[%s5015_s26 + $0x14] sm:$0xf] %vm1129_vm5, %v1044_v19 }
 0x364   : > { %v1074_v22 = vpop.permute.xlu0 %1073  ;;  %v1076_v23 = vpop.permute.xlu1 %1075 }
 0x365   : > { %1150 = vst.msk [vmem:[%s5015_s26 + $0x50] sm:$0xf] %vm1129_vm5, %v1074_v22  ;;  %1151 = vst.msk [vmem:[%s5015_s26 + $0x54] sm:$0xf] %vm1129_vm5, %v1076_v23 }
 0x368   : > { %v1054_v24 = vpop.permute.xlu0 %1053  ;;  %v1056_v25 = vpop.permute.xlu1 %1055 }
 0x369   : > { %1140 = vst.msk [vmem:[%s5015_s26 + $0x28] sm:$0xf] %vm1129_vm5, %v1054_v24  ;;  %1141 = vst.msk [vmem:[%s5015_s26 + $0x2c] sm:$0xf] %vm1129_vm5, %v1056_v25 }
 0x36c   : > { %v1086_v26 = vpop.permute.xlu0 %1085  ;;  %v1088_v27 = vpop.permute.xlu1 %1087 }
 0x36d   : > { %1156 = vst.msk [vmem:[%s5015_s26 + $0x68] sm:$0xf] %vm1129_vm5, %v1086_v26  ;;  %1157 = vst.msk [vmem:[%s5015_s26 + $0x6c] sm:$0xf] %vm1129_vm5, %v1088_v27 }
 0x370   : > { %v1050_v29 = vpop.permute.xlu0 %1049  ;;  %v1052_v32 = vpop.permute.xlu1 %1051 }
 0x371   : > { %1138 = vst.msk [vmem:[%s5015_s26 + $0x20] sm:$0xf] %vm1129_vm5, %v1050_v29  ;;  %1139 = vst.msk [vmem:[%s5015_s26 + $0x24] sm:$0xf] %vm1129_vm5, %v1052_v32 }
 0x374   : > { %v1082_v38 = vpop.permute.xlu0 %1081  ;;  %v1084_v39 = vpop.permute.xlu1 %1083 }
 0x375   : > { %1154 = vst.msk [vmem:[%s5015_s26 + $0x60] sm:$0xf] %vm1129_vm5, %v1082_v38  ;;  %1155 = vst.msk [vmem:[%s5015_s26 + $0x64] sm:$0xf] %vm1129_vm5, %v1084_v39 }
 0x378   : > { %v1062_v44 = vpop.permute.xlu0 %1061  ;;  %v1064_v45 = vpop.permute.xlu1 %1063 }
 0x379   : > { %1144 = vst.msk [vmem:[%s5015_s26 + $0x38] sm:$0xf] %vm1129_vm5, %v1062_v44  ;;  %1145 = vst.msk [vmem:[%s5015_s26 + $0x3c] sm:$0xf] %vm1129_vm5, %v1064_v45 }
 0x37c   : > { %v1094_v30 = vpop.permute.xlu0 %1093  ;;  %v1096_v0 = vpop.permute.xlu1 %1095 }
 0x37d   : > { %1160 = vst.msk [vmem:[%s5015_s26 + $0x78] sm:$0xf] %vm1129_vm5, %v1094_v30  ;;  %1161 = vst.msk [vmem:[%s5015_s26 + $0x7c] sm:$0xf] %vm1129_vm5, %v1096_v0 }
 0x380   : > { %v1058_v4 = vpop.permute.xlu0 %1057  ;;  %v1060_v50 = vpop.permute.xlu1 %1059 }
 0x381   : > { %1142 = vst.msk [vmem:[%s5015_s26 + $0x30] sm:$0xf] %vm1129_vm5, %v1058_v4  ;;  %1143 = vst.msk [vmem:[%s5015_s26 + $0x34] sm:$0xf] %vm1129_vm5, %v1060_v50 }
 0x3ce   : > { %v1306_v61 = vpop.f32.mrb[40].mxu0 }
 0x3cf   : > { %v1336_v63 = vmul.f32 %v3586_v60, %v1306_v61  ;;  %v4335_v49 = vpop.f32.mrb[41].mxu0 }
 0x3d0   : > { %v1309_v52 = vpop.f32.mrb[42].mxu0  ;;  %v4586_v49 = vld [vmem:[%s5851_s5 + $0xb0] sm:$0xff]  }
 0x3d1   : > { %v1349_v51 = vadd.f32 %v3588_v62, %v1336_v63  ;;  %v1337_v53 = vmul.f32 %v3586_v60, %v1309_v52  ;;  %v4336_v57 = vpop.f32.mrb[43].mxu0  ;;  %v4585_v63 = vld [vmem:[%s5851_s5 + $0xa8] sm:$0xff]   ;;  %v4587_v52 = vld [vmem:[%s5851_s5 + $0xb8] sm:$0xff]  }
 0x3d2   : > { %v4590_v57 = vld [vmem:[%s5851_s5 + $0xd0] sm:$0xff]  }
 0x3d3   : > { %v1350_v55 = vadd.f32 %v3588_v62, %v1337_v53  ;;  %v1354_v54 = vmax.f32 %v1349_v51, 0.0  ;;  %v4588_v51 = vld [vmem:[%s5851_s5 + $0xc0] sm:$0xff]   ;;  %v4589_v53 = vld [vmem:[%s5851_s5 + $0xc8] sm:$0xff]  }
 0x3d5   : > { %v1355_v58 = vmax.f32 %v1350_v55, 0.0  ;;  %v4591_v55 = vld [vmem:[%s5851_s5 + $0xd8] sm:$0xff]  }
 0x3d6   : > { %v1314_v42 = vpop.f32.mrb[44].mxu0 }
 0x3d7   : > { %v1338_v35 = vmul.f32 %v3586_v60, %v1314_v42  ;;  %v4339_v36 = vpop.f32.mrb[45].mxu0  ;;  %v1392_v41 = vpack.c.bf16 %v1355_v58, %v1354_v54  ;;  %v4592_v54 = vld [vmem:[%s5851_s5 + $0xe0] sm:$0xff]   ;;  %v4593_v58 = vld [vmem:[%s5851_s5 + $0xe8] sm:$0xff]   ;;  %v4594_v42 = vld [vmem:[%s5851_s5 + $0xf0] sm:$0xff]  }
 0x3d8   : > { %v1317_v56 = vpop.f32.mrb[46].mxu0  ;;  %v3703_v36 = vld [vmem:[%s5849_s3 + $0x2] ss:$0 sm:$0xff] }
 0x3d9   : > { %v1351_v1 = vadd.f32 %v3588_v62, %v1338_v35  ;;  %v1339_v2 = vmul.f32 %v3586_v60, %v1317_v56  ;;  %4345 = vmatprep.subr.bf16.mxu1 %v1392_v41  ;;  %v4340_v3 = vpop.f32.mrb[47].mxu0  ;;  %v4595_v35 = vld [vmem:[%s5851_s5 + $0xf8] sm:$0xff]   ;;  %v3705_v56 = vld [vmem:[%s5850_s4 + $0x2] ss:$0 sm:$0xff] }
 0x3da   : > { %4346 = vmatpush3.bf16.msra.mxu1 %v1392_v41 }
 0x3db   : > { %v1356_v5 = vmax.f32 %v1351_v1, 0.0  ;;  %v1352_v6 = vadd.f32 %v3588_v62, %v1339_v2 }
 0x3dd   : > { %v1357_v7 = vmax.f32 %v1352_v6, 0.0 }
 0x3de   : > { %v1322_v10 = vpop.f32.mrb[48].mxu0 }
 0x3df   : > { %v1340_v11 = vmul.f32 %v3586_v60, %v1322_v10  ;;  %v4343_v12 = vpop.f32.mrb[49].mxu0  ;;  %v1393_v13 = vpack.c.bf16 %v1357_v7, %v1356_v5 }
 0x3e0   : > { %v1325_v16 = vpop.f32.mrb[50].mxu0 }
 0x3e1   : > { %v1353_v17 = vadd.f32 %v3588_v62, %v1340_v11  ;;  %4347 = vmatprep.subr.bf16.mxu1 %v1393_v13  ;;  %v4344_v18 = vpop.f32.mrb[51].mxu0 }
 0x3e2   : > { %4348 = vmatpush3.bf16.msra.mxu1 %v1393_v13 }
 0x3e3   : > { %v1358_v19 = vmax.f32 %v1353_v17, 0.0 }
 0x3e5   : > { %v1394_v22 = vpack.c.bf16 %v1358_v19, %v1358_v19 }
 0x3e7   : > { %4495 = vmatprep.subr.msk.bf16.mxu1 %vm772_vm3, %v1394_v22  ;;  %v1524_v23 = vsel %vm772_vm3, %v1394_v22, 0 }
 0x3e8   : > { %4350 = vmatpush3.bf16.msra.mxu1 %v1524_v23 }
 0x3ee   : > { %v4181_v24 = vpop.f32.mrb[52].mxu0 }
 0x3ef   : > { %v4182_v25 = vpop.f32.mrb[53].mxu0 }
 0x3f0   : > { %v4183_v26 = vadd.f32 %v4182_v25, %v4181_v24  ;;  %v4184_v27 = vpop.f32.mrb[54].mxu0 }
 0x3f1   : > { %v4185_v29 = vpop.f32.mrb[55].mxu0 }
 0x3f2   : > { %v4186_v32 = vadd.f32 %v4185_v29, %v4184_v27 }
 0x3f4   : > { %v2001_v33 = vpack.c.bf16 %v4186_v32, %v4183_v26 }
 0x3f6   : > { %4386 = vmatmul.mubr.msk.bf16.vlgmr.msra.gmra.mrb[64].mxu0 %vm513_vm1, %v2001_v33  ;;  %v4187_v38 = vpop.f32.mrb[56].mxu0 }
 0x3f7   : > { %4223 = vmatpush3.bf16.msra.mxu0 %v4722_v8  ;;  %v4188_v39 = vpop.f32.mrb[57].mxu0  ;;  %4389 = vmatprep.mubr.msk.bf16.mxu0 %vm4637_vm0, %v5865_v59 }
 0x3f8   : > { %v4189_v44 = vadd.f32 %v4188_v39, %v4187_v38  ;;  %v4190_v45 = vpop.f32.mrb[58].mxu0  ;;  %4224 = vmatprep.subr.bf16.mxu0 %v4726_v9 }
 0x3f9   : > { %v4191_v30 = vpop.f32.mrb[59].mxu0 }
 0x3fa   : > { %v4192_v0 = vadd.f32 %v4191_v30, %v4190_v45 }
 0x3fb   : > { %4225 = vmatpush3.bf16.msra.mxu0 %v4744_v14  ;;  %v4573_v14 = vld [vmem:[%s5847_s1 + $0x7c] ss:$8 sps:$4 sm:$0xff]  }
 0x3fc   : > { %v2002_v4 = vpack.c.bf16 %v4192_v0, %v4189_v44  ;;  %4226 = vmatprep.subr.bf16.mxu0 %v4749_v15  ;;  %v4571_v15 = vld [vmem:[%s5847_s1 + $0x78] ss:$8 sps:$4 sm:$0xff]  }
 0x3fe   : > { %4390 = vmatmul.mubr.msk.bf16.gmra.mrb[68].mxu0 %vm513_vm1, %v2002_v4  ;;  %v4193_v50 = vpop.f32.mrb[60].mxu0 }
 0x3ff   : > { %4227 = vmatpush3.bf16.msra.mxu0 %v4766_v20  ;;  %v4194_v8 = vpop.f32.mrb[61].mxu0  ;;  %4393 = vmatprep.mubr.msk.bf16.mxu0 %vm4637_vm0, %v5865_v59  ;;  %v4574_v20 = vld [vmem:[%s5847_s1 + $0x8c] ss:$8 sps:$4 sm:$0xff]  }
 0x400   : > { %4228 = vmatprep.subr.bf16.mxu0 %v4771_v21  ;;  %v4195_v60 = vadd.f32 %v4194_v8, %v4193_v50  ;;  %v4196_v9 = vpop.f32.mrb[62].mxu0  ;;  %v3806_v21 = vld [vmem:[%s5847_s1 + $0x98] sm:$0xff] }
 0x401   : > { %v4197_v61 = vpop.f32.mrb[63].mxu0 }
 0x402   : > { %v2003_v62 = vpack.c.bf16 %v4195_v60, %v4195_v60 }
 0x403   : > { %4229 = vmatpush3.bf16.msra.mxu0 %v4794_v28  ;;  %v4576_v28 = vld [vmem:[%s5847_s1 + $0x88] ss:$8 sps:$4 sm:$0xff]  }
 0x404   : > { %4230 = vmatprep.subr.bf16.mxu0 %v4805_v31  ;;  %v3812_v31 = vcombine.high %v3806_v21, %v3806_v21 }
 0x406   : > { %4394 = vmatmul.mubr.msk.bf16.gmra.mrb[72].mxu0 %vm513_vm1, %v2003_v62 }
 0x407   : > { %4231 = vmatpush3.bf16.msra.mxu0 %v4816_v34  ;;  %2727 = vmatprep.mubr.bf16.mxu0 %v4573_v14  ;;  %v3811_v34 = vcombine.low %v3806_v21, %v3806_v21 }
 0x408   : > { %4232 = vmatprep.subr.bf16.mxu0 %v4827_v37  ;;  %v4579_v37 = vld [vmem:[%s5851_s5 + $0x80] sm:$0xff]  }
 0x409   : > { %4351 = vmatprep.mubr.msk.bf16.mxu1 %vm723_vm2, %v4579_v37 }
 0x40b   : > { %4233 = vmatpush3.bf16.msra.mxu0 %v4838_v40  ;;  %v4580_v40 = vld [vmem:[%s5851_s5 + $0x88] sm:$0xff]  }
 0x40c   : > { %4234 = vmatprep.subr.bf16.mxu0 %v4849_v43  ;;  %4352 = vmatmul.mubr.msk.bf16.vlgmr.msra.gmra.mrb[28].mxu1 %vm723_vm2, %v4580_v40  ;;  %v4581_v43 = vld [vmem:[%s5848_s2 + $0x18] sm:$0xff]  }
 0x40f   : > { %4235 = vmatpush3.bf16.msra.mxu0 %v4860_v46  ;;  %v4582_v46 = vld [vmem:[%s5851_s5 + $0x90] sm:$0xff]  }
 0x410   : > { %4236 = vmatprep.subr.bf16.mxu0 %v4865_v47  ;;  %v4583_v47 = vld [vmem:[%s5851_s5 + $0x98] sm:$0xff]   ;;  %4355 = vmatprep.mubr.msk.bf16.mxu1 %vm723_vm2, %v4582_v46 }
 0x413   : > { %4237 = vmatpush3.bf16.msra.mxu0 %v4870_v48  ;;  %v4584_v48 = vld [vmem:[%s5851_s5 + $0xa0] sm:$0xff]  }
 0x414   : > { %4435 = vmatprep.subr.bf16.mxu0 %v5865_v59  ;;  %4356 = vmatmul.mubr.msk.bf16.gmra.mrb[32].mxu1 %vm723_vm2, %v4583_v47 }
 0x415   : > { %4359 = vmatprep.mubr.msk.bf16.mxu1 %vm723_vm2, %v4584_v48 }
 0x416   : > { %2728 = vmatmul.mubr.bf16.vlgmr.msra.gmra.mrb[76].mxu0 %v4571_v15 }
 0x417   : > { %2735 = vmatprep.mubr.bf16.mxu0 %v4574_v20  ;;  %4436 = vmatpush3.bf16.msra.mxu0 %v4581_v43 }
 0x41c   : > { %4360 = vmatmul.mubr.msk.bf16.gmra.mrb[36].mxu1 %vm723_vm2, %v4585_v63 }
 0x41d   : > { %4363 = vmatprep.mubr.msk.bf16.mxu1 %vm723_vm2, %v4586_v49  ;;  %v4596_v49 = vld [vmem:[%s5851_s5 + $0x100] sm:$0xff]  }
 0x41e   : > { %2736 = vmatmul.mubr.bf16.gmra.mrb[80].mxu0 %v4576_v28 }
 0x41f   : > { %2743 = vmatprep.mubr.bf16.mxu0 %v3812_v31 }
 0x424   : > { %4364 = vmatmul.mubr.msk.bf16.gmra.mrb[40].mxu1 %vm723_vm2, %v4587_v52  ;;  %v4597_v52 = vld [vmem:[%s5851_s5 + $0x108] sm:$0xff]  }
 0x425   : > { %4367 = vmatprep.mubr.msk.bf16.mxu1 %vm723_vm2, %v4588_v51  ;;  %v4599_v51 = vld [vmem:[%s5851_s5 + $0x118] sm:$0xff]  }
 0x426   : > { %2744 = vmatmul.mubr.bf16.gmra.mrb[84].mxu0 %v3811_v34 }
 0x427   : > { %4437 = vmatprep.mubr.msk.bf16.mxu0 %vm4637_vm0, %v5865_v59 }
 0x42c   : > { %4368 = vmatmul.mubr.msk.bf16.gmra.mrb[44].mxu1 %vm723_vm2, %v4589_v53  ;;  %v4600_v53 = vld [vmem:[%s5851_s5 + $0x120] sm:$0xff]  }
 0x42d   : > { %4371 = vmatprep.mubr.msk.bf16.mxu1 %vm723_vm2, %v4590_v57  ;;  %v4601_v57 = vld [vmem:[%s5851_s5 + $0x128] sm:$0xff]  }
 0x434   : > { %4372 = vmatmul.mubr.msk.bf16.gmra.mrb[48].mxu1 %vm723_vm2, %v4591_v55  ;;  %v4602_v55 = vld [vmem:[%s5851_s5 + $0x130] sm:$0xff]  }
 0x435   : > { %4375 = vmatprep.mubr.msk.bf16.mxu1 %vm723_vm2, %v4592_v54  ;;  %v4603_v54 = vld [vmem:[%s5851_s5 + $0x138] sm:$0xff]  }
 0x43c   : > { %4376 = vmatmul.mubr.msk.bf16.gmra.mrb[52].mxu1 %vm723_vm2, %v4593_v58  ;;  %v4604_v58 = vld [vmem:[%s5851_s5 + $0x140] sm:$0xff]  }
 0x43d   : > { %4379 = vmatprep.mubr.msk.bf16.mxu1 %vm723_vm2, %v4594_v42  ;;  %v4605_v42 = vld [vmem:[%s5851_s5 + $0x148] sm:$0xff]  }
 0x444   : > { %4380 = vmatmul.mubr.msk.bf16.gmra.mrb[56].mxu1 %vm723_vm2, %v4595_v35  ;;  %v4606_v35 = vld [vmem:[%s5851_s5 + $0x150] sm:$0xff]  }
 0x445   : > { %4403 = vmatprep.mubr.msk.bf16.mxu1 %vm723_vm2, %v4596_v49 }
 0x4c9   : > { %v2056_v41 = vpop.f32.mrb[64].mxu0 }
 0x4ca   : > { %v2086_v1 = vmul.f32 %v3703_v36, %v2056_v41  ;;  %v4387_v2 = vpop.f32.mrb[65].mxu0  ;;  %v4608_v41 = vld [vmem:[%s5851_s5 + $0x160] sm:$0xff]  }
 0x4cb   : > { %v2059_v3 = vpop.f32.mrb[66].mxu0  ;;  %v4611_v2 = vld [vmem:[%s5851_s5 + $0x178] sm:$0xff]  }
 0x4cc   : > { %v2099_v5 = vadd.f32 %v3705_v56, %v2086_v1  ;;  %v2087_v6 = vmul.f32 %v3703_v36, %v2059_v3  ;;  %v4388_v7 = vpop.f32.mrb[67].mxu0  ;;  %v4610_v1 = vld [vmem:[%s5851_s5 + $0x170] sm:$0xff]   ;;  %v4612_v3 = vld [vmem:[%s5851_s5 + $0x180] sm:$0xff]  }
 0x4ce   : > { %v2100_v10 = vadd.f32 %v3705_v56, %v2087_v6  ;;  %v2104_v11 = vmax.f32 %v2099_v5, 0.0  ;;  %v925_v5 = vpop.f32.mrb[27].mxu1 }
 0x4cf   : > { %v3952_v6 = vpack.c.bf16 %v925_v5, %v925_v5 }
 0x4d0   : > { %v2105_v12 = vmax.f32 %v2100_v10, 0.0 }
 0x4d1   : > { %v2064_v13 = vpop.f32.mrb[68].mxu0  ;;  %1091 = vrot.lane.b32.xlu1 %v3952_v6, %s4638_s22 }
 0x4d2   : > { %v2088_v16 = vmul.f32 %v3703_v36, %v2064_v13  ;;  %v4391_v17 = vpop.f32.mrb[69].mxu0  ;;  %v2142_v18 = vpack.c.bf16 %v2105_v12, %v2104_v11  ;;  %v1090_v12 = vpop.permute.xlu0 %1089 }
 0x4d3   : > { %v2067_v19 = vpop.f32.mrb[70].mxu0  ;;  %1158 = vst.msk [vmem:[%s5015_s26 + $0x70] sm:$0xf] %vm1129_vm5, %v1090_v12 }
 0x4d4   : > { %v2101_v22 = vadd.f32 %v3705_v56, %v2088_v16  ;;  %v2089_v23 = vmul.f32 %v3703_v36, %v2067_v19  ;;  %4397 = vmatprep.subr.bf16.mxu1 %v2142_v18  ;;  %v4392_v24 = vpop.f32.mrb[71].mxu0 }
 0x4d5   : > { %4398 = vmatpush3.bf16.msra.mxu1 %v2142_v18 }
 0x4d6   : > { %v2106_v25 = vmax.f32 %v2101_v22, 0.0  ;;  %v2102_v26 = vadd.f32 %v3705_v56, %v2089_v23 }
 0x4d8   : > { %v2107_v27 = vmax.f32 %v2102_v26, 0.0 }
 0x4d9   : > { %v2072_v29 = vpop.f32.mrb[72].mxu0 }
 0x4da   : > { %v2090_v32 = vmul.f32 %v3703_v36, %v2072_v29  ;;  %v4395_v33 = vpop.f32.mrb[73].mxu0  ;;  %v2143_v38 = vpack.c.bf16 %v2107_v27, %v2106_v25  ;;  %v4607_v36 = vld [vmem:[%s5851_s5 + $0x158] sm:$0xff]  }
 0x4db   : > { %v2075_v39 = vpop.f32.mrb[74].mxu0 }
 0x4dc   : > { %v2103_v44 = vadd.f32 %v3705_v56, %v2090_v32  ;;  %4399 = vmatprep.subr.bf16.mxu1 %v2143_v38  ;;  %v4396_v45 = vpop.f32.mrb[75].mxu0  ;;  %v4609_v56 = vld [vmem:[%s5851_s5 + $0x168] sm:$0xff]  }
 0x4dd   : > { %4400 = vmatpush3.bf16.msra.mxu1 %v2143_v38 }
 0x4de   : > { %v2108_v30 = vmax.f32 %v2103_v44, 0.0 }
 0x4df   : > { %v4353_v7 = vpop.f32.mrb[28].mxu1 }
 0x4e0   : > { %v2144_v0 = vpack.c.bf16 %v2108_v30, %v2108_v30  ;;  %v3957_v10 = vpack.c.bf16 %v4353_v7, %v4353_v7  ;;  %v1560_v11 = vpop.f32.mrb[29].mxu1 }
 0x4e1   : > { %v4354_v13 = vpop.f32.mrb[30].mxu1  ;;  %v3955_v16 = vpack.c.bf16 %v1560_v11, %v1560_v11 }
 0x4e2   : > { %4496 = vmatprep.subr.msk.bf16.mxu1 %vm772_vm3, %v2144_v0  ;;  %v2274_v4 = vsel %vm772_vm3, %v2144_v0, 0  ;;  %v3958_v17 = vpack.c.bf16 %v4354_v13, %v4354_v13  ;;  %1787 = vrot.lane.b32.xlu0 %v3957_v10, %s4639_s16  ;;  %v1563_v18 = vpop.f32.mrb[31].mxu1 }
 0x4e3   : > { %4402 = vmatpush3.bf16.msra.mxu1 %v2274_v4  ;;  %v3956_v23 = vpack.c.bf16 %v1563_v18, %v1563_v18 }
 0x4e4   : > { %1789 = vrot.lane.b32.xlu1 %v3958_v17, %s4639_s16 }
 0x4e6   : > { %4404 = vmatmul.mubr.msk.bf16.vlgmr.msra.gmra.mrb[60].mxu1 %vm723_vm2, %v4597_v52  ;;  %1783 = vrot.lane.b32.xlu0 %v3955_v16, %s4639_s16 }
 0x4e7   : > { %v4357_v19 = vpop.f32.mrb[32].mxu1 }
 0x4e8   : > { %v1576_v22 = vpop.f32.mrb[33].mxu1  ;;  %v3961_v25 = vpack.c.bf16 %v4357_v19, %v4357_v19  ;;  %1785 = vrot.lane.b32.xlu1 %v3956_v23, %s4639_s16 }
 0x4e9   : > { %v4238_v50 = vpop.f32.mrb[76].mxu0  ;;  %v4358_v24 = vpop.f32.mrb[34].mxu1  ;;  %v3959_v38 = vpack.c.bf16 %v1576_v22, %v1576_v22 }
 0x4ea   : > { %v4239_v8 = vpop.f32.mrb[77].mxu0  ;;  %v1579_v26 = vpop.f32.mrb[35].mxu1  ;;  %v3962_v32 = vpack.c.bf16 %v4358_v24, %v4358_v24  ;;  %1795 = vrot.lane.b32.xlu0 %v3961_v25, %s4639_s16 }
 0x4eb   : > { %v4240_v60 = vadd.f32 %v4239_v8, %v4238_v50  ;;  %v4241_v9 = vpop.f32.mrb[78].mxu0  ;;  %v3960_v30 = vpack.c.bf16 %v1579_v26, %v1579_v26 }
 0x4ec   : > { %v4242_v61 = vpop.f32.mrb[79].mxu0  ;;  %1797 = vrot.lane.b32.xlu1 %v3962_v32, %s4639_s16 }
 0x4ed   : > { %v4243_v62 = vadd.f32 %v4242_v61, %v4241_v9 }
 0x4ee   : > { %1791 = vrot.lane.b32.xlu0 %v3959_v38, %s4639_s16 }
 0x4ef   : > { %v2751_v14 = vpack.c.bf16 %v4243_v62, %v4240_v60  ;;  %v4361_v27 = vpop.f32.mrb[36].mxu1 }
 0x4f0   : > { %v1592_v29 = vpop.f32.mrb[37].mxu1  ;;  %v3965_v4 = vpack.c.bf16 %v4361_v27, %v4361_v27  ;;  %1793 = vrot.lane.b32.xlu1 %v3960_v30, %s4639_s16 }
 0x4f1   : > { %4438 = vmatmul.mubr.msk.bf16.vlgmr.msra.gmra.mrb[88].mxu0 %vm513_vm1, %v2751_v14  ;;  %v4244_v15 = vpop.f32.mrb[80].mxu0  ;;  %v4362_v33 = vpop.f32.mrb[38].mxu1  ;;  %v3963_v62 = vpack.c.bf16 %v1592_v29, %v1592_v29 }
 0x4f2   : > { %v4245_v20 = vpop.f32.mrb[81].mxu0  ;;  %4441 = vmatprep.mubr.msk.bf16.mxu0 %vm4637_vm0, %v5865_v59  ;;  %v1595_v39 = vpop.f32.mrb[39].mxu1  ;;  %v3966_v9 = vpack.c.bf16 %v4362_v33, %v4362_v33  ;;  %1803 = vrot.lane.b32.xlu0 %v3965_v4, %s4639_s16 }
 0x4f3   : > { %v4246_v21 = vadd.f32 %v4245_v20, %v4244_v15  ;;  %v4247_v28 = vpop.f32.mrb[82].mxu0 }
 0x4f4   : > { %v4248_v31 = vpop.f32.mrb[83].mxu0  ;;  %1805 = vrot.lane.b32.xlu1 %v3966_v9, %s4639_s16 }
 0x4f5   : > { %v4249_v34 = vadd.f32 %v4248_v31, %v4247_v28 }
 0x4f6   : > { %1799 = vrot.lane.b32.xlu0 %v3963_v62, %s4639_s16 }
 0x4f7   : > { %v2752_v37 = vpack.c.bf16 %v4249_v34, %v4246_v21  ;;  %v4365_v44 = vpop.f32.mrb[40].mxu1  ;;  %v3964_v21 = vpack.c.bf16 %v1595_v39, %v1595_v39 }
 0x4f8   : > { %v1608_v45 = vpop.f32.mrb[41].mxu1  ;;  %v3969_v31 = vpack.c.bf16 %v4365_v44, %v4365_v44 }
 0x4f9   : > { %4442 = vmatmul.mubr.msk.bf16.gmra.mrb[92].mxu0 %vm513_vm1, %v2752_v37  ;;  %v4250_v40 = vpop.f32.mrb[84].mxu0  ;;  %v4366_v0 = vpop.f32.mrb[42].mxu1  ;;  %1801 = vrot.lane.b32.xlu1 %v3964_v21, %s4639_s16  ;;  %v4613_v21 = vld [vmem:[%s5851_s5 + $0x188] sm:$0xff]  }
 0x4fa   : > { %v4251_v43 = vpop.f32.mrb[85].mxu0  ;;  %4445 = vmatprep.mubr.msk.bf16.mxu0 %vm4637_vm0, %v5865_v59  ;;  %v4598_v59 = vld [vmem:[%s5851_s5 + $0x110] sm:$0xff]   ;;  %v1611_v50 = vpop.f32.mrb[43].mxu1  ;;  %1811 = vrot.lane.b32.xlu0 %v3969_v31, %s4639_s16  ;;  %v4615_v31 = vld [vmem:[%s5851_s5 + $0x198] sm:$0xff]  }
 0x4fb   : > { %v4252_v46 = vadd.f32 %v4251_v43, %v4250_v40  ;;  %v4253_v47 = vpop.f32.mrb[86].mxu0  ;;  %4407 = vmatprep.mubr.msk.bf16.mxu1 %vm723_vm2, %v4598_v59  ;;  %v3970_v43 = vpack.c.bf16 %v4366_v0, %v4366_v0  ;;  %v3968_v52 = vpack.c.bf16 %v1611_v50, %v1611_v50 }
 0x4fc   : > { %v4254_v48 = vpop.f32.mrb[87].mxu0  ;;  %4408 = vmatmul.mubr.msk.bf16.gmra.mrb[64].mxu1 %vm723_vm2, %v4599_v51  ;;  %v3967_v47 = vpack.c.bf16 %v1608_v45, %v1608_v45 }
 0x4fd   : > { %v2753_v63 = vpack.c.bf16 %v4252_v46, %v4252_v46  ;;  %4411 = vmatprep.mubr.msk.bf16.mxu1 %vm723_vm2, %v4600_v53  ;;  %1813 = vrot.lane.b32.xlu1 %v3970_v43, %s4639_s16 }
 0x4fe   : > { %1807 = vrot.lane.b32.xlu0 %v3967_v47, %s4639_s16 }
 0x4ff   : > { %v4369_v8 = vpop.f32.mrb[44].mxu1 }
 0x500   : > { %v1624_v60 = vpop.f32.mrb[45].mxu1  ;;  %v3973_v51 = vpack.c.bf16 %v4369_v8, %v4369_v8 }
 0x501   : > { %4446 = vmatmul.mubr.msk.bf16.gmra.mrb[96].mxu0 %vm513_vm1, %v2753_v63  ;;  %v4370_v61 = vpop.f32.mrb[46].mxu1  ;;  %1809 = vrot.lane.b32.xlu1 %v3968_v52, %s4639_s16 }
 0x502   : > { %v1627_v14 = vpop.f32.mrb[47].mxu1  ;;  %1819 = vrot.lane.b32.xlu0 %v3973_v51, %s4639_s16  ;;  %v4619_v51 = vld [vmem:[%s5851_s5 + $0x1b8] sm:$0xff]  }
 0x504   : > { %4412 = vmatmul.mubr.msk.bf16.gmra.mrb[68].mxu1 %vm723_vm2, %v4601_v57  ;;  %v3974_v57 = vpack.c.bf16 %v4370_v61, %v4370_v61 }
 0x505   : > { %4415 = vmatprep.mubr.msk.bf16.mxu1 %vm723_vm2, %v4602_v55  ;;  %v3971_v55 = vpack.c.bf16 %v1624_v60, %v1624_v60 }
 0x506   : > { %1821 = vrot.lane.b32.xlu1 %v3974_v57, %s4639_s16 }
 0x507   : > { %v4373_v15 = vpop.f32.mrb[48].mxu1  ;;  %1815 = vrot.lane.b32.xlu0 %v3971_v55, %s4639_s16 }
 0x508   : > { %v1640_v20 = vpop.f32.mrb[49].mxu1 }
 0x509   : > { %v4374_v28 = vpop.f32.mrb[50].mxu1 }
 0x50a   : > { %v1643_v34 = vpop.f32.mrb[51].mxu1 }
 0x50b   : > { %v3976_v10 = vpack.c.bf16 %v1643_v34, %v1643_v34  ;;  %v4616_v34 = vld [vmem:[%s5851_s5 + $0x1a0] sm:$0xff]  }
 0x50c   : > { %4416 = vmatmul.mubr.msk.bf16.gmra.mrb[72].mxu1 %vm723_vm2, %v4603_v54  ;;  %v3972_v54 = vpack.c.bf16 %v1627_v14, %v1627_v14 }
 0x50d   : > { %4419 = vmatprep.mubr.msk.bf16.mxu1 %vm723_vm2, %v4604_v58  ;;  %v3977_v58 = vpack.c.bf16 %v4373_v15, %v4373_v15 }
 0x50e   : > { %1817 = vrot.lane.b32.xlu1 %v3972_v54, %s4639_s16 }
 0x50f   : > { %v4377_v37 = vpop.f32.mrb[52].mxu1  ;;  %1827 = vrot.lane.b32.xlu0 %v3977_v58, %s4639_s16 }
 0x510   : > { %v1656_v40 = vpop.f32.mrb[53].mxu1  ;;  %v3981_v12 = vpack.c.bf16 %v4377_v37, %v4377_v37  ;;  %v4617_v37 = vld [vmem:[%s5851_s5 + $0x1a8] sm:$0xff]  }
 0x511   : > { %v4378_v46 = vpop.f32.mrb[54].mxu1  ;;  %v3979_v24 = vpack.c.bf16 %v1656_v40, %v1656_v40  ;;  %v4618_v40 = vld [vmem:[%s5851_s5 + $0x1b0] sm:$0xff]  }
 0x512   : > { %v1659_v48 = vpop.f32.mrb[55].mxu1  ;;  %v3982_v18 = vpack.c.bf16 %v4378_v46, %v4378_v46 }
 0x513   : > { %v3980_v32 = vpack.c.bf16 %v1659_v48, %v1659_v48 }
 0x514   : > { %4420 = vmatmul.mubr.msk.bf16.gmra.mrb[76].mxu1 %vm723_vm2, %v4605_v42  ;;  %v3820_v42 = vld [vmem:[%s5849_s3 + $0x3] ss:$0 sm:$0xff] }
 0x515   : > { %4423 = vmatprep.mubr.msk.bf16.mxu1 %vm723_vm2, %v4606_v35 }
 0x517   : > { %v5482_v63 = vpop.f32.mrb[56].mxu1 }
 0x518   : > { %v5484_v49 = vpop.f32.mrb[57].mxu1  ;;  %v3985_v38 = vpack.c.bf16 %v5482_v63, %v5482_v63 }
 0x519   : > { %v5487_v59 = vpop.f32.mrb[58].mxu1  ;;  %v3983_v8 = vpack.c.bf16 %v5484_v49, %v5484_v49 }
 0x51a   : > { %v5490_v53 = vpop.f32.mrb[59].mxu1  ;;  %v3986_v30 = vpack.c.bf16 %v5487_v59, %v5487_v59 }
 0x51b   : > { %v3984_v62 = vpack.c.bf16 %v5490_v53, %v5490_v53  ;;  %v4620_v53 = vld [vmem:[%s5851_s5 + $0x1c0] sm:$0xff]  }
 0x51c   : > { %4424 = vmatmul.mubr.msk.bf16.gmra.mrb[80].mxu1 %vm723_vm2, %v4607_v36  ;;  %v3822_v36 = vld [vmem:[%s5850_s4 + $0x3] ss:$0 sm:$0xff] }
 0x51d   : > { %4427 = vmatprep.mubr.msk.bf16.mxu1 %vm723_vm2, %v4608_v41  ;;  %v3978_v41 = vpack.c.bf16 %v4374_v28, %v4374_v28  ;;  %v4614_v28 = vld [vmem:[%s5851_s5 + $0x190] sm:$0xff]  }
 0x51f   : > { %1829 = vrot.lane.b32.xlu1 %v3978_v41, %s4639_s16 }
 0x523   : > { %1825 = vrot.lane.b32.xlu1 %v3976_v10, %s4639_s16 }
 0x524   : > { %4428 = vmatmul.mubr.msk.bf16.gmra.mrb[84].mxu1 %vm723_vm2, %v4609_v56 }
 0x525   : > { %4431 = vmatprep.mubr.msk.bf16.mxu1 %vm723_vm2, %v4610_v1 }
 0x527   : > { %1837 = vrot.lane.b32.xlu1 %v3982_v18, %s4639_s16 }
 0x52b   : > { %1833 = vrot.lane.b32.xlu1 %v3980_v32, %s4639_s16 }
 0x52c   : > { %4432 = vmatmul.mubr.msk.bf16.gmra.mrb[88].mxu1 %vm723_vm2, %v4611_v2  ;;  %v3975_v2 = vpack.c.bf16 %v1640_v20, %v1640_v20 }
 0x52d   : > { %4455 = vmatprep.mubr.msk.bf16.mxu1 %vm723_vm2, %v4612_v3 }
 0x52e   : > { %1823 = vrot.lane.b32.xlu0 %v3975_v2, %s4639_s16 }
 0x52f   : > { %1845 = vrot.lane.b32.xlu1 %v3986_v30, %s4639_s16 }
 0x532   : > { %1835 = vrot.lane.b32.xlu0 %v3981_v12, %s4639_s16 }
 0x533   : > { %1841 = vrot.lane.b32.xlu1 %v3984_v62, %s4639_s16 }
 0x536   : > { %1831 = vrot.lane.b32.xlu0 %v3979_v24, %s4639_s16 }
 0x53a   : > { %1843 = vrot.lane.b32.xlu0 %v3985_v38, %s4639_s16 }
 0x53e   : > { %1839 = vrot.lane.b32.xlu0 %v3983_v8, %s4639_s16 }
 0x5b9   : > { %v4405_v43 = vpop.f32.mrb[60].mxu1 }
 0x5ba   : > { %v3989_v46 = vpack.c.bf16 %v4405_v43, %v4405_v43  ;;  %v2310_v47 = vpop.f32.mrb[61].mxu1 }
 0x5bb   : > { %v4406_v48 = vpop.f32.mrb[62].mxu1  ;;  %v3987_v63 = vpack.c.bf16 %v2310_v47, %v2310_v47 }
 0x5bc   : > { %v3990_v49 = vpack.c.bf16 %v4406_v48, %v4406_v48  ;;  %2537 = vrot.lane.b32.xlu0 %v3989_v46, %s4640_s11  ;;  %v2313_v52 = vpop.f32.mrb[63].mxu1 }
 0x5bd   : > { %v3988_v59 = vpack.c.bf16 %v2313_v52, %v2313_v52 }
 0x5be   : > { %2539 = vrot.lane.b32.xlu1 %v3990_v49, %s4640_s11 }
 0x5c0   : > { %2533 = vrot.lane.b32.xlu0 %v3987_v63, %s4640_s11 }
 0x5c2   : > { %2535 = vrot.lane.b32.xlu1 %v3988_v59, %s4640_s11 }
 0x5c4   : > { %v2806_v35 = vpop.f32.mrb[88].mxu0 }
 0x5c5   : > { %v2836_v56 = vmul.f32 %v3820_v42, %v2806_v35  ;;  %v4439_v1 = vpop.f32.mrb[89].mxu0 }
 0x5c6   : > { %v2809_v3 = vpop.f32.mrb[90].mxu0  ;;  %v4622_v1 = vld [vmem:[%s5851_s5 + $0x1d0] sm:$0xff]  }
 0x5c7   : > { %v2849_v5 = vadd.f32 %v3822_v36, %v2836_v56  ;;  %v2837_v6 = vmul.f32 %v3820_v42, %v2809_v3  ;;  %v4440_v7 = vpop.f32.mrb[91].mxu0  ;;  %v4621_v56 = vld [vmem:[%s5851_s5 + $0x1c8] sm:$0xff]  }
 0x5c9   : > { %v2850_v11 = vadd.f32 %v3822_v36, %v2837_v6  ;;  %v2854_v13 = vmax.f32 %v2849_v5, 0.0 }
 0x5cb   : > { %v2855_v16 = vmax.f32 %v2850_v11, 0.0 }
 0x5cc   : > { %v2814_v17 = vpop.f32.mrb[92].mxu0 }
 0x5cd   : > { %v2892_v19 = vpack.c.bf16 %v2855_v16, %v2854_v13  ;;  %v2838_v22 = vmul.f32 %v3820_v42, %v2814_v17  ;;  %v4443_v23 = vpop.f32.mrb[93].mxu0  ;;  %v4623_v13 = vld [vmem:[%s5851_s5 + $0x1d8] sm:$0xff]   ;;  %v4624_v16 = vld [vmem:[%s5851_s5 + $0x1e0] sm:$0xff]  }
 0x5ce   : > { %v2817_v25 = vpop.f32.mrb[94].mxu0 }
 0x5cf   : > { %4449 = vmatprep.subr.bf16.mxu1 %v2892_v19  ;;  %v2851_v26 = vadd.f32 %v3822_v36, %v2838_v22  ;;  %v2839_v27 = vmul.f32 %v3820_v42, %v2817_v25  ;;  %v4444_v29 = vpop.f32.mrb[95].mxu0  ;;  %v4409_v57 = vpop.f32.mrb[64].mxu1 }
 0x5d0   : > { %4450 = vmatpush3.bf16.msra.mxu1 %v2892_v19  ;;  %v3993_v55 = vpack.c.bf16 %v4409_v57, %v4409_v57  ;;  %v2326_v54 = vpop.f32.mrb[65].mxu1  ;;  %v4626_v29 = vld [vmem:[%s5851_s5 + $0x1f0] sm:$0xff]  }
 0x5d1   : > { %v2852_v33 = vadd.f32 %v3822_v36, %v2839_v27  ;;  %v2856_v39 = vmax.f32 %v2851_v26, 0.0  ;;  %v4410_v58 = vpop.f32.mrb[66].mxu1  ;;  %v4625_v27 = vld [vmem:[%s5851_s5 + $0x1e8] sm:$0xff]  }
 0x5d2   : > { %v3994_v35 = vpack.c.bf16 %v4410_v58, %v4410_v58  ;;  %2545 = vrot.lane.b32.xlu0 %v3993_v55, %s4640_s11 }
 0x5d3   : > { %v2857_v44 = vmax.f32 %v2852_v33, 0.0  ;;  %v1092_v33 = vpop.permute.xlu1 %1091 }
 0x5d4   : > { %v2822_v45 = vpop.f32.mrb[96].mxu0  ;;  %2547 = vrot.lane.b32.xlu1 %v3994_v35, %s4640_s11  ;;  %1159 = vst.msk [vmem:[%s5015_s26 + $0x74] sm:$0xf] %vm1129_vm5, %v1092_v33 }
 0x5d5   : > { %v2893_v0 = vpack.c.bf16 %v2857_v44, %v2856_v39  ;;  %v2840_v4 = vmul.f32 %v3820_v42, %v2822_v45  ;;  %v4447_v50 = vpop.f32.mrb[97].mxu0  ;;  %v3991_v42 = vpack.c.bf16 %v2326_v54, %v2326_v54  ;;  %v1788_v44 = vpop.permute.xlu0 %1787 }
 0x5d6   : > { %v2825_v60 = vpop.f32.mrb[98].mxu0  ;;  %1882 = vst.msk [vmem:[%s5015_s26 + $0x8] sm:$0xf] %vm1879_vm6, %v1788_v44 }
 0x5d7   : > { %4451 = vmatprep.subr.bf16.mxu1 %v2893_v0  ;;  %v2853_v9 = vadd.f32 %v3822_v36, %v2840_v4  ;;  %v4448_v61 = vpop.f32.mrb[99].mxu0  ;;  %v2329_v36 = vpop.f32.mrb[67].mxu1  ;;  %2541 = vrot.lane.b32.xlu0 %v3991_v42, %s4640_s11 }
 0x5d8   : > { %4452 = vmatpush3.bf16.msra.mxu1 %v2893_v0  ;;  %v3992_v41 = vpack.c.bf16 %v2329_v36, %v2329_v36  ;;  %v4413_v2 = vpop.f32.mrb[68].mxu1  ;;  %v1790_v50 = vpop.permute.xlu1 %1789 }
 0x5d9   : > { %v2858_v14 = vmax.f32 %v2853_v9, 0.0  ;;  %v3997_v3 = vpack.c.bf16 %v4413_v2, %v4413_v2  ;;  %v2342_v5 = vpop.f32.mrb[69].mxu1  ;;  %1883 = vst.msk [vmem:[%s5015_s26 + $0xc] sm:$0xf] %vm1879_vm6, %v1790_v50  ;;  %v1784_v60 = vpop.permute.xlu0 %1783  ;;  %v4627_v9 = vld [vmem:[%s5851_s5 + $0x1f8] sm:$0xff]  }
 0x5da   : > { %2543 = vrot.lane.b32.xlu1 %v3992_v41, %s4640_s11  ;;  %v4414_v6 = vpop.f32.mrb[70].mxu1  ;;  %v3995_v7 = vpack.c.bf16 %v2342_v5, %v2342_v5  ;;  %1880 = vst.msk [vmem:[%s5015_s26] sm:$0xf] %vm1879_vm6, %v1784_v60 }
 0x5db   : > { %v2894_v15 = vpack.c.bf16 %v2858_v14, %v2858_v14  ;;  %v3998_v10 = vpack.c.bf16 %v4414_v6, %v4414_v6  ;;  %2553 = vrot.lane.b32.xlu0 %v3997_v3, %s4640_s11  ;;  %v2345_v11 = vpop.f32.mrb[71].mxu1 }
 0x5dc   : > { %v3996_v12 = vpack.c.bf16 %v2345_v11, %v2345_v11  ;;  %v1786_v62 = vpop.permute.xlu1 %1785 }
 0x5dd   : > { %4497 = vmatprep.subr.msk.bf16.mxu1 %vm772_vm3, %v2894_v15  ;;  %v3024_v20 = vsel %vm772_vm3, %v2894_v15, 0  ;;  %1881 = vst.msk [vmem:[%s5015_s26 + $0x4] sm:$0xf] %vm1879_vm6, %v1786_v62 }
 0x5de   : > { %4454 = vmatpush3.bf16.msra.mxu1 %v3024_v20  ;;  %2555 = vrot.lane.b32.xlu1 %v3998_v10, %s4640_s11  ;;  %v1796_v20 = vpop.permute.xlu0 %1795 }
 0x5df   : > { %2549 = vrot.lane.b32.xlu0 %v3995_v7, %s4640_s11  ;;  %v4417_v17 = vpop.f32.mrb[72].mxu1  ;;  %1886 = vst.msk [vmem:[%s5015_s26 + $0x18] sm:$0xf] %vm1879_vm6, %v1796_v20 }
 0x5e0   : > { %v4001_v18 = vpack.c.bf16 %v4417_v17, %v4417_v17  ;;  %v2358_v19 = vpop.f32.mrb[73].mxu1 }
 0x5e1   : > { %4456 = vmatmul.mubr.msk.bf16.vlgmr.msra.gmra.mrb[92].mxu1 %vm723_vm2, %v4613_v21  ;;  %v4418_v22 = vpop.f32.mrb[74].mxu1  ;;  %v3999_v23 = vpack.c.bf16 %v2358_v19, %v2358_v19 }
 0x5e2   : > { %4459 = vmatprep.mubr.msk.bf16.mxu1 %vm723_vm2, %v4614_v28  ;;  %2551 = vrot.lane.b32.xlu1 %v3996_v12, %s4640_s11  ;;  %v4002_v24 = vpack.c.bf16 %v4418_v22, %v4418_v22  ;;  %v2361_v25 = vpop.f32.mrb[75].mxu1  ;;  %v1792_v36 = vpop.permute.xlu0 %1791 }
 0x5e3   : > { %2561 = vrot.lane.b32.xlu0 %v4001_v18, %s4640_s11  ;;  %v4000_v26 = vpack.c.bf16 %v2361_v25, %v2361_v25  ;;  %1884 = vst.msk [vmem:[%s5015_s26 + $0x10] sm:$0xf] %vm1879_vm6, %v1792_v36 }
 0x5e6   : > { %2563 = vrot.lane.b32.xlu1 %v4002_v24, %s4640_s11 }
 0x5e7   : > { %2557 = vrot.lane.b32.xlu0 %v3999_v23, %s4640_s11  ;;  %v4421_v32 = vpop.f32.mrb[76].mxu1 }
 0x5e8   : > { %v4005_v38 = vpack.c.bf16 %v4421_v32, %v4421_v32  ;;  %v2374_v39 = vpop.f32.mrb[77].mxu1 }
 0x5e9   : > { %4460 = vmatmul.mubr.msk.bf16.gmra.mrb[96].mxu1 %vm723_vm2, %v4615_v31  ;;  %v4422_v45 = vpop.f32.mrb[78].mxu1  ;;  %v4003_v30 = vpack.c.bf16 %v2374_v39, %v2374_v39 }
 0x5ea   : > { %4463 = vmatprep.mubr.msk.bf16.mxu1 %vm723_vm2, %v4616_v34  ;;  %2559 = vrot.lane.b32.xlu1 %v4000_v26, %s4640_s11  ;;  %v4006_v0 = vpack.c.bf16 %v4422_v45, %v4422_v45  ;;  %v2377_v4 = vpop.f32.mrb[79].mxu1 }
 0x5eb   : > { %2569 = vrot.lane.b32.xlu0 %v4005_v38, %s4640_s11  ;;  %v4004_v8 = vpack.c.bf16 %v2377_v4, %v2377_v4 }
 0x5ee   : > { %2571 = vrot.lane.b32.xlu1 %v4006_v0, %s4640_s11 }
 0x5ef   : > { %2565 = vrot.lane.b32.xlu0 %v4003_v30, %s4640_s11  ;;  %v4425_v61 = vpop.f32.mrb[80].mxu1 }
 0x5f0   : > { %v4009_v14 = vpack.c.bf16 %v4425_v61, %v4425_v61  ;;  %v2390_v15 = vpop.f32.mrb[81].mxu1 }
 0x5f1   : > { %4464 = vmatmul.mubr.msk.bf16.gmra.mrb[100].mxu1 %vm723_vm2, %v4617_v37  ;;  %v4426_v21 = vpop.f32.mrb[82].mxu1  ;;  %v4007_v28 = vpack.c.bf16 %v2390_v15, %v2390_v15  ;;  %v1798_v37 = vpop.permute.xlu1 %1797 }
 0x5f2   : > { %4467 = vmatprep.mubr.msk.bf16.mxu1 %vm723_vm2, %v4618_v40  ;;  %2567 = vrot.lane.b32.xlu1 %v4004_v8, %s4640_s11  ;;  %v4010_v31 = vpack.c.bf16 %v4426_v21, %v4426_v21  ;;  %v2393_v34 = vpop.f32.mrb[83].mxu1  ;;  %1887 = vst.msk [vmem:[%s5015_s26 + $0x1c] sm:$0xf] %vm1879_vm6, %v1798_v37 }
 0x5f3   : > { %2577 = vrot.lane.b32.xlu0 %v4009_v14, %s4640_s11  ;;  %v4008_v40 = vpack.c.bf16 %v2393_v34, %v2393_v34 }
 0x5f5   : > { %v1794_v41 = vpop.permute.xlu1 %1793 }
 0x5f6   : > { %2579 = vrot.lane.b32.xlu1 %v4010_v31, %s4640_s11  ;;  %1885 = vst.msk [vmem:[%s5015_s26 + $0x14] sm:$0xf] %vm1879_vm6, %v1794_v41 }
 0x5f7   : > { %2573 = vrot.lane.b32.xlu0 %v4007_v28, %s4640_s11  ;;  %v4429_v43 = vpop.f32.mrb[84].mxu1 }
 0x5f8   : > { %v4013_v46 = vpack.c.bf16 %v4429_v43, %v4429_v43  ;;  %v2406_v47 = vpop.f32.mrb[85].mxu1 }
 0x5f9   : > { %4468 = vmatmul.mubr.msk.bf16.gmra.mrb[104].mxu1 %vm723_vm2, %v4619_v51  ;;  %v4430_v48 = vpop.f32.mrb[86].mxu1  ;;  %v4011_v63 = vpack.c.bf16 %v2406_v47, %v2406_v47 }
 0x5fa   : > { %4471 = vmatprep.mubr.msk.bf16.mxu1 %vm723_vm2, %v4620_v53  ;;  %2575 = vrot.lane.b32.xlu1 %v4008_v40, %s4640_s11  ;;  %v4014_v49 = vpack.c.bf16 %v4430_v48, %v4430_v48  ;;  %v2409_v52 = vpop.f32.mrb[87].mxu1 }
 0x5fb   : > { %2585 = vrot.lane.b32.xlu0 %v4013_v46, %s4640_s11  ;;  %v4012_v59 = vpack.c.bf16 %v2409_v52, %v2409_v52 }
 0x5fe   : > { %2587 = vrot.lane.b32.xlu1 %v4014_v49, %s4640_s11 }
 0x5ff   : > { %2581 = vrot.lane.b32.xlu0 %v4011_v63, %s4640_s11  ;;  %v4433_v51 = vpop.f32.mrb[88].mxu1 }
 0x600   : > { %v4017_v53 = vpack.c.bf16 %v4433_v51, %v4433_v51  ;;  %v2422_v57 = vpop.f32.mrb[89].mxu1 }
 0x601   : > { %4472 = vmatmul.mubr.msk.bf16.gmra.mrb[108].mxu1 %vm723_vm2, %v4621_v56  ;;  %v4434_v55 = vpop.f32.mrb[90].mxu1  ;;  %v4015_v54 = vpack.c.bf16 %v2422_v57, %v2422_v57  ;;  %v1804_v56 = vpop.permute.xlu0 %1803 }
 0x602   : > { %4475 = vmatprep.mubr.msk.bf16.mxu1 %vm723_vm2, %v4622_v1  ;;  %2583 = vrot.lane.b32.xlu1 %v4012_v59, %s4640_s11  ;;  %v4018_v58 = vpack.c.bf16 %v4434_v55, %v4434_v55  ;;  %v2425_v42 = vpop.f32.mrb[91].mxu1  ;;  %v1806_v1 = vpop.permute.xlu1 %1805  ;;  %1890 = vst.msk [vmem:[%s5015_s26 + $0x28] sm:$0xf] %vm1879_vm6, %v1804_v56 }
 0x603   : > { %2593 = vrot.lane.b32.xlu0 %v4017_v53, %s4640_s11  ;;  %v4016_v35 = vpack.c.bf16 %v2425_v42, %v2425_v42  ;;  %1891 = vst.msk [vmem:[%s5015_s26 + $0x2c] sm:$0xf] %vm1879_vm6, %v1806_v1 }
 0x605   : > { %v1800_v2 = vpop.permute.xlu0 %1799 }
 0x606   : > { %2595 = vrot.lane.b32.xlu1 %v4018_v58, %s4640_s11  ;;  %v1802_v3 = vpop.permute.xlu1 %1801  ;;  %1888 = vst.msk [vmem:[%s5015_s26 + $0x20] sm:$0xf] %vm1879_vm6, %v1800_v2 }
 0x607   : > { %2589 = vrot.lane.b32.xlu0 %v4015_v54, %s4640_s11  ;;  %1889 = vst.msk [vmem:[%s5015_s26 + $0x24] sm:$0xf] %vm1879_vm6, %v1802_v3 }
 0x609   : > { %4476 = vmatmul.mubr.msk.bf16.gmra.mrb[112].mxu1 %vm723_vm2, %v4623_v13  ;;  %v1812_v5 = vpop.permute.xlu0 %1811 }
 0x60a   : > { %4479 = vmatprep.mubr.msk.bf16.mxu1 %vm723_vm2, %v4624_v16  ;;  %2591 = vrot.lane.b32.xlu1 %v4016_v35, %s4640_s11  ;;  %v1814_v6 = vpop.permute.xlu1 %1813  ;;  %1894 = vst.msk [vmem:[%s5015_s26 + $0x38] sm:$0xf] %vm1879_vm6, %v1812_v5 }
 0x60b   : > { %1895 = vst.msk [vmem:[%s5015_s26 + $0x3c] sm:$0xf] %vm1879_vm6, %v1814_v6 }
 0x60d   : > { %v1808_v7 = vpop.permute.xlu0 %1807 }
 0x60e   : > { %v1810_v10 = vpop.permute.xlu1 %1809  ;;  %1892 = vst.msk [vmem:[%s5015_s26 + $0x30] sm:$0xf] %vm1879_vm6, %v1808_v7 }
 0x60f   : > { %1893 = vst.msk [vmem:[%s5015_s26 + $0x34] sm:$0xf] %vm1879_vm6, %v1810_v10 }
 0x611   : > { %4480 = vmatmul.mubr.msk.bf16.gmra.mrb[116].mxu1 %vm723_vm2, %v4625_v27  ;;  %v1820_v11 = vpop.permute.xlu0 %1819 }
 0x612   : > { %4483 = vmatprep.mubr.msk.bf16.mxu1 %vm723_vm2, %v4626_v29  ;;  %v1822_v12 = vpop.permute.xlu1 %1821  ;;  %1898 = vst.msk [vmem:[%s5015_s26 + $0x48] sm:$0xf] %vm1879_vm6, %v1820_v11 }
 0x613   : > { %1899 = vst.msk [vmem:[%s5015_s26 + $0x4c] sm:$0xf] %vm1879_vm6, %v1822_v12 }
 0x615   : > { %v1816_v13 = vpop.permute.xlu0 %1815 }
 0x616   : > { %v1818_v16 = vpop.permute.xlu1 %1817  ;;  %1896 = vst.msk [vmem:[%s5015_s26 + $0x40] sm:$0xf] %vm1879_vm6, %v1816_v13 }
 0x617   : > { %1897 = vst.msk [vmem:[%s5015_s26 + $0x44] sm:$0xf] %vm1879_vm6, %v1818_v16 }
 0x619   : > { %4484 = vmatmul.mubr.msk.bf16.gmra.mrb[120].mxu1 %vm723_vm2, %v4627_v9  ;;  %v1828_v17 = vpop.permute.xlu0 %1827 }
 0x61a   : > { %v1830_v18 = vpop.permute.xlu1 %1829  ;;  %1902 = vst.msk [vmem:[%s5015_s26 + $0x58] sm:$0xf] %vm1879_vm6, %v1828_v17 }
 0x61b   : > { %1903 = vst.msk [vmem:[%s5015_s26 + $0x5c] sm:$0xf] %vm1879_vm6, %v1830_v18 }
 0x61d   : > { %v1824_v19 = vpop.permute.xlu0 %1823 }
 0x61e   : > { %v1826_v22 = vpop.permute.xlu1 %1825  ;;  %1900 = vst.msk [vmem:[%s5015_s26 + $0x50] sm:$0xf] %vm1879_vm6, %v1824_v19 }
 0x61f   : > { %1901 = vst.msk [vmem:[%s5015_s26 + $0x54] sm:$0xf] %vm1879_vm6, %v1826_v22 }
 0x621   : > { %v1836_v23 = vpop.permute.xlu0 %1835 }
 0x622   : > { %v1838_v24 = vpop.permute.xlu1 %1837  ;;  %1906 = vst.msk [vmem:[%s5015_s26 + $0x68] sm:$0xf] %vm1879_vm6, %v1836_v23 }
 0x623   : > { %1907 = vst.msk [vmem:[%s5015_s26 + $0x6c] sm:$0xf] %vm1879_vm6, %v1838_v24 }
 0x625   : > { %v1832_v25 = vpop.permute.xlu0 %1831 }
 0x626   : > { %v1834_v26 = vpop.permute.xlu1 %1833  ;;  %1904 = vst.msk [vmem:[%s5015_s26 + $0x60] sm:$0xf] %vm1879_vm6, %v1832_v25 }
 0x627   : > { %1905 = vst.msk [vmem:[%s5015_s26 + $0x64] sm:$0xf] %vm1879_vm6, %v1834_v26 }
 0x629   : > { %v1844_v27 = vpop.permute.xlu0 %1843 }
 0x62a   : > { %v1846_v29 = vpop.permute.xlu1 %1845  ;;  %1910 = vst.msk [vmem:[%s5015_s26 + $0x78] sm:$0xf] %vm1879_vm6, %v1844_v27 }
 0x62b   : > { %1911 = vst.msk [vmem:[%s5015_s26 + $0x7c] sm:$0xf] %vm1879_vm6, %v1846_v29 }
 0x62d   : > { %v1840_v32 = vpop.permute.xlu0 %1839 }
 0x62e   : > { %v1842_v33 = vpop.permute.xlu1 %1841  ;;  %1908 = vst.msk [vmem:[%s5015_s26 + $0x70] sm:$0xf] %vm1879_vm6, %v1840_v32 }
 0x62f   : > { %1909 = vst.msk [vmem:[%s5015_s26 + $0x74] sm:$0xf] %vm1879_vm6, %v1842_v33 }
 0x631   : > { %v2538_v38 = vpop.permute.xlu0 %2537 }
 0x632   : > { %v2540_v39 = vpop.permute.xlu1 %2539  ;;  %2632 = vst.msk [vmem:[%s5015_s26 + $0x8] sm:$0xf] %vm2629_vm7, %v2538_v38 }
 0x633   : > { %2633 = vst.msk [vmem:[%s5015_s26 + $0xc] sm:$0xf] %vm2629_vm7, %v2540_v39 }
 0x635   : > { %v2534_v44 = vpop.permute.xlu0 %2533 }
 0x636   : > { %v2536_v45 = vpop.permute.xlu1 %2535  ;;  %2630 = vst.msk [vmem:[%s5015_s26] sm:$0xf] %vm2629_vm7, %v2534_v44 }
 0x637   : > { %2631 = vst.msk [vmem:[%s5015_s26 + $0x4] sm:$0xf] %vm2629_vm7, %v2536_v45 }
 0x644   : > { %v2546_v30 = vpop.permute.xlu0 %2545 }
 0x645   : > { %2636 = vst.msk [vmem:[%s5015_s26 + $0x18] sm:$0xf] %vm2629_vm7, %v2546_v30 }
 0x646   : > { %v2548_v0 = vpop.permute.xlu1 %2547 }
 0x647   : > { %2637 = vst.msk [vmem:[%s5015_s26 + $0x1c] sm:$0xf] %vm2629_vm7, %v2548_v0 }
 0x649   : > { %v2542_v4 = vpop.permute.xlu0 %2541 }
 0x64a   : > { %2634 = vst.msk [vmem:[%s5015_s26 + $0x10] sm:$0xf] %vm2629_vm7, %v2542_v4 }
 0x64c   : > { %v2544_v50 = vpop.permute.xlu1 %2543 }
 0x64d   : > { %2635 = vst.msk [vmem:[%s5015_s26 + $0x14] sm:$0xf] %vm2629_vm7, %v2544_v50  ;;  %v2554_v8 = vpop.permute.xlu0 %2553 }
 0x64e   : > { %2640 = vst.msk [vmem:[%s5015_s26 + $0x28] sm:$0xf] %vm2629_vm7, %v2554_v8 }
 0x650   : > { %v2556_v60 = vpop.permute.xlu1 %2555 }
 0x651   : > { %2641 = vst.msk [vmem:[%s5015_s26 + $0x2c] sm:$0xf] %vm2629_vm7, %v2556_v60  ;;  %v2550_v9 = vpop.permute.xlu0 %2549 }
 0x652   : > { %2638 = vst.msk [vmem:[%s5015_s26 + $0x20] sm:$0xf] %vm2629_vm7, %v2550_v9 }
 0x654   : > { %v2552_v61 = vpop.permute.xlu1 %2551 }
 0x655   : > { %2639 = vst.msk [vmem:[%s5015_s26 + $0x24] sm:$0xf] %vm2629_vm7, %v2552_v61  ;;  %v2562_v62 = vpop.permute.xlu0 %2561 }
 0x656   : > { %2644 = vst.msk [vmem:[%s5015_s26 + $0x38] sm:$0xf] %vm2629_vm7, %v2562_v62 }
 0x658   : > { %v2564_v14 = vpop.permute.xlu1 %2563 }
 0x659   : > { %2645 = vst.msk [vmem:[%s5015_s26 + $0x3c] sm:$0xf] %vm2629_vm7, %v2564_v14  ;;  %v2558_v15 = vpop.permute.xlu0 %2557 }
 0x65a   : > { %2642 = vst.msk [vmem:[%s5015_s26 + $0x30] sm:$0xf] %vm2629_vm7, %v2558_v15 }
 0x65c   : > { %v2560_v20 = vpop.permute.xlu1 %2559 }
 0x65d   : > { %2643 = vst.msk [vmem:[%s5015_s26 + $0x34] sm:$0xf] %vm2629_vm7, %v2560_v20  ;;  %v2570_v21 = vpop.permute.xlu0 %2569 }
 0x65e   : > { %2648 = vst.msk [vmem:[%s5015_s26 + $0x48] sm:$0xf] %vm2629_vm7, %v2570_v21 }
 0x660   : > { %v2572_v28 = vpop.permute.xlu1 %2571 }
 0x661   : > { %2649 = vst.msk [vmem:[%s5015_s26 + $0x4c] sm:$0xf] %vm2629_vm7, %v2572_v28  ;;  %v2566_v31 = vpop.permute.xlu0 %2565 }
 0x662   : > { %2646 = vst.msk [vmem:[%s5015_s26 + $0x40] sm:$0xf] %vm2629_vm7, %v2566_v31 }
 0x664   : > { %v2568_v34 = vpop.permute.xlu1 %2567 }
 0x665   : > { %2647 = vst.msk [vmem:[%s5015_s26 + $0x44] sm:$0xf] %vm2629_vm7, %v2568_v34  ;;  %v2578_v37 = vpop.permute.xlu0 %2577 }
 0x666   : > { %2652 = vst.msk [vmem:[%s5015_s26 + $0x58] sm:$0xf] %vm2629_vm7, %v2578_v37 }
 0x668   : > { %v2580_v40 = vpop.permute.xlu1 %2579 }
 0x669   : > { %2653 = vst.msk [vmem:[%s5015_s26 + $0x5c] sm:$0xf] %vm2629_vm7, %v2580_v40  ;;  %v2574_v43 = vpop.permute.xlu0 %2573 }
 0x66a   : > { %2650 = vst.msk [vmem:[%s5015_s26 + $0x50] sm:$0xf] %vm2629_vm7, %v2574_v43 }
 0x66c   : > { %v2576_v46 = vpop.permute.xlu1 %2575 }
 0x66d   : > { %2651 = vst.msk [vmem:[%s5015_s26 + $0x54] sm:$0xf] %vm2629_vm7, %v2576_v46  ;;  %v2586_v47 = vpop.permute.xlu0 %2585 }
 0x66e   : > { %2656 = vst.msk [vmem:[%s5015_s26 + $0x68] sm:$0xf] %vm2629_vm7, %v2586_v47 }
 0x670   : > { %v2588_v48 = vpop.permute.xlu1 %2587 }
 0x671   : > { %2657 = vst.msk [vmem:[%s5015_s26 + $0x6c] sm:$0xf] %vm2629_vm7, %v2588_v48  ;;  %v2582_v63 = vpop.permute.xlu0 %2581 }
 0x672   : > { %2654 = vst.msk [vmem:[%s5015_s26 + $0x60] sm:$0xf] %vm2629_vm7, %v2582_v63 }
 0x674   : > { %v2584_v49 = vpop.permute.xlu1 %2583 }
 0x675   : > { %2655 = vst.msk [vmem:[%s5015_s26 + $0x64] sm:$0xf] %vm2629_vm7, %v2584_v49  ;;  %v2594_v52 = vpop.permute.xlu0 %2593 }
 0x676   : > { %2660 = vst.msk [vmem:[%s5015_s26 + $0x78] sm:$0xf] %vm2629_vm7, %v2594_v52 }
 0x678   : > { %v2596_v59 = vpop.permute.xlu1 %2595 }
 0x679   : > { %2661 = vst.msk [vmem:[%s5015_s26 + $0x7c] sm:$0xf] %vm2629_vm7, %v2596_v59  ;;  %v2590_v51 = vpop.permute.xlu0 %2589 }
 0x67a   : > { %2658 = vst.msk [vmem:[%s5015_s26 + $0x70] sm:$0xf] %vm2629_vm7, %v2590_v51 }
 0x67c   : > { %v2592_v53 = vpop.permute.xlu1 %2591 }
 0x67d   : > { %2659 = vst.msk [vmem:[%s5015_s26 + $0x74] sm:$0xf] %vm2629_vm7, %v2592_v53 }
 0x6b4   : > { %v4457_v57 = vpop.f32.mrb[92].mxu1 }
 0x6b5   : > { %v4021_v55 = vpack.c.bf16 %v4457_v57, %v4457_v57  ;;  %v3060_v54 = vpop.f32.mrb[93].mxu1 }
 0x6b6   : > { %v4458_v58 = vpop.f32.mrb[94].mxu1  ;;  %v4019_v36 = vpack.c.bf16 %v3060_v54, %v3060_v54 }
 0x6b7   : > { %v4022_v42 = vpack.c.bf16 %v4458_v58, %v4458_v58  ;;  %3287 = vrot.lane.b32.xlu0 %v4021_v55, %s4641_s8  ;;  %v3063_v35 = vpop.f32.mrb[95].mxu1 }
 0x6b8   : > { %v4020_v41 = vpack.c.bf16 %v3063_v35, %v3063_v35 }
 0x6b9   : > { %3289 = vrot.lane.b32.xlu1 %v4022_v42, %s4641_s8 }
 0x6bb   : > { %3283 = vrot.lane.b32.xlu0 %v4019_v36, %s4641_s8 }
 0x6bc   : > { %v4461_v56 = vpop.f32.mrb[96].mxu1 }
 0x6bd   : > { %v4025_v1 = vpack.c.bf16 %v4461_v56, %v4461_v56  ;;  %v3076_v2 = vpop.f32.mrb[97].mxu1  ;;  %3285 = vrot.lane.b32.xlu1 %v4020_v41, %s4641_s8 }
 0x6be   : > { %v4462_v3 = vpop.f32.mrb[98].mxu1  ;;  %v4023_v7 = vpack.c.bf16 %v3076_v2, %v3076_v2 }
 0x6bf   : > { %v4026_v5 = vpack.c.bf16 %v4462_v3, %v4462_v3  ;;  %3295 = vrot.lane.b32.xlu0 %v4025_v1, %s4641_s8  ;;  %v3079_v6 = vpop.f32.mrb[99].mxu1 }
 0x6c0   : > { %v4024_v10 = vpack.c.bf16 %v3079_v6, %v3079_v6 }
 0x6c1   : > { %3297 = vrot.lane.b32.xlu1 %v4026_v5, %s4641_s8 }
 0x6c3   : > { %3291 = vrot.lane.b32.xlu0 %v4023_v7, %s4641_s8 }
 0x6c4   : > { %v4465_v11 = vpop.f32.mrb[100].mxu1 }
 0x6c5   : > { %v4029_v12 = vpack.c.bf16 %v4465_v11, %v4465_v11  ;;  %v3092_v13 = vpop.f32.mrb[101].mxu1  ;;  %3293 = vrot.lane.b32.xlu1 %v4024_v10, %s4641_s8 }
 0x6c6   : > { %v4466_v16 = vpop.f32.mrb[102].mxu1  ;;  %v4027_v19 = vpack.c.bf16 %v3092_v13, %v3092_v13 }
 0x6c7   : > { %v4030_v17 = vpack.c.bf16 %v4466_v16, %v4466_v16  ;;  %3303 = vrot.lane.b32.xlu0 %v4029_v12, %s4641_s8  ;;  %v3095_v18 = vpop.f32.mrb[103].mxu1 }
 0x6c8   : > { %v4028_v22 = vpack.c.bf16 %v3095_v18, %v3095_v18 }
 0x6c9   : > { %3305 = vrot.lane.b32.xlu1 %v4030_v17, %s4641_s8 }
 0x6cb   : > { %3299 = vrot.lane.b32.xlu0 %v4027_v19, %s4641_s8 }
 0x6cc   : > { %v4469_v23 = vpop.f32.mrb[104].mxu1 }
 0x6cd   : > { %v4033_v24 = vpack.c.bf16 %v4469_v23, %v4469_v23  ;;  %v3108_v25 = vpop.f32.mrb[105].mxu1  ;;  %3301 = vrot.lane.b32.xlu1 %v4028_v22, %s4641_s8 }
 0x6ce   : > { %v4470_v26 = vpop.f32.mrb[106].mxu1  ;;  %v4031_v32 = vpack.c.bf16 %v3108_v25, %v3108_v25 }
 0x6cf   : > { %v4034_v27 = vpack.c.bf16 %v4470_v26, %v4470_v26  ;;  %3311 = vrot.lane.b32.xlu0 %v4033_v24, %s4641_s8  ;;  %v3111_v29 = vpop.f32.mrb[107].mxu1 }
 0x6d0   : > { %v4032_v33 = vpack.c.bf16 %v3111_v29, %v3111_v29 }
 0x6d1   : > { %3313 = vrot.lane.b32.xlu1 %v4034_v27, %s4641_s8 }
 0x6d3   : > { %3307 = vrot.lane.b32.xlu0 %v4031_v32, %s4641_s8 }
 0x6d4   : > { %v4473_v38 = vpop.f32.mrb[108].mxu1 }
 0x6d5   : > { %v4037_v39 = vpack.c.bf16 %v4473_v38, %v4473_v38  ;;  %v3124_v44 = vpop.f32.mrb[109].mxu1  ;;  %3309 = vrot.lane.b32.xlu1 %v4032_v33, %s4641_s8 }
 0x6d6   : > { %v4474_v45 = vpop.f32.mrb[110].mxu1  ;;  %v4035_v4 = vpack.c.bf16 %v3124_v44, %v3124_v44 }
 0x6d7   : > { %v4038_v30 = vpack.c.bf16 %v4474_v45, %v4474_v45  ;;  %3319 = vrot.lane.b32.xlu0 %v4037_v39, %s4641_s8  ;;  %v3127_v0 = vpop.f32.mrb[111].mxu1 }
 0x6d8   : > { %v4036_v50 = vpack.c.bf16 %v3127_v0, %v3127_v0 }
 0x6d9   : > { %3321 = vrot.lane.b32.xlu1 %v4038_v30, %s4641_s8 }
 0x6db   : > { %3315 = vrot.lane.b32.xlu0 %v4035_v4, %s4641_s8 }
 0x6dc   : > { %v4477_v8 = vpop.f32.mrb[112].mxu1 }
 0x6dd   : > { %v4041_v60 = vpack.c.bf16 %v4477_v8, %v4477_v8  ;;  %v3140_v9 = vpop.f32.mrb[113].mxu1  ;;  %3317 = vrot.lane.b32.xlu1 %v4036_v50, %s4641_s8 }
 0x6de   : > { %v4478_v61 = vpop.f32.mrb[114].mxu1  ;;  %v4039_v15 = vpack.c.bf16 %v3140_v9, %v3140_v9 }
 0x6df   : > { %v4042_v62 = vpack.c.bf16 %v4478_v61, %v4478_v61  ;;  %3327 = vrot.lane.b32.xlu0 %v4041_v60, %s4641_s8  ;;  %v3143_v14 = vpop.f32.mrb[115].mxu1 }
 0x6e0   : > { %v4040_v20 = vpack.c.bf16 %v3143_v14, %v3143_v14 }
 0x6e1   : > { %3329 = vrot.lane.b32.xlu1 %v4042_v62, %s4641_s8 }
 0x6e3   : > { %3323 = vrot.lane.b32.xlu0 %v4039_v15, %s4641_s8 }
 0x6e4   : > { %v4481_v21 = vpop.f32.mrb[116].mxu1 }
 0x6e5   : > { %v4045_v28 = vpack.c.bf16 %v4481_v21, %v4481_v21  ;;  %v3156_v31 = vpop.f32.mrb[117].mxu1  ;;  %3325 = vrot.lane.b32.xlu1 %v4040_v20, %s4641_s8 }
 0x6e6   : > { %v4482_v34 = vpop.f32.mrb[118].mxu1  ;;  %v4043_v43 = vpack.c.bf16 %v3156_v31, %v3156_v31 }
 0x6e7   : > { %v4046_v37 = vpack.c.bf16 %v4482_v34, %v4482_v34  ;;  %3335 = vrot.lane.b32.xlu0 %v4045_v28, %s4641_s8  ;;  %v3159_v40 = vpop.f32.mrb[119].mxu1 }
 0x6e8   : > { %v4044_v46 = vpack.c.bf16 %v3159_v40, %v3159_v40 }
 0x6e9   : > { %3337 = vrot.lane.b32.xlu1 %v4046_v37, %s4641_s8 }
 0x6eb   : > { %3331 = vrot.lane.b32.xlu0 %v4043_v43, %s4641_s8 }
 0x6ec   : > { %v4485_v47 = vpop.f32.mrb[120].mxu1 }
 0x6ed   : > { %v3172_v48 = vpop.f32.mrb[121].mxu1  ;;  %3333 = vrot.lane.b32.xlu1 %v4044_v46, %s4641_s8  ;;  %v4049_v51 = vpack.c.bf16 %v4485_v47, %v4485_v47 }
 0x6ee   : > { %v4047_v63 = vpack.c.bf16 %v3172_v48, %v3172_v48  ;;  %v4486_v49 = vpop.f32.mrb[122].mxu1 }
 0x6ef   : > { %v3175_v52 = vpop.f32.mrb[123].mxu1  ;;  %v4050_v53 = vpack.c.bf16 %v4486_v49, %v4486_v49 }
 0x6f0   : > { %v4048_v59 = vpack.c.bf16 %v3175_v52, %v3175_v52  ;;  %3339 = vrot.lane.b32.xlu0 %v4047_v63, %s4641_s8 }
 0x6f2   : > { %3341 = vrot.lane.b32.xlu1 %v4048_v59, %s4641_s8 }
 0x6f4   : > { %3343 = vrot.lane.b32.xlu0 %v4049_v51, %s4641_s8 }
 0x6f6   : > { %3345 = vrot.lane.b32.xlu1 %v4050_v53, %s4641_s8 }
 0x729   : > { %v3288_v57 = vpop.permute.xlu0 %3287 }
 0x72a   : > { %3382 = vst.msk [vmem:[%s5015_s26 + $0x8] sm:$0xf] %vm3379_vm8, %v3288_v57 }
 0x72b   : > { %v3290_v55 = vpop.permute.xlu1 %3289 }
 0x72c   : > { %3383 = vst.msk [vmem:[%s5015_s26 + $0xc] sm:$0xf] %vm3379_vm8, %v3290_v55 }
 0x72d   : > { %v3284_v54 = vpop.permute.xlu0 %3283 }
 0x72e   : > { %3380 = vst.msk [vmem:[%s5015_s26] sm:$0xf] %vm3379_vm8, %v3284_v54 }
 0x72f   : > { %v3286_v58 = vpop.permute.xlu1 %3285 }
 0x730   : > { %3381 = vst.msk [vmem:[%s5015_s26 + $0x4] sm:$0xf] %vm3379_vm8, %v3286_v58 }
 0x731   : > { %v3296_v42 = vpop.permute.xlu0 %3295 }
 0x732   : > { %3386 = vst.msk [vmem:[%s5015_s26 + $0x18] sm:$0xf] %vm3379_vm8, %v3296_v42 }
 0x733   : > { %v3298_v35 = vpop.permute.xlu1 %3297 }
 0x734   : > { %3387 = vst.msk [vmem:[%s5015_s26 + $0x1c] sm:$0xf] %vm3379_vm8, %v3298_v35 }
 0x735   : > { %v3292_v36 = vpop.permute.xlu0 %3291 }
 0x736   : > { %3384 = vst.msk [vmem:[%s5015_s26 + $0x10] sm:$0xf] %vm3379_vm8, %v3292_v36 }
 0x737   : > { %v3294_v41 = vpop.permute.xlu1 %3293 }
 0x738   : > { %3385 = vst.msk [vmem:[%s5015_s26 + $0x14] sm:$0xf] %vm3379_vm8, %v3294_v41 }
 0x739   : > { %v3304_v56 = vpop.permute.xlu0 %3303 }
 0x73a   : > { %3390 = vst.msk [vmem:[%s5015_s26 + $0x28] sm:$0xf] %vm3379_vm8, %v3304_v56 }
 0x73b   : > { %v3306_v1 = vpop.permute.xlu1 %3305 }
 0x73c   : > { %3391 = vst.msk [vmem:[%s5015_s26 + $0x2c] sm:$0xf] %vm3379_vm8, %v3306_v1 }
 0x73d   : > { %v3300_v2 = vpop.permute.xlu0 %3299 }
 0x73e   : > { %3388 = vst.msk [vmem:[%s5015_s26 + $0x20] sm:$0xf] %vm3379_vm8, %v3300_v2 }
 0x73f   : > { %v3302_v3 = vpop.permute.xlu1 %3301 }
 0x740   : > { %3389 = vst.msk [vmem:[%s5015_s26 + $0x24] sm:$0xf] %vm3379_vm8, %v3302_v3 }
 0x741   : > { %v3312_v5 = vpop.permute.xlu0 %3311 }
 0x742   : > { %3394 = vst.msk [vmem:[%s5015_s26 + $0x38] sm:$0xf] %vm3379_vm8, %v3312_v5 }
 0x743   : > { %v3314_v6 = vpop.permute.xlu1 %3313 }
 0x744   : > { %3395 = vst.msk [vmem:[%s5015_s26 + $0x3c] sm:$0xf] %vm3379_vm8, %v3314_v6 }
 0x745   : > { %v3308_v7 = vpop.permute.xlu0 %3307 }
 0x746   : > { %3392 = vst.msk [vmem:[%s5015_s26 + $0x30] sm:$0xf] %vm3379_vm8, %v3308_v7 }
 0x747   : > { %v3310_v10 = vpop.permute.xlu1 %3309 }
 0x748   : > { %3393 = vst.msk [vmem:[%s5015_s26 + $0x34] sm:$0xf] %vm3379_vm8, %v3310_v10 }
 0x749   : > { %v3320_v11 = vpop.permute.xlu0 %3319 }
 0x74a   : > { %3398 = vst.msk [vmem:[%s5015_s26 + $0x48] sm:$0xf] %vm3379_vm8, %v3320_v11 }
 0x74b   : > { %v3322_v12 = vpop.permute.xlu1 %3321 }
 0x74c   : > { %3399 = vst.msk [vmem:[%s5015_s26 + $0x4c] sm:$0xf] %vm3379_vm8, %v3322_v12 }
 0x74d   : > { %v3316_v13 = vpop.permute.xlu0 %3315 }
 0x74e   : > { %3396 = vst.msk [vmem:[%s5015_s26 + $0x40] sm:$0xf] %vm3379_vm8, %v3316_v13 }
 0x74f   : > { %v3318_v16 = vpop.permute.xlu1 %3317 }
 0x750   : > { %3397 = vst.msk [vmem:[%s5015_s26 + $0x44] sm:$0xf] %vm3379_vm8, %v3318_v16 }
 0x751   : > { %v3328_v17 = vpop.permute.xlu0 %3327 }
 0x752   : > { %3402 = vst.msk [vmem:[%s5015_s26 + $0x58] sm:$0xf] %vm3379_vm8, %v3328_v17 }
 0x753   : > { %v3330_v18 = vpop.permute.xlu1 %3329 }
 0x754   : > { %3403 = vst.msk [vmem:[%s5015_s26 + $0x5c] sm:$0xf] %vm3379_vm8, %v3330_v18 }
 0x755   : > { %v3324_v19 = vpop.permute.xlu0 %3323 }
 0x756   : > { %3400 = vst.msk [vmem:[%s5015_s26 + $0x50] sm:$0xf] %vm3379_vm8, %v3324_v19 }
 0x757   : > { %v3326_v22 = vpop.permute.xlu1 %3325 }
 0x758   : > { %3401 = vst.msk [vmem:[%s5015_s26 + $0x54] sm:$0xf] %vm3379_vm8, %v3326_v22 }
 0x759   : > { %v3336_v23 = vpop.permute.xlu0 %3335 }
 0x75a   : > { %3406 = vst.msk [vmem:[%s5015_s26 + $0x68] sm:$0xf] %vm3379_vm8, %v3336_v23 }
 0x75b   : > { %v3338_v24 = vpop.permute.xlu1 %3337 }
 0x75c   : > { %3407 = vst.msk [vmem:[%s5015_s26 + $0x6c] sm:$0xf] %vm3379_vm8, %v3338_v24 }
 0x75d   : > { %v3332_v25 = vpop.permute.xlu0 %3331 }
 0x75e   : > { %3404 = vst.msk [vmem:[%s5015_s26 + $0x60] sm:$0xf] %vm3379_vm8, %v3332_v25 }
 0x75f   : > { %v3334_v26 = vpop.permute.xlu1 %3333 }
 0x760   : > { %3405 = vst.msk [vmem:[%s5015_s26 + $0x64] sm:$0xf] %vm3379_vm8, %v3334_v26 }
 0x762   : > { %v3340_v27 = vpop.permute.xlu0 %3339 }
 0x763   : > { %3408 = vst.msk [vmem:[%s5015_s26 + $0x70] sm:$0xf] %vm3379_vm8, %v3340_v27 }
 0x764   : > { %v3342_v29 = vpop.permute.xlu1 %3341 }
 0x765   : > { %3409 = vst.msk [vmem:[%s5015_s26 + $0x74] sm:$0xf] %vm3379_vm8, %v3342_v29 }
 0x766   : > { %v3344_v32 = vpop.permute.xlu0 %3343 }
 0x767   : > { %3410 = vst.msk [vmem:[%s5015_s26 + $0x78] sm:$0xf] %vm3379_vm8, %v3344_v32 }
 0x768   : > { %v3346_v33 = vpop.permute.xlu1 %3345 }
 0x769   : > { %3411 = vst.msk [vmem:[%s5015_s26 + $0x7c] sm:$0xf] %vm3379_vm8, %v3346_v33 }
 0x76a PF: > { %s16_s21 = sadd.s32 1, %s4634_s21  }
 0x76b   : > { %p13_p4 = scmp.ge.s32.totalorder %s16_s21, 4  }
 0x76d   :  { %15 = sbr.rel (!%p13_p4) target bundleno = 1 (0x1), region = 89 }

</bundles_post_ra>
